<compile_context>
chip_gen: v7x
topology: tpu7x:2x2x1
jax: 0.10.0
libtpu: 0.0.40
codegen_flags: <defaults>
</compile_context>

<pallas_src>
import functools

import numpy as np
import jax
import jax.numpy as jnp
from jax.experimental import pallas as pl
from jax.experimental.pallas import tpu as pltpu

NC = 64       # synthetic encoder output channels (real ResNeXt50 has nc=2048)
NCP = 128     # lane-padded channel width
HID = 512     # head hidden width (matches nn.Linear(2*nc, 512))
NOUTP = 128   # lane-padded head output width
EPS = 1e-5    # BatchNorm1d eps


def _mish_kernel(x):
    # mish(x) = x * tanh(softplus(x)) = x * ((1+e^x)^2 - 1) / ((1+e^x)^2 + 1)
    # single exp; clamp keeps (1+t)^2 finite (for x>20, tanh(softplus(x)) == 1 in f32).
    t = jnp.exp(jnp.minimum(x, 20.0))
    u = (1.0 + t) * (1.0 + t)
    return x * ((u - 1.0) / (u + 1.0))


# ---------------- fused encoder + head kernel ----------------
def fused_kernel(p_ref, we_ref, be_ref, w1m_ref, w1a_ref, b1_ref,
                 w2_ref, b2_ref, o_ref, *, B, S):
    # encoder: one full-M matmul on the MXU, bias + Mish on the VPU/EUP
    feat = jnp.dot(p_ref[...], we_ref[...], preferred_element_type=jnp.float32)
    feat = _mish_kernel(feat + be_ref[...])               # (B*S, NCP), stays in VMEM

    # AdaptiveConcatPool2d per sample (static slices; no HBM traffic)
    inv_s = 1.0 / S
    mx_rows, av_rows = [], []
    for b in range(B):
        fb = feat[b * S:(b + 1) * S, :]                   # (S, NCP)
        mx_rows.append(jnp.max(fb, axis=0, keepdims=True))
        av_rows.append(jnp.sum(fb, axis=0, keepdims=True) * inv_s)
    mx = jnp.concatenate(mx_rows, axis=0)                 # (B, NCP)
    av = jnp.concatenate(av_rows, axis=0)                 # (B, NCP)

    # Linear(2*nc, 512) as two accumulated batched matmuls (no lane concat) + Mish
    h = (jnp.dot(mx, w1m_ref[...], preferred_element_type=jnp.float32)
         + jnp.dot(av, w1a_ref[...], preferred_element_type=jnp.float32)
         + b1_ref[...])
    h = _mish_kernel(h)                                   # (B, HID)

    # BatchNorm1d(eval) is folded into w2/b2; Dropout(0.5) is identity in eval mode.
    # TODO(synk): training-mode dropout / batch statistics not implemented.
    o_ref[...] = (jnp.dot(h, w2_ref[...], preferred_element_type=jnp.float32)
                  + b2_ref[...])                          # (B, NOUTP) lane-dense store


def fused_forward(patches, kp, *, B, S):
    M, K = patches.shape
    assert M == B * S, "patch rows must equal B * S"
    args = (patches, kp["w_enc"], kp["b_enc"], kp["w1_max"], kp["w1_avg"],
            kp["b1"], kp["w2f"], kp["b2f"])

    def full_spec(a):
        nd = a.ndim
        return pl.BlockSpec(a.shape, lambda i, _nd=nd: (0,) * _nd)

    kernel = functools.partial(fused_kernel, B=B, S=S)
    return pl.pallas_call(
        kernel,
        out_shape=jax.ShapeDtypeStruct((B, NOUTP), jnp.float32),
        grid_spec=pltpu.PrefetchScalarGridSpec(
            num_scalar_prefetch=0,
            grid=(1,),
            in_specs=[full_spec(a) for a in args],
            out_specs=pl.BlockSpec((B, NOUTP), lambda i: (0, 0)),
        ),
        compiler_params=pltpu.CompilerParams(
            dimension_semantics=("arbitrary",),
            vmem_limit_bytes=32 * 1024 * 1024,
        ),
    )(*args)


# ---------------- plain-JAX glue ----------------
def im2col_3x3_s4_p1(x):
    """x: (N, C, H, W) NCHW -> (N*Ho*Wo, C*9) patch rows (3x3 conv, stride 4, pad 1)."""
    N, C, H, W = x.shape
    k, s, p = 3, 4, 1
    Ho = (H + 2 * p - k) // s + 1
    Wo = (W + 2 * p - k) // s + 1
    xp = jnp.pad(x, ((0, 0), (0, 0), (p, p), (p, p)))
    cols = []
    for ci in range(C):
        for ky in range(k):
            for kx in range(k):
                cols.append(xp[:, ci,
                               ky:ky + s * (Ho - 1) + 1:s,
                               kx:kx + s * (Wo - 1) + 1:s])
    patches = jnp.stack(cols, axis=-1)             # (N, Ho, Wo, C*9)
    return patches.reshape(N * Ho * Wo, C * k * k), Ho, Wo


def init_params(key, C, n_out):
    ks = jax.random.split(key, 10)
    K = C * 9
    return dict(
        # synthetic encoder conv (OIHW flattened to (C*3*3, NC), stored input-major)
        w_enc=0.1 * jax.random.normal(ks[0], (K, NC), jnp.float32),
        b_enc=0.01 * jax.random.normal(ks[1], (1, NC), jnp.float32),
        # head: Linear(2*NC, 512) stored as (in, out)
        w1=0.05 * jax.random.normal(ks[2], (2 * NC, HID), jnp.float32),
        b1=0.01 * jax.random.normal(ks[3], (1, HID), jnp.float32),
        # BatchNorm1d(512) eval-mode params / running stats
        gamma=1.0 + 0.1 * jax.random.normal(ks[4], (1, HID), jnp.float32),
        beta=0.1 * jax.random.normal(ks[5], (1, HID), jnp.float32),
        rmean=0.05 * jax.random.normal(ks[6], (1, HID), jnp.float32),
        rvar=jnp.abs(1.0 + 0.1 * jax.random.normal(ks[7], (1, HID), jnp.float32)),
        # Linear(512, n) stored as (in, out)
        w2=0.05 * jax.random.normal(ks[8], (HID, n_out), jnp.float32),
        b2=0.01 * jax.random.normal(ks[9], (1, n_out), jnp.float32),
    )


def prepare_kernel_params(p):
    """Pad channels to 128 lanes, split w1, fold eval-mode BN into the final linear."""
    K, nc = p["w_enc"].shape
    hid = p["w1"].shape[1]
    n_out = p["w2"].shape[1]
    w_enc = jnp.zeros((K, NCP), jnp.float32).at[:, :nc].set(p["w_enc"])
    b_enc = jnp.zeros((1, NCP), jnp.float32).at[:, :nc].set(p["b_enc"])
    w1_max = jnp.zeros((NCP, hid), jnp.float32).at[:nc, :].set(p["w1"][:nc, :])
    w1_avg = jnp.zeros((NCP, hid), jnp.float32).at[:nc, :].set(p["w1"][nc:, :])
    # BatchNorm1d(eval): y = (h - rmean) * gamma/sqrt(rvar+eps) + beta; fold into Linear2.
    s = p["gamma"] * jax.lax.rsqrt(p["rvar"] + EPS)                # (1, hid)
    w2_bn = p["w2"] * s.reshape(hid, 1)                            # (hid, n_out)
    b2_bn = p["b2"] + (p["beta"] - p["rmean"] * s) @ p["w2"]       # (1, n_out)
    w2f = jnp.zeros((hid, NOUTP), jnp.float32).at[:, :n_out].set(w2_bn)
    b2f = jnp.zeros((1, NOUTP), jnp.float32).at[:, :n_out].set(b2_bn)
    return dict(w_enc=w_enc, b_enc=b_enc, w1_max=w1_max, w1_avg=w1_avg,
                b1=p["b1"], w2f=w2f, b2f=b2f)


def panda_forward(x_tiles, p):
    """x_tiles: tuple of n arrays, each (B, C, H, W) NCHW (like PyTorch forward(*x))."""
    n = len(x_tiles)
    B, C, H, W = x_tiles[0].shape
    n_out = p["w2"].shape[1]
    # torch.stack(x, 1).view(-1, C, H, W)
    x = jnp.stack(x_tiles, axis=1).reshape(B * n, C, H, W)
    # --- encoder ---
    # TODO(synk): real self.enc is a torch.hub-pretrained ResNeXt50_32x4d_ssl backbone;
    # replaced by a synthetic single 3x3/stride-4 conv + Mish (im2col matmul in the kernel).
    patches, Ho, Wo = im2col_3x3_s4_p1(x)                 # (B*n*Ho*Wo, C*9)
    # PyTorch: view(B,n,nc,h,w).permute(0,2,1,3,4).view(B,nc,n*h,w); the head's adaptive
    # (1,1) pooling is invariant to that permute, so pooling over all n*Ho*Wo rows per
    # sample is equivalent.
    S = n * Ho * Wo
    kp = prepare_kernel_params(p)
    out_padded = fused_forward(patches, kp, B=B, S=S)     # (B, NOUTP)
    return out_padded[:, :n_out]                          # (B, n_out)


def reference_forward(x_tiles, p):
    """Pure-jnp reference for correctness checking."""
    n = len(x_tiles)
    B, C, H, W = x_tiles[0].shape
    x = jnp.stack(x_tiles, axis=1).reshape(B * n, C, H, W)
    patches, Ho, Wo = im2col_3x3_s4_p1(x)
    f = patches @ p["w_enc"] + p["b_enc"]
    f = f * jnp.tanh(jax.nn.softplus(f))
    f = f.reshape(B, n * Ho * Wo, NC)
    mx = f.max(axis=1)
    av = f.mean(axis=1)
    cat = jnp.concatenate([mx, av], axis=1)
    h = cat @ p["w1"] + p["b1"]
    h = h * jnp.tanh(jax.nn.softplus(h))
    h = (h - p["rmean"]) / jnp.sqrt(p["rvar"] + EPS) * p["gamma"] + p["beta"]
    return h @ p["w2"] + p["b2"]


if __name__ == "__main__":
    B, n_tiles, C, H, W, n_out = 2, 6, 3, 32, 32, 6
    key = jax.random.PRNGKey(0)
    kx, kp = jax.random.split(key)
    params = init_params(kp, C, n_out)
    tile_keys = jax.random.split(kx, n_tiles)
    x_tiles = tuple(jax.random.normal(k, (B, C, H, W), jnp.float32) for k in tile_keys)

    out = panda_forward(x_tiles, params)
    out = jax.block_until_ready(out)
    assert out.shape == (B, n_out)

    ref = reference_forward(x_tiles, params)
    np.testing.assert_allclose(np.asarray(out), np.asarray(ref), rtol=2e-3, atol=2e-3)
    print("KERNEL_OK")
</pallas_src>

<mosaic_0001>
module attributes {stable_mosaic.version = 11 : i64} {
  func.func @fused_kernel(%arg0: i32, %arg1: memref<768x27xf32, #tpu.memory_space<vmem>>, %arg2: memref<27x128xf32, #tpu.memory_space<vmem>>, %arg3: memref<1x128xf32, #tpu.memory_space<vmem>>, %arg4: memref<128x512xf32, #tpu.memory_space<vmem>>, %arg5: memref<128x512xf32, #tpu.memory_space<vmem>>, %arg6: memref<1x512xf32, #tpu.memory_space<vmem>>, %arg7: memref<512x128xf32, #tpu.memory_space<vmem>>, %arg8: memref<1x128xf32, #tpu.memory_space<vmem>>, %arg9: memref<2x128xf32, #tpu.memory_space<vmem>>) attributes {dimension_semantics = [#tpu.dimension_semantics<arbitrary>], iteration_bounds = array<i64: 1>, scalar_prefetch = 0 : i64, scratch_operands = 0 : i64, tpu.core_type = #tpu.core_type<tc>, window_params = [{pipeline_mode = #tpu.pipeline_mode<synchronous>, transform_indices = @transform_0, window_bounds = array<i64: 768, 27>}, {pipeline_mode = #tpu.pipeline_mode<synchronous>, transform_indices = @transform_1, window_bounds = array<i64: 27, 128>}, {pipeline_mode = #tpu.pipeline_mode<synchronous>, transform_indices = @transform_2, window_bounds = array<i64: 1, 128>}, {pipeline_mode = #tpu.pipeline_mode<synchronous>, transform_indices = @transform_3, window_bounds = array<i64: 128, 512>}, {pipeline_mode = #tpu.pipeline_mode<synchronous>, transform_indices = @transform_4, window_bounds = array<i64: 128, 512>}, {pipeline_mode = #tpu.pipeline_mode<synchronous>, transform_indices = @transform_5, window_bounds = array<i64: 1, 512>}, {pipeline_mode = #tpu.pipeline_mode<synchronous>, transform_indices = @transform_6, window_bounds = array<i64: 512, 128>}, {pipeline_mode = #tpu.pipeline_mode<synchronous>, transform_indices = @transform_7, window_bounds = array<i64: 1, 128>}, {pipeline_mode = #tpu.pipeline_mode<synchronous>, transform_indices = @transform_8, window_bounds = array<i64: 2, 128>}]} {
    %c0 = arith.constant 0 : index
    %c0_0 = arith.constant 0 : index
    %0 = vector.load %arg1[%c0, %c0_0] : memref<768x27xf32, #tpu.memory_space<vmem>>, vector<768x27xf32>
    %c0_1 = arith.constant 0 : index
    %c0_2 = arith.constant 0 : index
    %1 = vector.load %arg2[%c0_1, %c0_2] : memref<27x128xf32, #tpu.memory_space<vmem>>, vector<27x128xf32>
    %cst = arith.constant dense<0.000000e+00> : vector<768x128xf32>
    %2 = tpu.matmul %0, %1, %cst {dimension_numbers = #tpu.dot_dimension_numbers<[1], [0], [0], [1], [0, 0, 1, 1], [], []>} : vector<768x27xf32>, vector<27x128xf32>, vector<768x128xf32> -> vector<768x128xf32>
    %c0_3 = arith.constant 0 : index
    %c0_4 = arith.constant 0 : index
    %3 = vector.load %arg3[%c0_3, %c0_4] : memref<1x128xf32, #tpu.memory_space<vmem>>, vector<1x128xf32>
    %4 = vector.broadcast %3 : vector<1x128xf32> to vector<768x128xf32>
    %5 = arith.addf %2, %4 : vector<768x128xf32>
    %cst_5 = arith.constant 2.000000e+01 : f32
    %6 = vector.broadcast %cst_5 : f32 to vector<768x128xf32>
    %7 = arith.minimumf %5, %6 : vector<768x128xf32>
    %8 = math.exp %7 : vector<768x128xf32>
    %cst_6 = arith.constant 1.000000e+00 : f32
    %9 = vector.broadcast %cst_6 : f32 to vector<768x128xf32>
    %10 = arith.addf %9, %8 : vector<768x128xf32>
    %cst_7 = arith.constant 1.000000e+00 : f32
    %11 = vector.broadcast %cst_7 : f32 to vector<768x128xf32>
    %12 = arith.addf %11, %8 : vector<768x128xf32>
    %13 = arith.mulf %10, %12 : vector<768x128xf32>
    %cst_8 = arith.constant 1.000000e+00 : f32
    %14 = vector.broadcast %cst_8 : f32 to vector<768x128xf32>
    %15 = arith.subf %13, %14 : vector<768x128xf32>
    %cst_9 = arith.constant 1.000000e+00 : f32
    %16 = vector.broadcast %cst_9 : f32 to vector<768x128xf32>
    %17 = arith.addf %13, %16 : vector<768x128xf32>
    %18 = arith.divf %15, %17 : vector<768x128xf32>
    %19 = arith.mulf %5, %18 : vector<768x128xf32>
    %20 = vector.extract_strided_slice %19 {offsets = [0, 0], sizes = [384, 128], strides = [1, 1]} : vector<768x128xf32> to vector<384x128xf32>
    %cst_10 = arith.constant dense<0xFF800000> : vector<128xf32>
    %21 = vector.multi_reduction <maximumf>, %20, %cst_10 [0] : vector<384x128xf32> to vector<128xf32>
    %22 = vector.shape_cast %21 : vector<128xf32> to vector<1x128xf32>
    %cst_11 = arith.constant dense<0.000000e+00> : vector<128xf32>
    %23 = vector.multi_reduction <add>, %20, %cst_11 [0] : vector<384x128xf32> to vector<128xf32>
    %24 = vector.shape_cast %23 : vector<128xf32> to vector<1x128xf32>
    %cst_12 = arith.constant 0.00260416674 : f32
    %25 = vector.broadcast %cst_12 : f32 to vector<1x128xf32>
    %26 = arith.mulf %24, %25 : vector<1x128xf32>
    %27 = vector.extract_strided_slice %19 {offsets = [384, 0], sizes = [384, 128], strides = [1, 1]} : vector<768x128xf32> to vector<384x128xf32>
    %cst_13 = arith.constant dense<0xFF800000> : vector<128xf32>
    %28 = vector.multi_reduction <maximumf>, %27, %cst_13 [0] : vector<384x128xf32> to vector<128xf32>
    %29 = vector.shape_cast %28 : vector<128xf32> to vector<1x128xf32>
    %cst_14 = arith.constant dense<0.000000e+00> : vector<128xf32>
    %30 = vector.multi_reduction <add>, %27, %cst_14 [0] : vector<384x128xf32> to vector<128xf32>
    %31 = vector.shape_cast %30 : vector<128xf32> to vector<1x128xf32>
    %cst_15 = arith.constant 0.00260416674 : f32
    %32 = vector.broadcast %cst_15 : f32 to vector<1x128xf32>
    %33 = arith.mulf %31, %32 : vector<1x128xf32>
    %34 = tpu.concatenate %22, %29 in 0 : vector<1x128xf32>, vector<1x128xf32> -> vector<2x128xf32>
    %35 = tpu.concatenate %26, %33 in 0 : vector<1x128xf32>, vector<1x128xf32> -> vector<2x128xf32>
    %c0_16 = arith.constant 0 : index
    %c0_17 = arith.constant 0 : index
    %36 = vector.load %arg4[%c0_16, %c0_17] : memref<128x512xf32, #tpu.memory_space<vmem>>, vector<128x512xf32>
    %cst_18 = arith.constant dense<0.000000e+00> : vector<2x512xf32>
    %37 = tpu.matmul %34, %36, %cst_18 {dimension_numbers = #tpu.dot_dimension_numbers<[1], [0], [0], [1], [0, 0, 1, 1], [], []>} : vector<2x128xf32>, vector<128x512xf32>, vector<2x512xf32> -> vector<2x512xf32>
    %c0_19 = arith.constant 0 : index
    %c0_20 = arith.constant 0 : index
    %38 = vector.load %arg5[%c0_19, %c0_20] : memref<128x512xf32, #tpu.memory_space<vmem>>, vector<128x512xf32>
    %cst_21 = arith.constant dense<0.000000e+00> : vector<2x512xf32>
    %39 = tpu.matmul %35, %38, %cst_21 {dimension_numbers = #tpu.dot_dimension_numbers<[1], [0], [0], [1], [0, 0, 1, 1], [], []>} : vector<2x128xf32>, vector<128x512xf32>, vector<2x512xf32> -> vector<2x512xf32>
    %40 = arith.addf %37, %39 : vector<2x512xf32>
    %c0_22 = arith.constant 0 : index
    %c0_23 = arith.constant 0 : index
    %41 = vector.load %arg6[%c0_22, %c0_23] : memref<1x512xf32, #tpu.memory_space<vmem>>, vector<1x512xf32>
    %42 = vector.broadcast %41 : vector<1x512xf32> to vector<2x512xf32>
    %43 = arith.addf %40, %42 : vector<2x512xf32>
    %cst_24 = arith.constant 2.000000e+01 : f32
    %44 = vector.broadcast %cst_24 : f32 to vector<2x512xf32>
    %45 = arith.minimumf %43, %44 : vector<2x512xf32>
    %46 = math.exp %45 : vector<2x512xf32>
    %cst_25 = arith.constant 1.000000e+00 : f32
    %47 = vector.broadcast %cst_25 : f32 to vector<2x512xf32>
    %48 = arith.addf %47, %46 : vector<2x512xf32>
    %cst_26 = arith.constant 1.000000e+00 : f32
    %49 = vector.broadcast %cst_26 : f32 to vector<2x512xf32>
    %50 = arith.addf %49, %46 : vector<2x512xf32>
    %51 = arith.mulf %48, %50 : vector<2x512xf32>
    %cst_27 = arith.constant 1.000000e+00 : f32
    %52 = vector.broadcast %cst_27 : f32 to vector<2x512xf32>
    %53 = arith.subf %51, %52 : vector<2x512xf32>
    %cst_28 = arith.constant 1.000000e+00 : f32
    %54 = vector.broadcast %cst_28 : f32 to vector<2x512xf32>
    %55 = arith.addf %51, %54 : vector<2x512xf32>
    %56 = arith.divf %53, %55 : vector<2x512xf32>
    %57 = arith.mulf %43, %56 : vector<2x512xf32>
    %c0_29 = arith.constant 0 : index
    %c0_30 = arith.constant 0 : index
    %58 = vector.load %arg7[%c0_29, %c0_30] : memref<512x128xf32, #tpu.memory_space<vmem>>, vector<512x128xf32>
    %cst_31 = arith.constant dense<0.000000e+00> : vector<2x128xf32>
    %59 = tpu.matmul %57, %58, %cst_31 {dimension_numbers = #tpu.dot_dimension_numbers<[1], [0], [0], [1], [0, 0, 1, 1], [], []>} : vector<2x512xf32>, vector<512x128xf32>, vector<2x128xf32> -> vector<2x128xf32>
    %c0_32 = arith.constant 0 : index
    %c0_33 = arith.constant 0 : index
    %60 = vector.load %arg8[%c0_32, %c0_33] : memref<1x128xf32, #tpu.memory_space<vmem>>, vector<1x128xf32>
    %61 = vector.broadcast %60 : vector<1x128xf32> to vector<2x128xf32>
    %62 = arith.addf %59, %61 : vector<2x128xf32>
    %c0_34 = arith.constant 0 : index
    %c0_35 = arith.constant 0 : index
    %63 = vector.load %arg9[%c0_34, %c0_35] : memref<2x128xf32, #tpu.memory_space<vmem>>, vector<2x128xf32>
    tpu.vector_store %arg9[%c0_34, %c0_35], %62 {strides = array<i32>} : memref<2x128xf32, #tpu.memory_space<vmem>>, vector<2x128xf32>,
    return
  }
  func.func @transform_0(%arg0: i32) -> (i32, i32) {
    %c0_i32 = arith.constant 0 : i32
    %c0_i32_0 = arith.constant 0 : i32
    %c0_i32_1 = arith.constant 0 : i32
    return %c0_i32, %c0_i32_0 : i32, i32
  }
  func.func @transform_1(%arg0: i32) -> (i32, i32) {
    %c0_i32 = arith.constant 0 : i32
    %c0_i32_0 = arith.constant 0 : i32
    %c0_i32_1 = arith.constant 0 : i32
    return %c0_i32, %c0_i32_0 : i32, i32
  }
  func.func @transform_2(%arg0: i32) -> (i32, i32) {
    %c0_i32 = arith.constant 0 : i32
    %c0_i32_0 = arith.constant 0 : i32
    %c0_i32_1 = arith.constant 0 : i32
    return %c0_i32, %c0_i32_0 : i32, i32
  }
  func.func @transform_3(%arg0: i32) -> (i32, i32) {
    %c0_i32 = arith.constant 0 : i32
    %c0_i32_0 = arith.constant 0 : i32
    %c0_i32_1 = arith.constant 0 : i32
    return %c0_i32, %c0_i32_0 : i32, i32
  }
  func.func @transform_4(%arg0: i32) -> (i32, i32) {
    %c0_i32 = arith.constant 0 : i32
    %c0_i32_0 = arith.constant 0 : i32
    %c0_i32_1 = arith.constant 0 : i32
    return %c0_i32, %c0_i32_0 : i32, i32
  }
  func.func @transform_5(%arg0: i32) -> (i32, i32) {
    %c0_i32 = arith.constant 0 : i32
    %c0_i32_0 = arith.constant 0 : i32
    %c0_i32_1 = arith.constant 0 : i32
    return %c0_i32, %c0_i32_0 : i32, i32
  }
  func.func @transform_6(%arg0: i32) -> (i32, i32) {
    %c0_i32 = arith.constant 0 : i32
    %c0_i32_0 = arith.constant 0 : i32
    %c0_i32_1 = arith.constant 0 : i32
    return %c0_i32, %c0_i32_0 : i32, i32
  }
  func.func @transform_7(%arg0: i32) -> (i32, i32) {
    %c0_i32 = arith.constant 0 : i32
    %c0_i32_0 = arith.constant 0 : i32
    %c0_i32_1 = arith.constant 0 : i32
    return %c0_i32, %c0_i32_0 : i32, i32
  }
  func.func @transform_8(%arg0: i32) -> (i32, i32) {
    %c0_i32 = arith.constant 0 : i32
    %c0_i32_0 = arith.constant 0 : i32
    %c0_i32_1 = arith.constant 0 : i32
    return %c0_i32, %c0_i32_0 : i32, i32
  }
}

</mosaic_0001>

<bundles_post_ra>
// kernel: tpu_custom_call.1
= control target key start
LH: loop header
LB: loop body
LE: loop exit
PB: predicated region body
PF: predicated region fallthrough
CT: control target
= control target key end

     0   :  { %13 = vsyncpa [#allocation3], 0  ;;  %s5903_s0 = inlined_call_operand.vmem [shape: f32[768,27], index: 0, kind: input, shape index: {}]   ;;  %s5904_s1 = inlined_call_operand.vmem [shape: f32[27,128], index: 1, kind: input, shape index: {}]   ;;  %s5905_s2 = inlined_call_operand.vmem [shape: f32[1,128], index: 2, kind: input, shape index: {}]   ;;  %s5906_s3 = inlined_call_operand.vmem [shape: f32[128,512], index: 3, kind: input, shape index: {}]   ;;  %s5907_s4 = inlined_call_operand.hbm [shape: f32[128,512], index: 4, kind: input, shape index: {}]   ;;  %s5908_s5 = inlined_call_operand.vmem [shape: f32[1,512], index: 5, kind: input, shape index: {}]   ;;  %s5909_s6 = inlined_call_operand.hbm [shape: f32[512,128], index: 6, kind: input, shape index: {}]   ;;  %s5910_s7 = inlined_call_operand.vmem [shape: f32[1,128], index: 7, kind: input, shape index: {}]   ;;  %s5911_s8 = inlined_call_operand.hbm [shape: f32[2,128], index: 8, kind: output, shape index: {}]  }
   0x1   :  { %14 = vsyncpa [#allocation6], 0 }
   0x2   :  { %15 = vsyncpa [#allocation4], 0  ;;  %s4096_s27 = smov [#allocation2]   ;;  %s4024_s9 = scalar_lea.hbm %s5907_s4, 8192 }
   0x3   :  { %s29_s28 = sshll.u32 %s4096_s27, 4  ;;  %p4025_p0 = scmp.ne.s32.totalorder %s5907_s4, %s4024_s9  ;;  %s30_s28 = int_to_ptr.vmem [resolvable:$true] %s29_s28 }
   0x4   :  { %p4028_p1 = scmp.lt.u32.totalorder %s4024_s9, %s5907_s4 }
   0x6   :  { %p4030_p2 = pnand %p4028_p1, %p4025_p0 }
   0x8   :  { %4033 = shalt.err (!%p4030_p2)
}
   0x9   :  { %s4034_s14 = scalar_lea.vmem %s30_s28, 8192  ;;  %p4039_p4 = scmp.lt.s32.totalorder %s30_s28, %s30_s28 }
   0xa   :  { %p4035_p3 = scmp.ne.s32.totalorder %s30_s28, %s4034_s14  ;;  %p4040_p5 = scmp.lt.s32.totalorder %s4034_s14, %s4034_s14 }
   0xc   :  { %p4041_p6 = por %p4040_p5, %p4039_p4 }
   0xe   :  { %p4042_p7 = pnand %p4041_p6, %p4035_p3 }
  0x10   :  { %4045 = shalt.err (!%p4042_p7)
}
  0x11   :  { %s4097_s15 = smov 512   ;;  %s4098_s16 = smov 32  }
  0x12   :  { %35 = dma.hbm_to_vmem [thread:$0]  %s5907_s4, 8192, %s30_s28, [#allocation3], %s4097_s15, %s4097_s15, %s4098_s16  }
  0x13   :  { %s4099_s19 = smov [#allocation5]   ;;  %s4046_s23 = scalar_lea.hbm %s5909_s6, 8192 }
  0x14   :  { %s43_s20 = sshll.u32 %s4099_s19, 4  ;;  %p4047_p8 = scmp.ne.s32.totalorder %s5909_s6, %s4046_s23  ;;  %s44_s20 = int_to_ptr.vmem [resolvable:$true] %s43_s20 }
  0x15   :  { %p4050_p9 = scmp.lt.u32.totalorder %s4046_s23, %s5909_s6 }
  0x17   :  { %p4052_p10 = pnand %p4050_p9, %p4047_p8 }
  0x19   :  { %4055 = shalt.err (!%p4052_p10)
}
  0x1a   :  { %s4056_s29 = scalar_lea.vmem %s44_s20, 8192  ;;  %p4061_p12 = scmp.lt.s32.totalorder %s44_s20, %s44_s20 }
  0x1b   :  { %p4057_p11 = scmp.ne.s32.totalorder %s44_s20, %s4056_s29  ;;  %p4062_p13 = scmp.lt.s32.totalorder %s4056_s29, %s4056_s29 }
  0x1d   :  { %p4063_p0 = por %p4062_p13, %p4061_p12 }
  0x1f   :  { %p4064_p1 = pnand %p4063_p0, %p4057_p11 }
  0x21   :  { %4067 = shalt.err (!%p4064_p1)
}
  0x22   :  { %s4100_s4 = smov 128   ;;  %s4101_s28 = smov 8  }
  0x23   :  { %49 = dma.hbm_to_vmem [thread:$0]  %s5909_s6, 8192, %s44_s20, [#allocation6], %s4100_s4, %s4100_s4, %s4101_s28  }
  0x24   :  { %4090 = dma.done.wait [#allocation3], 8192  }
  0x25   :  { %4091 = vsyncadd [#allocation3], 4294959104 }
  0x26   :  { %4092 = dma.done.wait [#allocation6], 8192  }
  0x27   :  { %4093 = vsyncadd [#allocation6], 4294959104  ;;  %vm454_vm0 = vcmask 1042432   ;;  %vm165_vm1 = vcmask 220160   ;;  %v154_v0 = vld [vmem:[%s5904_s1] sm:$0xff]  ;;  %v155_v1 = vld [vmem:[%s5904_s1 + $0x8] sm:$0xff] }
  0x28   :  { %v156_v2 = vld [vmem:[%s5904_s1 + $0x10] sm:$0xff]  ;;  %v3407_v3 = vpack.c.bf16 %v155_v1, %v154_v0  ;;  %v157_v4 = vld [vmem:[%s5904_s1 + $0x18] sm:$0x7]  ;;  %v58_v5 = vld [vmem:[%s5903_s0] sm:$0xff]  ;;  %vm4102_vm2 = vmmov 1   ;;  %vm2177_vm4 = vcmask 1040384  }
  0x29   :  { %v3411_v6 = vpack.c.bf16 %v157_v4, %v156_v2  ;;  %vm3412_vm3 = vmpackc.low %vm454_vm0, %vm4102_vm2  ;;  %3263 = vmatprep.mubr.msk.f32.mxu0 %vm165_vm1, %v58_v5  ;;  %v59_v7 = vld [vmem:[%s5903_s0 + $0x8] sm:$0xff]  ;;  %v60_v8 = vld [vmem:[%s5903_s0 + $0x10] sm:$0xff]  ;;  %s4104_s11 = smov [#allocation7]  }
  0x2a   :  { %3408 = vmatprep.subr.bf16.mxu0 %v3407_v3  ;;  %v61_v9 = vld [vmem:[%s5903_s0 + $0x18] sm:$0xff]  ;;  %v62_v10 = vld [vmem:[%s5903_s0 + $0x20] sm:$0xff]  ;;  %v63_v11 = vld [vmem:[%s5903_s0 + $0x28] sm:$0xff] }
  0x2b   :  { %3410 = vmatpush3.bf16.msra.mxu0 %v3407_v3  ;;  %v64_v12 = vld [vmem:[%s5903_s0 + $0x30] sm:$0xff]  ;;  %v65_v13 = vld [vmem:[%s5903_s0 + $0x38] sm:$0xff]  ;;  %v66_v14 = vld [vmem:[%s5903_s0 + $0x40] sm:$0xff] }
  0x2c   :  { %3413 = vmatprep.subr.msk.bf16.mxu0 %vm3412_vm3, %v3411_v6  ;;  %v67_v15 = vld [vmem:[%s5903_s0 + $0x48] sm:$0xff]  ;;  %v68_v16 = vld [vmem:[%s5903_s0 + $0x50] sm:$0xff]  ;;  %v69_v17 = vld [vmem:[%s5903_s0 + $0x58] sm:$0xff] }
  0x2d   :  { %v70_v18 = vld [vmem:[%s5903_s0 + $0x60] sm:$0xff]  ;;  %v71_v19 = vld [vmem:[%s5903_s0 + $0x68] sm:$0xff]  ;;  %v72_v20 = vld [vmem:[%s5903_s0 + $0x70] sm:$0xff] }
  0x2e   :  { %v73_v21 = vld [vmem:[%s5903_s0 + $0x78] sm:$0xff]  ;;  %v74_v22 = vld [vmem:[%s5903_s0 + $0x80] sm:$0xff]  ;;  %v75_v23 = vld [vmem:[%s5903_s0 + $0x88] sm:$0xff] }
  0x2f   :  { %3416 = vmatpush3.bf16.msk.msra.mxu0 %vm3412_vm3, %v3411_v6  ;;  %v76_v24 = vld [vmem:[%s5903_s0 + $0x90] sm:$0xff]  ;;  %v77_v25 = vld [vmem:[%s5903_s0 + $0x98] sm:$0xff]  ;;  %v78_v26 = vld [vmem:[%s5903_s0 + $0xa0] sm:$0xff] }
  0x30   :  { %v79_v27 = vld [vmem:[%s5903_s0 + $0xa8] sm:$0xff]  ;;  %v80_v28 = vld [vmem:[%s5903_s0 + $0xb0] sm:$0xff]  ;;  %v81_v29 = vld [vmem:[%s5903_s0 + $0xb8] sm:$0xff] }
  0x31   :  { %v82_v30 = vld [vmem:[%s5903_s0 + $0xc0] sm:$0xff]  ;;  %v83_v31 = vld [vmem:[%s5903_s0 + $0xc8] sm:$0xff]  ;;  %v84_v32 = vld [vmem:[%s5903_s0 + $0xd0] sm:$0xff] }
  0x32   :  { %3264 = vmatmul.mubr.msk.f32.vlgmr.msra.gmra.mrb[0].mxu0 %vm165_vm1, %v59_v7  ;;  %v85_v33 = vld [vmem:[%s5903_s0 + $0xd8] sm:$0xff]  ;;  %v86_v34 = vld [vmem:[%s5903_s0 + $0xe0] sm:$0xff]  ;;  %v87_v35 = vld [vmem:[%s5903_s0 + $0xe8] sm:$0xff] }
  0x33   :  { %3266 = vmatprep.mubr.msk.f32.mxu0 %vm165_vm1, %v60_v8  ;;  %v88_v36 = vld [vmem:[%s5903_s0 + $0xf0] sm:$0xff]  ;;  %v89_v37 = vld [vmem:[%s5903_s0 + $0xf8] sm:$0xff]  ;;  %v90_v38 = vld [vmem:[%s5903_s0 + $0x100] sm:$0xff] }
  0x34   :  { %v91_v39 = vld [vmem:[%s5903_s0 + $0x108] sm:$0xff]  ;;  %v92_v40 = vld [vmem:[%s5903_s0 + $0x110] sm:$0xff]  ;;  %v93_v41 = vld [vmem:[%s5903_s0 + $0x118] sm:$0xff] }
  0x35   :  { %v94_v42 = vld [vmem:[%s5903_s0 + $0x120] sm:$0xff]  ;;  %v95_v43 = vld [vmem:[%s5903_s0 + $0x128] sm:$0xff]  ;;  %v96_v44 = vld [vmem:[%s5903_s0 + $0x130] sm:$0xff] }
  0x36   :  { %3267 = vmatmul.mubr.msk.f32.gmra.mrb[2].mxu0 %vm165_vm1, %v61_v9  ;;  %v97_v45 = vld [vmem:[%s5903_s0 + $0x138] sm:$0xff]  ;;  %v98_v46 = vld [vmem:[%s5903_s0 + $0x140] sm:$0xff]  ;;  %v99_v47 = vld [vmem:[%s5903_s0 + $0x148] sm:$0xff] }
  0x37   :  { %3269 = vmatprep.mubr.msk.f32.mxu0 %vm165_vm1, %v62_v10  ;;  %v100_v48 = vld [vmem:[%s5903_s0 + $0x150] sm:$0xff]  ;;  %v101_v49 = vld [vmem:[%s5903_s0 + $0x158] sm:$0xff]  ;;  %v102_v50 = vld [vmem:[%s5903_s0 + $0x160] sm:$0xff] }
  0x38   :  { %v103_v51 = vld [vmem:[%s5903_s0 + $0x168] sm:$0xff]  ;;  %v104_v52 = vld [vmem:[%s5903_s0 + $0x170] sm:$0xff]  ;;  %v105_v53 = vld [vmem:[%s5903_s0 + $0x178] sm:$0xff] }
  0x39   :  { %v106_v54 = vld [vmem:[%s5903_s0 + $0x180] sm:$0xff]  ;;  %v107_v55 = vld [vmem:[%s5903_s0 + $0x188] sm:$0xff]  ;;  %v108_v56 = vld [vmem:[%s5903_s0 + $0x190] sm:$0xff] }
  0x3a   :  { %3270 = vmatmul.mubr.msk.f32.gmra.mrb[4].mxu0 %vm165_vm1, %v63_v11  ;;  %v109_v57 = vld [vmem:[%s5903_s0 + $0x198] sm:$0xff]  ;;  %v110_v58 = vld [vmem:[%s5903_s0 + $0x1a0] sm:$0xff]  ;;  %v111_v59 = vld [vmem:[%s5903_s0 + $0x1a8] sm:$0xff] }
  0x3b   :  { %3272 = vmatprep.mubr.msk.f32.mxu0 %vm165_vm1, %v64_v12  ;;  %v112_v60 = vld [vmem:[%s5903_s0 + $0x1b0] sm:$0xff]  ;;  %v113_v61 = vld [vmem:[%s5903_s0 + $0x1b8] sm:$0xff]  ;;  %v114_v62 = vld [vmem:[%s5903_s0 + $0x1c0] sm:$0xff] }
  0x3c   :  { %v115_v63 = vld [vmem:[%s5903_s0 + $0x1c8] sm:$0xff]  ;;  %v116_v0 = vld [vmem:[%s5903_s0 + $0x1d0] sm:$0xff]  ;;  %v117_v1 = vld [vmem:[%s5903_s0 + $0x1d8] sm:$0xff] }
  0x3d   :  { %v118_v2 = vld [vmem:[%s5903_s0 + $0x1e0] sm:$0xff]  ;;  %v119_v3 = vld [vmem:[%s5903_s0 + $0x1e8] sm:$0xff]  ;;  %v120_v4 = vld [vmem:[%s5903_s0 + $0x1f0] sm:$0xff] }
  0x3e   :  { %3273 = vmatmul.mubr.msk.f32.gmra.mrb[6].mxu0 %vm165_vm1, %v65_v13  ;;  %v121_v5 = vld [vmem:[%s5903_s0 + $0x1f8] sm:$0xff]  ;;  %v122_v6 = vld [vmem:[%s5903_s0 + $0x200] sm:$0xff]  ;;  %v123_v7 = vld [vmem:[%s5903_s0 + $0x208] sm:$0xff] }
  0x3f   :  { %3275 = vmatprep.mubr.msk.f32.mxu0 %vm165_vm1, %v66_v14  ;;  %v124_v8 = vld [vmem:[%s5903_s0 + $0x210] sm:$0xff]  ;;  %v125_v9 = vld [vmem:[%s5903_s0 + $0x218] sm:$0xff]  ;;  %v126_v10 = vld [vmem:[%s5903_s0 + $0x220] sm:$0xff] }
  0x40   :  { %v127_v11 = vld [vmem:[%s5903_s0 + $0x228] sm:$0xff]  ;;  %v128_v12 = vld [vmem:[%s5903_s0 + $0x230] sm:$0xff]  ;;  %v129_v13 = vld [vmem:[%s5903_s0 + $0x238] sm:$0xff] }
  0x41   :  { %v130_v14 = vld [vmem:[%s5903_s0 + $0x240] sm:$0xff] }
  0x42   :  { %3276 = vmatmul.mubr.msk.f32.gmra.mrb[8].mxu0 %vm165_vm1, %v67_v15  ;;  %v131_v15 = vld [vmem:[%s5903_s0 + $0x248] sm:$0xff] }
  0x43   :  { %3278 = vmatprep.mubr.msk.f32.mxu0 %vm165_vm1, %v68_v16  ;;  %v132_v16 = vld [vmem:[%s5903_s0 + $0x250] sm:$0xff] }
  0x46   :  { %3279 = vmatmul.mubr.msk.f32.gmra.mrb[10].mxu0 %vm165_vm1, %v69_v17  ;;  %v133_v17 = vld [vmem:[%s5903_s0 + $0x258] sm:$0xff] }
  0x47   :  { %3281 = vmatprep.mubr.msk.f32.mxu0 %vm165_vm1, %v70_v18  ;;  %v134_v18 = vld [vmem:[%s5903_s0 + $0x260] sm:$0xff] }
  0x4a   :  { %3282 = vmatmul.mubr.msk.f32.gmra.mrb[12].mxu0 %vm165_vm1, %v71_v19  ;;  %v135_v19 = vld [vmem:[%s5903_s0 + $0x268] sm:$0xff] }
  0x4b   :  { %3284 = vmatprep.mubr.msk.f32.mxu0 %vm165_vm1, %v72_v20  ;;  %v136_v20 = vld [vmem:[%s5903_s0 + $0x270] sm:$0xff] }
  0x4e   :  { %3285 = vmatmul.mubr.msk.f32.gmra.mrb[14].mxu0 %vm165_vm1, %v73_v21  ;;  %v137_v21 = vld [vmem:[%s5903_s0 + $0x278] sm:$0xff] }
  0x4f   :  { %3287 = vmatprep.mubr.msk.f32.mxu0 %vm165_vm1, %v74_v22  ;;  %v138_v22 = vld [vmem:[%s5903_s0 + $0x280] sm:$0xff] }
  0x52   :  { %3288 = vmatmul.mubr.msk.f32.gmra.mrb[16].mxu0 %vm165_vm1, %v75_v23  ;;  %v139_v23 = vld [vmem:[%s5903_s0 + $0x288] sm:$0xff] }
  0x53   :  { %3290 = vmatprep.mubr.msk.f32.mxu0 %vm165_vm1, %v76_v24  ;;  %v140_v24 = vld [vmem:[%s5903_s0 + $0x290] sm:$0xff] }
  0x56   :  { %3291 = vmatmul.mubr.msk.f32.gmra.mrb[18].mxu0 %vm165_vm1, %v77_v25  ;;  %v141_v25 = vld [vmem:[%s5903_s0 + $0x298] sm:$0xff] }
  0x57   :  { %3293 = vmatprep.mubr.msk.f32.mxu0 %vm165_vm1, %v78_v26  ;;  %v142_v26 = vld [vmem:[%s5903_s0 + $0x2a0] sm:$0xff] }
  0x5a   :  { %3294 = vmatmul.mubr.msk.f32.gmra.mrb[20].mxu0 %vm165_vm1, %v79_v27  ;;  %v143_v27 = vld [vmem:[%s5903_s0 + $0x2a8] sm:$0xff] }
  0x5b   :  { %3296 = vmatprep.mubr.msk.f32.mxu0 %vm165_vm1, %v80_v28  ;;  %v144_v28 = vld [vmem:[%s5903_s0 + $0x2b0] sm:$0xff] }
  0x5e   :  { %3297 = vmatmul.mubr.msk.f32.gmra.mrb[22].mxu0 %vm165_vm1, %v81_v29  ;;  %v145_v29 = vld [vmem:[%s5903_s0 + $0x2b8] sm:$0xff] }
  0x5f   :  { %3299 = vmatprep.mubr.msk.f32.mxu0 %vm165_vm1, %v82_v30  ;;  %v146_v30 = vld [vmem:[%s5903_s0 + $0x2c0] sm:$0xff] }
  0x62   :  { %3300 = vmatmul.mubr.msk.f32.gmra.mrb[24].mxu0 %vm165_vm1, %v83_v31  ;;  %v147_v31 = vld [vmem:[%s5903_s0 + $0x2c8] sm:$0xff] }
  0x63   :  { %3302 = vmatprep.mubr.msk.f32.mxu0 %vm165_vm1, %v84_v32  ;;  %v148_v32 = vld [vmem:[%s5903_s0 + $0x2d0] sm:$0xff] }
  0x66   :  { %3303 = vmatmul.mubr.msk.f32.gmra.mrb[26].mxu0 %vm165_vm1, %v85_v33  ;;  %v149_v33 = vld [vmem:[%s5903_s0 + $0x2d8] sm:$0xff] }
  0x67   :  { %3305 = vmatprep.mubr.msk.f32.mxu0 %vm165_vm1, %v86_v34  ;;  %v150_v34 = vld [vmem:[%s5903_s0 + $0x2e0] sm:$0xff] }
  0x6a   :  { %3306 = vmatmul.mubr.msk.f32.gmra.mrb[28].mxu0 %vm165_vm1, %v87_v35  ;;  %v151_v35 = vld [vmem:[%s5903_s0 + $0x2e8] sm:$0xff] }
  0x6b   :  { %3308 = vmatprep.mubr.msk.f32.mxu0 %vm165_vm1, %v88_v36  ;;  %v152_v36 = vld [vmem:[%s5903_s0 + $0x2f0] sm:$0xff] }
  0x6e   :  { %3309 = vmatmul.mubr.msk.f32.gmra.mrb[30].mxu0 %vm165_vm1, %v89_v37  ;;  %v153_v37 = vld [vmem:[%s5903_s0 + $0x2f8] sm:$0xff]  ;;  %s2876_s0 = sshll.u32 %s4104_s11, 4  ;;  %s2877_s0 = int_to_ptr.vmem [resolvable:$true] %s2876_s0 }
  0x6f   :  { %3311 = vmatprep.mubr.msk.f32.mxu0 %vm165_vm1, %v90_v38  ;;  %v4573_v38 = vld [vmem:[%s5905_s2] ss:$0 sm:$0xff]  ;;  %s4068_s12 = scalar_lea.vmem %s2877_s0, 32  ;;  %p4073_p3 = scmp.lt.s32.totalorder %s2877_s0, %s2877_s0 }
  0x70   :  { %p4069_p2 = scmp.ne.s32.totalorder %s2877_s0, %s4068_s12  ;;  %p4074_p4 = scmp.lt.s32.totalorder %s4068_s12, %s4068_s12 }
  0x72   :  { %3312 = vmatmul.mubr.msk.f32.gmra.mrb[32].mxu0 %vm165_vm1, %v91_v39  ;;  %p4075_p5 = por %p4074_p4, %p4073_p3 }
  0x73   :  { %3314 = vmatprep.mubr.msk.f32.mxu0 %vm165_vm1, %v92_v40 }
  0x74   :  { %p4076_p6 = pnand %p4075_p5, %p4069_p2 }
  0x76   :  { %3315 = vmatmul.mubr.msk.f32.gmra.mrb[34].mxu0 %vm165_vm1, %v93_v41 }
  0x77   :  { %3317 = vmatprep.mubr.msk.f32.mxu0 %vm165_vm1, %v94_v42 }
  0x7a   :  { %3318 = vmatmul.mubr.msk.f32.gmra.mrb[36].mxu0 %vm165_vm1, %v95_v43 }
  0x7b   :  { %3320 = vmatprep.mubr.msk.f32.mxu0 %vm165_vm1, %v96_v44 }
  0x7e   :  { %3321 = vmatmul.mubr.msk.f32.gmra.mrb[38].mxu0 %vm165_vm1, %v97_v45 }
  0x7f   :  { %3323 = vmatprep.mubr.msk.f32.mxu0 %vm165_vm1, %v98_v46 }
  0x82   :  { %3324 = vmatmul.mubr.msk.f32.gmra.mrb[40].mxu0 %vm165_vm1, %v99_v47 }
  0x83   :  { %3326 = vmatprep.mubr.msk.f32.mxu0 %vm165_vm1, %v100_v48 }
  0x86   :  { %3327 = vmatmul.mubr.msk.f32.gmra.mrb[42].mxu0 %vm165_vm1, %v101_v49 }
  0x87   :  { %3329 = vmatprep.mubr.msk.f32.mxu0 %vm165_vm1, %v102_v50 }
  0x8a   :  { %3330 = vmatmul.mubr.msk.f32.gmra.mrb[44].mxu0 %vm165_vm1, %v103_v51 }
  0x8b   :  { %3332 = vmatprep.mubr.msk.f32.mxu0 %vm165_vm1, %v104_v52 }
  0x8e   :  { %3333 = vmatmul.mubr.msk.f32.gmra.mrb[46].mxu0 %vm165_vm1, %v105_v53 }
  0x8f   :  { %3335 = vmatprep.mubr.msk.f32.mxu0 %vm165_vm1, %v106_v54 }
  0x92   :  { %3336 = vmatmul.mubr.msk.f32.gmra.mrb[48].mxu0 %vm165_vm1, %v107_v55 }
  0x93   :  { %3338 = vmatprep.mubr.msk.f32.mxu0 %vm165_vm1, %v108_v56 }
  0x96   :  { %3339 = vmatmul.mubr.msk.f32.gmra.mrb[50].mxu0 %vm165_vm1, %v109_v57 }
  0x97   :  { %3341 = vmatprep.mubr.msk.f32.mxu0 %vm165_vm1, %v110_v58 }
  0x9a   :  { %3342 = vmatmul.mubr.msk.f32.gmra.mrb[52].mxu0 %vm165_vm1, %v111_v59 }
  0x9b   :  { %3344 = vmatprep.mubr.msk.f32.mxu0 %vm165_vm1, %v112_v60 }
  0x9e   :  { %3345 = vmatmul.mubr.msk.f32.gmra.mrb[54].mxu0 %vm165_vm1, %v113_v61 }
  0x9f   :  { %3347 = vmatprep.mubr.msk.f32.mxu0 %vm165_vm1, %v114_v62 }
  0xa2   :  { %3348 = vmatmul.mubr.msk.f32.gmra.mrb[56].mxu0 %vm165_vm1, %v115_v63 }
  0xa3   :  { %3350 = vmatprep.mubr.msk.f32.mxu0 %vm165_vm1, %v116_v0 }
  0xa6   :  { %3351 = vmatmul.mubr.msk.f32.gmra.mrb[58].mxu0 %vm165_vm1, %v117_v1 }
  0xa7   :  { %3353 = vmatprep.mubr.msk.f32.mxu0 %vm165_vm1, %v118_v2 }
  0xaa   :  { %3354 = vmatmul.mubr.msk.f32.gmra.mrb[60].mxu0 %vm165_vm1, %v119_v3 }
  0xab   :  { %3356 = vmatprep.mubr.msk.f32.mxu0 %vm165_vm1, %v120_v4 }
  0xae   :  { %3357 = vmatmul.mubr.msk.f32.gmra.mrb[62].mxu0 %vm165_vm1, %v121_v5 }
  0xaf   :  { %3359 = vmatprep.mubr.msk.f32.mxu0 %vm165_vm1, %v122_v6 }
  0xb2   :  { %3360 = vmatmul.mubr.msk.f32.gmra.mrb[64].mxu0 %vm165_vm1, %v123_v7 }
  0xb3   :  { %3362 = vmatprep.mubr.msk.f32.mxu0 %vm165_vm1, %v124_v8 }
  0xb6   :  { %3363 = vmatmul.mubr.msk.f32.gmra.mrb[66].mxu0 %vm165_vm1, %v125_v9 }
  0xb7   :  { %3365 = vmatprep.mubr.msk.f32.mxu0 %vm165_vm1, %v126_v10 }
  0xba   :  { %3366 = vmatmul.mubr.msk.f32.gmra.mrb[68].mxu0 %vm165_vm1, %v127_v11 }
  0xbb   :  { %3368 = vmatprep.mubr.msk.f32.mxu0 %vm165_vm1, %v128_v12 }
  0xbe   :  { %3369 = vmatmul.mubr.msk.f32.gmra.mrb[70].mxu0 %vm165_vm1, %v129_v13 }
  0xbf   :  { %3371 = vmatprep.mubr.msk.f32.mxu0 %vm165_vm1, %v130_v14 }
  0xc2   :  { %3372 = vmatmul.mubr.msk.f32.gmra.mrb[72].mxu0 %vm165_vm1, %v131_v15 }
  0xc3   :  { %3374 = vmatprep.mubr.msk.f32.mxu0 %vm165_vm1, %v132_v16 }
  0xc6   :  { %3375 = vmatmul.mubr.msk.f32.gmra.mrb[74].mxu0 %vm165_vm1, %v133_v17 }
  0xc7   :  { %3377 = vmatprep.mubr.msk.f32.mxu0 %vm165_vm1, %v134_v18 }
  0xca   :  { %3378 = vmatmul.mubr.msk.f32.gmra.mrb[76].mxu0 %vm165_vm1, %v135_v19 }
  0xcb   :  { %3380 = vmatprep.mubr.msk.f32.mxu0 %vm165_vm1, %v136_v20 }
  0xce   :  { %3381 = vmatmul.mubr.msk.f32.gmra.mrb[78].mxu0 %vm165_vm1, %v137_v21 }
  0xcf   :  { %3383 = vmatprep.mubr.msk.f32.mxu0 %vm165_vm1, %v138_v22 }
  0xd2   :  { %3384 = vmatmul.mubr.msk.f32.gmra.mrb[80].mxu0 %vm165_vm1, %v139_v23 }
  0xd3   :  { %3386 = vmatprep.mubr.msk.f32.mxu0 %vm165_vm1, %v140_v24 }
  0xd6   :  { %3387 = vmatmul.mubr.msk.f32.gmra.mrb[82].mxu0 %vm165_vm1, %v141_v25 }
  0xd7   :  { %3389 = vmatprep.mubr.msk.f32.mxu0 %vm165_vm1, %v142_v26 }
  0xda   :  { %3390 = vmatmul.mubr.msk.f32.gmra.mrb[84].mxu0 %vm165_vm1, %v143_v27 }
  0xdb   :  { %3392 = vmatprep.mubr.msk.f32.mxu0 %vm165_vm1, %v144_v28 }
  0xde   :  { %3393 = vmatmul.mubr.msk.f32.gmra.mrb[86].mxu0 %vm165_vm1, %v145_v29 }
  0xdf   :  { %3395 = vmatprep.mubr.msk.f32.mxu0 %vm165_vm1, %v146_v30 }
  0xe2   :  { %3396 = vmatmul.mubr.msk.f32.gmra.mrb[88].mxu0 %vm165_vm1, %v147_v31 }
  0xe3   :  { %3398 = vmatprep.mubr.msk.f32.mxu0 %vm165_vm1, %v148_v32 }
  0xe6   :  { %3399 = vmatmul.mubr.msk.f32.gmra.mrb[90].mxu0 %vm165_vm1, %v149_v33 }
  0xe7   :  { %3401 = vmatprep.mubr.msk.f32.mxu0 %vm165_vm1, %v150_v34 }
  0xea   :  { %3402 = vmatmul.mubr.msk.f32.gmra.mrb[92].mxu0 %vm165_vm1, %v151_v35 }
  0xeb   :  { %3404 = vmatprep.mubr.msk.f32.mxu0 %vm165_vm1, %v152_v36 }
  0xee   :  { %3405 = vmatmul.mubr.msk.f32.gmra.mrb[94].mxu0 %vm165_vm1, %v153_v37 }
 0x105   :  { %v3265_v39 = vpop.f32.mrb[0].mxu0 }
 0x106   :  { %v4576_v40 = vadd.f32 %v3265_v39, %v4573_v38  ;;  %v524_v41 = vpop.f32.mrb[1].mxu0 }
 0x107   :  { %v4579_v42 = vadd.f32 %v4573_v38, %v524_v41 }
 0x108   :  { %v1004_v43 = vmin.f32 %v4576_v40, 20.0 }
 0x109   :  { %v1003_v44 = vmin.f32 %v4579_v42, 20.0  ;;  %v3268_v45 = vpop.f32.mrb[2].mxu0 }
 0x10a   :  { %v1101_v46 = vmul.f32 1.442695, %v1004_v43  ;;  %v4584_v47 = vadd.f32 %v3268_v45, %v4573_v38  ;;  %v534_v48 = vpop.f32.mrb[3].mxu0 }
 0x10b   :  { %v1099_v49 = vmul.f32 1.442695, %v1003_v44  ;;  %v4587_v50 = vadd.f32 %v4573_v38, %v534_v48 }
 0x10c   :  { %3622 = vpow2.f32 %v1101_v46  ;;  %v1006_v51 = vmin.f32 %v4584_v47, 20.0 }
 0x10d   :  { %3624 = vpow2.f32 %v1099_v49  ;;  %v1005_v52 = vmin.f32 %v4587_v50, 20.0  ;;  %v3271_v53 = vpop.f32.mrb[4].mxu0 }
 0x10e   :  { %v1105_v54 = vmul.f32 1.442695, %v1006_v51  ;;  %v4592_v55 = vadd.f32 %v3271_v53, %v4573_v38  ;;  %v544_v56 = vpop.f32.mrb[5].mxu0 }
 0x10f   :  { %v1103_v57 = vmul.f32 1.442695, %v1005_v52  ;;  %v4595_v58 = vadd.f32 %v4573_v38, %v544_v56 }
 0x110   :  { %3626 = vpow2.f32 %v1105_v54  ;;  %v1008_v59 = vmin.f32 %v4592_v55, 20.0 }
 0x111   :  { %3628 = vpow2.f32 %v1103_v57  ;;  %v1007_v60 = vmin.f32 %v4595_v58, 20.0  ;;  %v3274_v61 = vpop.f32.mrb[6].mxu0 }
 0x112   :  { %v1109_v62 = vmul.f32 1.442695, %v1008_v59  ;;  %v4600_v63 = vadd.f32 %v3274_v61, %v4573_v38  ;;  %v554_v0 = vpop.f32.mrb[7].mxu0 }
 0x113   :  { %v1107_v1 = vmul.f32 1.442695, %v1007_v60  ;;  %v4603_v2 = vadd.f32 %v4573_v38, %v554_v0 }
 0x114   :  { %3630 = vpow2.f32 %v1109_v62  ;;  %v1010_v3 = vmin.f32 %v4600_v63, 20.0 }
 0x115   :  { %3632 = vpow2.f32 %v1107_v1  ;;  %v1009_v4 = vmin.f32 %v4603_v2, 20.0  ;;  %v3277_v5 = vpop.f32.mrb[8].mxu0 }
 0x116   :  { %v3623_v6 = vpop.eup %3622  ;;  %v1113_v7 = vmul.f32 1.442695, %v1010_v3  ;;  %v4608_v8 = vadd.f32 %v3277_v5, %v4573_v38  ;;  %v564_v9 = vpop.f32.mrb[9].mxu0 }
 0x117   :  { %v3625_v10 = vpop.eup %3624  ;;  %v1292_v11 = vadd.f32 1.0, %v3623_v6  ;;  %v1111_v12 = vmul.f32 1.442695, %v1009_v4  ;;  %v4611_v13 = vadd.f32 %v4573_v38, %v564_v9 }
 0x118   :  { %v1291_v14 = vadd.f32 1.0, %v3625_v10  ;;  %3634 = vpow2.f32 %v1113_v7  ;;  %v1012_v15 = vmin.f32 %v4608_v8, 20.0 }
 0x119   :  { %v1388_v16 = vmul.f32 %v1292_v11, %v1292_v11  ;;  %3636 = vpow2.f32 %v1111_v12  ;;  %v1011_v17 = vmin.f32 %v4611_v13, 20.0  ;;  %v3280_v18 = vpop.f32.mrb[10].mxu0 }
 0x11a   :  { %v3627_v19 = vpop.eup %3626  ;;  %v1387_v20 = vmul.f32 %v1291_v14, %v1291_v14  ;;  %v1117_v21 = vmul.f32 1.442695, %v1012_v15  ;;  %v4616_v22 = vadd.f32 %v3280_v18, %v4573_v38  ;;  %v574_v23 = vpop.f32.mrb[11].mxu0 }
 0x11b   :  { %v3629_v24 = vpop.eup %3628  ;;  %v1580_v25 = vadd.f32 1.0, %v1388_v16  ;;  %v1294_v26 = vadd.f32 1.0, %v3627_v19  ;;  %v1115_v27 = vmul.f32 1.442695, %v1011_v17  ;;  %v4620_v32 = vadd.f32 %v4573_v38, %v574_v23 }
 0x11c   :  { %v1579_v28 = vadd.f32 1.0, %v1387_v20  ;;  %v1293_v29 = vadd.f32 1.0, %v3629_v24  ;;  %3638 = vpow2.f32 %v1117_v21  ;;  %v1014_v31 = vmin.f32 %v4616_v22, 20.0 }
 0x11d   :  { %3640 = vrcp.f32 %v1580_v25  ;;  %v1390_v30 = vmul.f32 %v1294_v26, %v1294_v26  ;;  %v3283_v33 = vpop.f32.mrb[12].mxu0  ;;  %v2985_v35 = vadd.f32 -1.0, %v1388_v16  ;;  %v2984_v43 = vadd.f32 -1.0, %v1387_v20 }
 0x11e   :  { %v3631_v34 = vpop.eup %3630  ;;  %3642 = vrcp.f32 %v1579_v28  ;;  %v1389_v36 = vmul.f32 %v1293_v29, %v1293_v29  ;;  %v4623_v37 = vadd.f32 %v3283_v33, %v4573_v38  ;;  %v584_v39 = vpop.f32.mrb[13].mxu0  ;;  %v1121_v51 = vmul.f32 1.442695, %v1014_v31 }
 0x11f   :  { %v3633_v41 = vpop.eup %3632  ;;  %v1582_v44 = vadd.f32 1.0, %v1390_v30  ;;  %v1296_v45 = vadd.f32 1.0, %v3631_v34  ;;  %3644 = vpow2.f32 %v1115_v27  ;;  %v2987_v46 = vadd.f32 -1.0, %v1390_v30 }
 0x120   :  { %v1581_v48 = vadd.f32 1.0, %v1389_v36  ;;  %v1295_v49 = vadd.f32 1.0, %v3633_v41  ;;  %v1013_v53 = vmin.f32 %v4620_v32, 20.0  ;;  %v1016_v54 = vmin.f32 %v4623_v37, 20.0 }
 0x121   :  { %3646 = vrcp.f32 %v1582_v44  ;;  %v1392_v52 = vmul.f32 %v1296_v45, %v1296_v45  ;;  %v3286_v56 = vpop.f32.mrb[14].mxu0  ;;  %v4628_v60 = vadd.f32 %v4573_v38, %v584_v39  ;;  %v2986_v1 = vadd.f32 -1.0, %v1389_v36 }
 0x122   :  { %v3635_v57 = vpop.eup %3634  ;;  %3648 = vrcp.f32 %v1581_v48  ;;  %v1391_v59 = vmul.f32 %v1295_v49, %v1295_v49  ;;  %v4631_v61 = vadd.f32 %v3286_v56, %v4573_v38  ;;  %v594_v62 = vpop.f32.mrb[15].mxu0  ;;  %v1119_v9 = vmul.f32 1.442695, %v1013_v53 }
 0x123   :  { %v3637_v0 = vpop.eup %3636  ;;  %v1584_v3 = vadd.f32 1.0, %v1392_v52  ;;  %v1298_v4 = vadd.f32 1.0, %v3635_v57  ;;  %3650 = vpow2.f32 %v1121_v51  ;;  %v4633_v5 = vadd.f32 -1.0, %v1392_v52 }
 0x124   :  { %v1583_v6 = vadd.f32 1.0, %v1391_v59  ;;  %v1297_v7 = vadd.f32 1.0, %v3637_v0  ;;  %v1125_v11 = vmul.f32 1.442695, %v1016_v54  ;;  %v1015_v12 = vmin.f32 %v4628_v60, 20.0 }
 0x125   :  { %3652 = vrcp.f32 %v1584_v3  ;;  %v1394_v10 = vmul.f32 %v1298_v4, %v1298_v4  ;;  %v3289_v14 = vpop.f32.mrb[16].mxu0  ;;  %v2988_v16 = vadd.f32 -1.0, %v1391_v59  ;;  %v1018_v18 = vmin.f32 %v4631_v61, 20.0 }
 0x126   :  { %v3639_v15 = vpop.eup %3638  ;;  %3654 = vrcp.f32 %v1583_v6  ;;  %v1393_v17 = vmul.f32 %v1297_v7, %v1297_v7  ;;  %v604_v19 = vpop.f32.mrb[17].mxu0  ;;  %v4638_v24 = vadd.f32 %v4573_v38, %v594_v62  ;;  %v1123_v33 = vmul.f32 1.442695, %v1015_v12 }
 0x127   :  { %v3641_v20 = vpop.eup %3640  ;;  %v1586_v21 = vadd.f32 1.0, %v1394_v10  ;;  %v1300_v23 = vadd.f32 1.0, %v3639_v15  ;;  %3656 = vpow2.f32 %v1119_v9  ;;  %v4640_v27 = vadd.f32 -1.0, %v1394_v10 }
 0x128   :  { %v3643_v25 = vpop.eup %3642  ;;  %v1678_v26 = vmul.f32 %v3641_v20, %v2985_v35  ;;  %v1585_v28 = vadd.f32 1.0, %v1393_v17  ;;  %3658 = vpow2.f32 %v1125_v11  ;;  %v1129_v41 = vmul.f32 1.442695, %v1018_v18 }
 0x129   :  { %v3645_v29 = vpop.eup %3644  ;;  %v1676_v30 = vmul.f32 %v3643_v25, %v2984_v43  ;;  %3660 = vrcp.f32 %v1586_v21  ;;  %v1396_v31 = vmul.f32 %v1300_v23, %v1300_v23  ;;  %v3292_v34 = vpop.f32.mrb[18].mxu0  ;;  %v2990_v48 = vadd.f32 -1.0, %v1393_v17 }
 0x12a   :  { %v4643_v36 = vmul.f32 %v1678_v26, %v4576_v40  ;;  %3662 = vrcp.f32 %v1585_v28  ;;  %v1299_v39 = vadd.f32 1.0, %v3645_v29  ;;  %v4645_v44 = vpop.f32.mrb[19].mxu0  ;;  %v1017_v53 = vmin.f32 %v4638_v24, 20.0 }
 0x12b   :  { %v3647_v45 = vpop.eup %3646  ;;  %v4648_v35 = vmul.f32 %v1676_v30, %v4579_v42  ;;  %v1588_v49 = vadd.f32 1.0, %v1396_v31  ;;  %3664 = vpow2.f32 %v1123_v33  ;;  %v4654_v57 = vadd.f32 %v3289_v14, %v4573_v38 }
 0x12c   :  { %v3649_v43 = vpop.eup %3648  ;;  %v1682_v51 = vmul.f32 %v3647_v45, %v2987_v46  ;;  %v1395_v52 = vmul.f32 %v1299_v39, %v1299_v39  ;;  %3666 = vpow2.f32 %v1129_v41  ;;  %v2993_v62 = vadd.f32 -1.0, %v1396_v31 }
 0x12d   :  { %v3651_v40 = vpop.eup %3650  ;;  %v2016_v54 = vadd.f32 %v4643_v36, %v4648_v35  ;;  %v1680_v56 = vmul.f32 %v3649_v43, %v2986_v1  ;;  %3668 = vrcp.f32 %v1588_v49  ;;  %v4656_v42 = vpop.f32.mrb[20].mxu0  ;;  %v1127_v1 = vmul.f32 1.442695, %v1017_v53 }
 0x12e   :  { %v4659_v59 = vmul.f32 %v1682_v51, %v4584_v47  ;;  %v1587_v46 = vadd.f32 1.0, %v1395_v52  ;;  %v1302_v0 = vadd.f32 1.0, %v3651_v40  ;;  %v4661_v3 = vpop.f32.mrb[21].mxu0  ;;  %v4666_v7 = vadd.f32 -1.0, %v1395_v52 }
 0x12f   :  { %v3653_v4 = vpop.eup %3652  ;;  %v4664_v6 = vmul.f32 %v1680_v56, %v4587_v50  ;;  %v1020_v9 = vmin.f32 %v4654_v57, 20.0  ;;  %v4671_v12 = vadd.f32 %v4573_v38, %v604_v19 }
 0x130   :  { %v3655_v10 = vpop.eup %3654  ;;  %v1686_v11 = vmul.f32 %v3653_v4, %v4633_v5  ;;  %3670 = vrcp.f32 %v1587_v46  ;;  %v1398_v47 = vmul.f32 %v1302_v0, %v1302_v0  ;;  %v4678_v5 = vadd.f32 %v3292_v34, %v4573_v38 }
 0x131   :  { %v3657_v14 = vpop.eup %3656  ;;  %v2017_v15 = vadd.f32 %v2016_v54, %v4664_v6  ;;  %v1684_v17 = vmul.f32 %v3655_v10, %v2988_v16  ;;  %3672 = vpow2.f32 %v1127_v1  ;;  %v1133_v50 = vmul.f32 1.442695, %v1020_v9  ;;  %v4674_v18 = vpop.f32.mrb[22].mxu0 }
 0x132   :  { %v3659_v20 = vpop.eup %3658  ;;  %v1872_v21 = vmul.f32 %v1686_v11, %v4592_v55  ;;  %v1590_v23 = vadd.f32 1.0, %v1398_v47  ;;  %v1301_v25 = vadd.f32 1.0, %v3657_v14  ;;  %v4680_v26 = vpop.f32.mrb[23].mxu0  ;;  %v2995_v52 = vadd.f32 -1.0, %v1398_v47 }
 0x133   :  { %v3661_v19 = vpop.eup %3660  ;;  %v4683_v28 = vmul.f32 %v1684_v17, %v4595_v58  ;;  %v2018_v16 = vadd.f32 %v2017_v15, %v4659_v59  ;;  %v1304_v29 = vadd.f32 1.0, %v3659_v20  ;;  %3674 = vpow2.f32 %v1133_v50 }
 0x134   :  { %v3663_v30 = vpop.eup %3662  ;;  %v1964_v31 = vmax.f32 %v4643_v36, %v1872_v21  ;;  %v1690_v55 = vmul.f32 %v3661_v19, %v4640_v27  ;;  %3676 = vrcp.f32 %v1590_v23  ;;  %v1397_v33 = vmul.f32 %v1301_v25, %v1301_v25 }
 0x135   :  { %v3665_v39 = vpop.eup %3664  ;;  %v1963_v34 = vmax.f32 %v4648_v35, %v4683_v28  ;;  %v2019_v41 = vadd.f32 %v2018_v16, %v4683_v28  ;;  %v1688_v45 = vmul.f32 %v3663_v30, %v2990_v48  ;;  %v1400_v58 = vmul.f32 %v1304_v29, %v1304_v29  ;;  %v4691_v49 = vpop.f32.mrb[24].mxu0 }
 0x136   :  { %v3667_v43 = vpop.eup %3666  ;;  %v4694_v51 = vmul.f32 %v1690_v55, %v4600_v63  ;;  %v1589_v36 = vadd.f32 1.0, %v1397_v33  ;;  %v1303_v53 = vadd.f32 1.0, %v3665_v39  ;;  %v4696_v27 = vpop.f32.mrb[25].mxu0  ;;  %v2994_v56 = vadd.f32 -1.0, %v1397_v33 }
 0x137   :  { %v3669_v40 = vpop.eup %3668  ;;  %v4699_v54 = vmul.f32 %v1688_v45, %v4603_v2  ;;  %v2020_v35 = vadd.f32 %v2019_v41, %v1872_v21  ;;  %v1592_v46 = vadd.f32 1.0, %v1400_v58  ;;  %v1306_v9 = vadd.f32 1.0, %v3667_v43 }
 0x138   :  { %v1966_v48 = vmax.f32 %v4659_v59, %v4694_v51  ;;  %v1694_v0 = vmul.f32 %v3669_v40, %v2993_v62  ;;  %3678 = vrcp.f32 %v1589_v36  ;;  %v1399_v4 = vmul.f32 %v1303_v53, %v1303_v53 }
 0x139   :  { %v1965_v63 = vmax.f32 %v4664_v6, %v4699_v54  ;;  %v2021_v1 = vadd.f32 %v2020_v35, %v4699_v54  ;;  %3680 = vrcp.f32 %v1592_v46  ;;  %v4706_v10 = vpop.f32.mrb[26].mxu0  ;;  %v2997_v47 = vadd.f32 -1.0, %v1400_v58 }
 0x13a   :  { %v3671_v2 = vpop.eup %3670  ;;  %v1876_v11 = vmul.f32 %v1694_v0, %v4608_v8  ;;  %v1591_v14 = vadd.f32 1.0, %v1399_v4  ;;  %v1019_v15 = vmin.f32 %v4671_v12, 20.0  ;;  %v4710_v59 = vpop.f32.mrb[27].mxu0  ;;  %v1402_v20 = vmul.f32 %v1306_v9, %v1306_v9 }
 0x13b   :  { %v3673_v62 = vpop.eup %3672  ;;  %v1692_v17 = vmul.f32 %v3671_v2, %v4666_v7  ;;  %v2022_v50 = vadd.f32 %v2021_v1, %v4694_v51  ;;  %v1022_v21 = vmin.f32 %v4678_v5, 20.0  ;;  %v2996_v16 = vadd.f32 -1.0, %v1399_v4 }
 0x13c   :  { %v4715_v23 = vmax.f32 %v1964_v31, %v1876_v11  ;;  %3682 = vrcp.f32 %v1591_v14  ;;  %v1305_v25 = vadd.f32 1.0, %v3673_v62  ;;  %v1131_v19 = vmul.f32 1.442695, %v1019_v15 }
 0x13d   :  { %v3675_v8 = vpop.eup %3674  ;;  %v1875_v28 = vmul.f32 %v1692_v17, %v4611_v13  ;;  %v1594_v29 = vadd.f32 1.0, %v1402_v20  ;;  %v1137_v30 = vmul.f32 1.442695, %v1022_v21  ;;  %v4718_v55 = vpop.f32.mrb[28].mxu0  ;;  %v4722_v41 = vadd.f32 %v4573_v38, %v4645_v44 }
 0x13e   :  { %v3677_v33 = vpop.eup %3676  ;;  %v1401_v7 = vmul.f32 %v1305_v25, %v1305_v25  ;;  %v1308_v39 = vadd.f32 1.0, %v3675_v8  ;;  %3684 = vpow2.f32 %v1131_v19  ;;  %v4724_v31 = vpop.f32.mrb[29].mxu0  ;;  %v2999_v13 = vadd.f32 -1.0, %v1402_v20 }
 0x13f   :  { %v4726_v45 = vmax.f32 %v1963_v34, %v1875_v28  ;;  %v2023_v58 = vadd.f32 %v2022_v50, %v1875_v28  ;;  %v1698_v43 = vmul.f32 %v3677_v33, %v2995_v52  ;;  %3686 = vrcp.f32 %v1594_v29 }
 0x140   :  { %v1593_v51 = vadd.f32 1.0, %v1401_v7  ;;  %v4728_v36 = vmul.f32 %v1308_v39, %v1308_v39  ;;  %3688 = vpow2.f32 %v1137_v30  ;;  %v1021_v35 = vmin.f32 %v4722_v41, 20.0 }
 0x141   :  { %v1878_v53 = vmul.f32 %v1698_v43, %v4616_v22  ;;  %v2024_v40 = vadd.f32 %v2023_v58, %v1876_v11  ;;  %v4734_v44 = vadd.f32 %v4656_v42, %v4573_v38  ;;  %v4736_v46 = vpop.f32.mrb[30].mxu0  ;;  %v2998_v0 = vadd.f32 -1.0, %v1401_v7 }
 0x142   :  { %v3679_v34 = vpop.eup %3678  ;;  %3690 = vrcp.f32 %v1593_v51  ;;  %v1596_v52 = vadd.f32 1.0, %v4728_v36  ;;  %v4741_v4 = vadd.f32 %v4573_v38, %v4661_v3  ;;  %v4743_v1 = vpop.f32.mrb[31].mxu0  ;;  %v1135_v11 = vmul.f32 1.442695, %v1021_v35 }
 0x143   :  { %v3681_v22 = vpop.eup %3680  ;;  %v4745_v9 = vmax.f32 %v1966_v48, %v1878_v53  ;;  %v1696_v2 = vmul.f32 %v3679_v34, %v2994_v56  ;;  %v1024_v42 = vmin.f32 %v4734_v44, 20.0  ;;  %v4751_v62 = vadd.f32 %v4674_v18, %v4573_v38 }
 0x144   :  { %v1702_v14 = vmul.f32 %v3681_v22, %v2997_v47  ;;  %3692 = vrcp.f32 %v1596_v52  ;;  %v1023_v15 = vmin.f32 %v4741_v4, 20.0  ;;  %v4756_v48 = vadd.f32 %v4573_v38, %v4680_v26 }
 0x145   :  { %v1877_v3 = vmul.f32 %v1696_v2, %v4620_v32  ;;  %3694 = vpow2.f32 %v1135_v11  ;;  %v1141_v17 = vmul.f32 1.442695, %v1024_v42  ;;  %v4758_v56 = vpop.f32.mrb[32].mxu0  ;;  %v1026_v21 = vmin.f32 %v4751_v62, 20.0 }
 0x146   :  { %v3683_v50 = vpop.eup %3682  ;;  %v4761_v47 = vmul.f32 %v1702_v14, %v4623_v37  ;;  %v1139_v20 = vmul.f32 1.442695, %v1023_v15  ;;  %v4766_v18 = vadd.f32 %v4691_v49, %v4573_v38  ;;  %v4768_v32 = vpop.f32.mrb[33].mxu0  ;;  %v1025_v29 = vmin.f32 %v4756_v48, 20.0 }
 0x147   :  { %v4773_v26 = vmax.f32 %v1965_v63, %v1877_v3  ;;  %v2025_v25 = vadd.f32 %v2024_v40, %v1877_v3  ;;  %v1700_v19 = vmul.f32 %v3683_v50, %v2996_v16  ;;  %3696 = vpow2.f32 %v1141_v17 }
 0x148   :  { %v3685_v8 = vpop.eup %3684  ;;  %v1972_v37 = vmax.f32 %v4715_v23, %v4761_v47  ;;  %3698 = vpow2.f32 %v1139_v20  ;;  %v1145_v28 = vmul.f32 1.442695, %v1026_v21  ;;  %v1028_v6 = vmin.f32 %v4766_v18, 20.0 }
 0x149   :  { %v3687_v49 = vpop.eup %3686  ;;  %v4779_v30 = vmul.f32 %v1700_v19, %v4628_v60  ;;  %v2026_v33 = vadd.f32 %v2025_v25, %v1878_v53  ;;  %v1307_v7 = vadd.f32 1.0, %v3685_v8  ;;  %v4782_v54 = vpop.f32.mrb[34].mxu0  ;;  %v1143_v39 = vmul.f32 1.442695, %v1025_v29 }
 0x14a   :  { %v3689_v63 = vpop.eup %3688  ;;  %v1706_v16 = vmul.f32 %v3687_v49, %v2999_v13  ;;  %3700 = vpow2.f32 %v1145_v28  ;;  %v4786_v23 = vadd.f32 %v4573_v38, %v4696_v27  ;;  %v4788_v58 = vpop.f32.mrb[35].mxu0  ;;  %v1149_v13 = vmul.f32 1.442695, %v1028_v6 }
 0x14b   :  { %v1971_v60 = vmax.f32 %v4726_v45, %v4779_v30  ;;  %v2027_v43 = vadd.f32 %v2026_v33, %v4779_v30  ;;  %v1403_v51 = vmul.f32 %v1307_v7, %v1307_v7  ;;  %v1310_v53 = vadd.f32 1.0, %v3689_v63 }
 0x14c   :  { %v3691_v40 = vpop.eup %3690  ;;  %v4794_v35 = vmul.f32 %v1706_v16, %v4631_v61  ;;  %3702 = vpow2.f32 %v1143_v39  ;;  %v1027_v34 = vmin.f32 %v4786_v23, 20.0  ;;  %v3001_v22 = vadd.f32 -1.0, %v4728_v36 }
 0x14d   :  { %v1704_v52 = vmul.f32 %v3691_v40, %v2998_v0  ;;  %v2028_v27 = vadd.f32 %v2027_v43, %v4761_v47  ;;  %v1595_v2 = vadd.f32 1.0, %v1403_v51  ;;  %v4799_v11 = vpop.f32.mrb[36].mxu0  ;;  %v1406_v15 = vmul.f32 %v1310_v53, %v1310_v53 }
 0x14e   :  { %v3693_v42 = vpop.eup %3692  ;;  %v1974_v14 = vmax.f32 %v4745_v9, %v4794_v35  ;;  %3704 = vpow2.f32 %v1149_v13  ;;  %v1147_v61 = vmul.f32 1.442695, %v1027_v34  ;;  %v4803_v3 = vpop.f32.mrb[37].mxu0  ;;  %v4810_v36 = vadd.f32 %v4706_v10, %v4573_v38 }
 0x14f   :  { %v3695_v17 = vpop.eup %3694  ;;  %v4806_v50 = vmul.f32 %v1704_v52, %v4638_v24  ;;  %v1710_v0 = vmul.f32 %v3693_v42, %v3001_v22  ;;  %3706 = vrcp.f32 %v1595_v2  ;;  %v1598_v47 = vadd.f32 1.0, %v1406_v15 }
 0x150   :  { %v1309_v20 = vadd.f32 1.0, %v3695_v17  ;;  %3708 = vpow2.f32 %v1147_v61  ;;  %v1030_v24 = vmin.f32 %v4810_v36, 20.0  ;;  %v4823_v33 = vadd.f32 %v4573_v38, %v4710_v59 }
 0x151   :  { %v3697_v21 = vpop.eup %3696  ;;  %v2029_v19 = vadd.f32 %v2028_v27, %v4806_v50  ;;  %v4816_v8 = vmul.f32 %v1710_v0, %v4654_v57  ;;  %v4819_v28 = vpop.f32.mrb[38].mxu0  ;;  %3710 = vrcp.f32 %v1598_v47  ;;  %v3000_v43 = vadd.f32 -1.0, %v1403_v51 }
 0x152   :  { %v3699_v29 = vpop.eup %3698  ;;  %v1405_v10 = vmul.f32 %v1309_v20, %v1309_v20  ;;  %v1312_v49 = vadd.f32 1.0, %v3697_v21  ;;  %v4825_v7 = vpop.f32.mrb[39].mxu0  ;;  %v1153_v16 = vmul.f32 1.442695, %v1030_v24  ;;  %v1029_v13 = vmin.f32 %v4823_v33, 20.0 }
 0x153   :  { %v4828_v6 = vmax.f32 %v1972_v37, %v4816_v8  ;;  %v2030_v57 = vadd.f32 %v2029_v19, %v4794_v35  ;;  %v1311_v63 = vadd.f32 1.0, %v3699_v29  ;;  %v4834_v59 = vadd.f32 %v4718_v55, %v4573_v38 }
 0x154   :  { %v3701_v39 = vpop.eup %3700  ;;  %v1597_v53 = vadd.f32 1.0, %v1405_v10  ;;  %v1408_v40 = vmul.f32 %v1312_v49, %v1312_v49  ;;  %3712 = vpow2.f32 %v1153_v16  ;;  %v3003_v22 = vadd.f32 -1.0, %v1406_v15 }
 0x155   :  { %v1407_v34 = vmul.f32 %v1311_v63, %v1311_v63  ;;  %v1314_v52 = vadd.f32 1.0, %v3701_v39  ;;  %v4836_v27 = vpop.f32.mrb[40].mxu0  ;;  %v1151_v42 = vmul.f32 1.442695, %v1029_v13  ;;  %v3002_v51 = vadd.f32 -1.0, %v1405_v10 }
 0x156   :  { %v3703_v37 = vpop.eup %3702  ;;  %3714 = vrcp.f32 %v1597_v53  ;;  %v1600_v2 = vadd.f32 1.0, %v1408_v40  ;;  %v4838_v61 = vpop.f32.mrb[41].mxu0  ;;  %v3005_v21 = vadd.f32 -1.0, %v1408_v40  ;;  %v1032_v19 = vmin.f32 %v4834_v59, 20.0 }
 0x157   :  { %v1599_v17 = vadd.f32 1.0, %v1407_v34  ;;  %v1410_v0 = vmul.f32 %v1314_v52, %v1314_v52  ;;  %v1313_v47 = vadd.f32 1.0, %v3703_v37  ;;  %v4843_v55 = vadd.f32 %v4573_v38, %v4724_v31 }
 0x158   :  { %v3705_v20 = vpop.eup %3704  ;;  %3716 = vrcp.f32 %v1600_v2  ;;  %v4847_v49 = vadd.f32 %v4736_v46, %v4573_v38  ;;  %v1157_v53 = vmul.f32 1.442695, %v1032_v19  ;;  %v3004_v13 = vadd.f32 -1.0, %v1407_v34 }
 0x159   :  { %v3707_v24 = vpop.eup %3706  ;;  %3718 = vrcp.f32 %v1599_v17  ;;  %v1602_v15 = vadd.f32 1.0, %v1410_v0  ;;  %v1409_v29 = vmul.f32 %v1313_v47, %v1313_v47  ;;  %v4849_v10 = vpop.f32.mrb[42].mxu0  ;;  %v1316_v39 = vadd.f32 1.0, %v3705_v20 }
 0x15a   :  { %v3709_v63 = vpop.eup %3708  ;;  %v1708_v16 = vmul.f32 %v3707_v24, %v3000_v43  ;;  %3720 = vpow2.f32 %v1151_v42  ;;  %v4851_v40 = vpop.f32.mrb[43].mxu0  ;;  %v1031_v46 = vmin.f32 %v4843_v55, 20.0  ;;  %v1034_v43 = vmin.f32 %v4847_v49, 20.0 }
 0x15b   :  { %3722 = vrcp.f32 %v1602_v15  ;;  %v1601_v31 = vadd.f32 1.0, %v1409_v29  ;;  %v1315_v52 = vadd.f32 1.0, %v3709_v63  ;;  %v3711_v37 = vpop.eup %3710  ;;  %v1412_v17 = vmul.f32 %v1316_v39, %v1316_v39 }
 0x15c   :  { %v1883_v2 = vmul.f32 %v1708_v16, %v4671_v12  ;;  %3724 = vpow2.f32 %v1157_v53  ;;  %v1714_v47 = vmul.f32 %v3711_v37, %v3003_v22  ;;  %v3007_v19 = vadd.f32 -1.0, %v1410_v0 }
 0x15d   :  { %3726 = vrcp.f32 %v1601_v31  ;;  %v1411_v25 = vmul.f32 %v1315_v52, %v1315_v52  ;;  %v4856_v42 = vpop.f32.mrb[44].mxu0  ;;  %v1604_v24 = vadd.f32 1.0, %v1412_v17  ;;  %v3006_v22 = vadd.f32 -1.0, %v1409_v29 }
 0x15e   :  { %v4861_v34 = vmax.f32 %v1971_v60, %v1883_v2  ;;  %v2031_v20 = vadd.f32 %v2030_v57, %v1883_v2  ;;  %v4863_v12 = vpop.f32.mrb[45].mxu0  ;;  %v3713_v15 = vpop.eup %3712  ;;  %v1886_v63 = vmul.f32 %v1714_v47, %v4678_v5  ;;  %v1155_v39 = vmul.f32 1.442695, %v1031_v46 }
 0x15f   :  { %v1603_v16 = vadd.f32 1.0, %v1411_v25  ;;  %3728 = vrcp.f32 %v1604_v24  ;;  %v1318_v52 = vadd.f32 1.0, %v3713_v15  ;;  %v1161_v37 = vmul.f32 1.442695, %v1034_v43 }
 0x160   :  { %v3715_v53 = vpop.eup %3714  ;;  %v2032_v31 = vadd.f32 %v2031_v20, %v4816_v8  ;;  %v4870_v45 = vmax.f32 %v1974_v14, %v1886_v63  ;;  %v4874_v60 = vadd.f32 %v4573_v38, %v4743_v1  ;;  %v3009_v0 = vadd.f32 -1.0, %v1412_v17 }
 0x161   :  { %v1712_v30 = vmul.f32 %v3715_v53, %v3002_v51  ;;  %3730 = vrcp.f32 %v1603_v16  ;;  %v4876_v5 = vpop.f32.mrb[46].mxu0  ;;  %v1414_v29 = vmul.f32 %v1318_v52, %v1318_v52  ;;  %v4880_v8 = vadd.f32 %v4758_v56, %v4573_v38 }
 0x162   :  { %v3717_v57 = vpop.eup %3716  ;;  %3732 = vpow2.f32 %v1155_v39  ;;  %v4882_v2 = vpop.f32.mrb[47].mxu0  ;;  %v1033_v1 = vmin.f32 %v4874_v60, 20.0  ;;  %v4889_v43 = vadd.f32 %v4573_v38, %v4768_v32  ;;  %v5914_v20 = vmax.f32 %v4773_v26, %v4806_v50 }
 0x163   :  { %v3719_v9 = vpop.eup %3718  ;;  %v1885_v35 = vmul.f32 %v1712_v30, %v4722_v41  ;;  %v1718_v14 = vmul.f32 %v3717_v57, %v3005_v21  ;;  %3734 = vpow2.f32 %v1161_v37  ;;  %v1606_v47 = vadd.f32 1.0, %v1414_v29 }
 0x164   :  { %v3721_v51 = vpop.eup %3720  ;;  %v1716_v46 = vmul.f32 %v3719_v9, %v3004_v13  ;;  %v1036_v17 = vmin.f32 %v4880_v8, 20.0  ;;  %v1159_v52 = vmul.f32 1.442695, %v1033_v1 }
 0x165   :  { %v3723_v56 = vpop.eup %3722  ;;  %v4894_v24 = vmax.f32 %v5914_v20, %v1885_v35  ;;  %v2033_v41 = vadd.f32 %v2032_v31, %v1885_v35  ;;  %v1888_v21 = vmul.f32 %v1718_v14, %v4734_v44  ;;  %v1317_v15 = vadd.f32 1.0, %v3721_v51  ;;  %v4897_v16 = vpop.f32.mrb[48].mxu0 }
 0x166   :  { %v3725_v13 = vpop.eup %3724  ;;  %v1887_v39 = vmul.f32 %v1716_v46, %v4741_v4  ;;  %v1722_v53 = vmul.f32 %v3723_v56, %v3007_v19  ;;  %3736 = vrcp.f32 %v1606_v47  ;;  %v4900_v32 = vpop.f32.mrb[49].mxu0  ;;  %v3008_v4 = vadd.f32 -1.0, %v1411_v25 }
 0x167   :  { %v3727_v37 = vpop.eup %3726  ;;  %v1980_v30 = vmax.f32 %v4828_v6, %v1888_v21  ;;  %v2034_v26 = vadd.f32 %v2033_v41, %v1886_v63  ;;  %v1413_v50 = vmul.f32 %v1317_v15, %v1317_v15  ;;  %v1320_v57 = vadd.f32 1.0, %v3725_v13 }
 0x168   :  { %v1979_v31 = vmax.f32 %v4861_v34, %v1887_v39  ;;  %v4905_v44 = vmul.f32 %v1722_v53, %v4751_v62  ;;  %v1720_v9 = vmul.f32 %v3727_v37, %v3006_v22  ;;  %3738 = vpow2.f32 %v1159_v52 }
 0x169   :  { %v2035_v35 = vadd.f32 %v2034_v26, %v1887_v39  ;;  %v1605_v19 = vadd.f32 1.0, %v1413_v50  ;;  %v1416_v14 = vmul.f32 %v1320_v57, %v1320_v57  ;;  %v4907_v1 = vpop.f32.mrb[50].mxu0  ;;  %v3729_v51 = vpop.eup %3728  ;;  %v1165_v46 = vmul.f32 1.442695, %v1036_v17 }
 0x16a   :  { %v1982_v6 = vmax.f32 %v4870_v45, %v4905_v44  ;;  %v4912_v63 = vmul.f32 %v1720_v9, %v4756_v48  ;;  %v1035_v34 = vmin.f32 %v4889_v43, 20.0  ;;  %v4915_v62 = vpop.f32.mrb[51].mxu0  ;;  %v1726_v56 = vmul.f32 %v3729_v51, %v3009_v0 }
 0x16b   :  { %v3731_v22 = vpop.eup %3730  ;;  %v2036_v47 = vadd.f32 %v2035_v35, %v1888_v21  ;;  %v3011_v25 = vadd.f32 -1.0, %v1414_v29  ;;  %3740 = vrcp.f32 %v1605_v19  ;;  %v1608_v13 = vadd.f32 1.0, %v1416_v14 }
 0x16c   :  { %v3733_v20 = vpop.eup %3732  ;;  %v1981_v41 = vmax.f32 %v4894_v24, %v4912_v63  ;;  %v1724_v15 = vmul.f32 %v3731_v22, %v3008_v4  ;;  %3742 = vpow2.f32 %v1165_v46  ;;  %v1892_v17 = vmul.f32 %v1726_v56, %v4766_v18 }
 0x16d   :  { %v3735_v45 = vpop.eup %3734  ;;  %v2037_v48 = vadd.f32 %v2036_v47, %v4912_v63  ;;  %v1319_v39 = vadd.f32 1.0, %v3733_v20  ;;  %v1163_v53 = vmul.f32 1.442695, %v1035_v34  ;;  %v4921_v52 = vpop.f32.mrb[52].mxu0  ;;  %3744 = vrcp.f32 %v1608_v13 }
 0x16e   :  { %v1891_v0 = vmul.f32 %v1724_v15, %v4786_v23  ;;  %v1322_v29 = vadd.f32 1.0, %v3735_v45  ;;  %v4926_v21 = vadd.f32 %v4782_v54, %v4573_v38  ;;  %v4928_v37 = vpop.f32.mrb[53].mxu0  ;;  %v4930_v26 = vmax.f32 %v1980_v30, %v1892_v17 }
 0x16f   :  { %v2038_v57 = vadd.f32 %v2037_v48, %v4905_v44  ;;  %v1415_v9 = vmul.f32 %v1319_v39, %v1319_v39  ;;  %3746 = vpow2.f32 %v1163_v53  ;;  %v4938_v19 = vadd.f32 %v4573_v38, %v4788_v58 }
 0x170   :  { %v3737_v18 = vpop.eup %3736  ;;  %v4933_v35 = vmax.f32 %v1979_v31, %v1891_v0  ;;  %v1418_v4 = vmul.f32 %v1322_v29, %v1322_v29  ;;  %v1038_v23 = vmin.f32 %v4926_v21, 20.0  ;;  %v3010_v46 = vadd.f32 -1.0, %v1413_v50  ;;  %v4949_v50 = vld [vmem:[%s5905_s2] ss:$0 sm:$0xff] }
 0x171   :  { %v2039_v54 = vadd.f32 %v2038_v57, %v1891_v0  ;;  %v1730_v51 = vmul.f32 %v3737_v18, %v3011_v25  ;;  %v1607_v34 = vadd.f32 1.0, %v1415_v9  ;;  %v4940_v30 = vpop.f32.mrb[54].mxu0  ;;  %v3013_v44 = vadd.f32 -1.0, %v1416_v14 }
 0x172   :  { %v3739_v22 = vpop.eup %3738  ;;  %v1610_v47 = vadd.f32 1.0, %v1418_v4  ;;  %v1169_v56 = vmul.f32 1.442695, %v1038_v23  ;;  %v1037_v31 = vmin.f32 %v4938_v19, 20.0  ;;  %v4943_v20 = vpop.f32.mrb[55].mxu0  ;;  %v4953_v14 = vadd.f32 %v4949_v50, %v4799_v11 }
 0x173   :  { %v1894_v15 = vmul.f32 %v1730_v51, %v4810_v36  ;;  %v2040_v13 = vadd.f32 %v2039_v54, %v1892_v17  ;;  %3748 = vrcp.f32 %v1607_v34  ;;  %v1321_v38 = vadd.f32 1.0, %v3739_v22 }
 0x174   :  { %3750 = vrcp.f32 %v1610_v47  ;;  %v1167_v58 = vmul.f32 1.442695, %v1037_v31  ;;  %v4957_v25 = vadd.f32 %v4949_v50, %v4803_v3  ;;  %v4963_v17 = vadd.f32 %v4949_v50, %v4819_v28 }
 0x175   :  { %v3741_v45 = vpop.eup %3740  ;;  %v4959_v36 = vmax.f32 %v1982_v6, %v1894_v15  ;;  %v1417_v48 = vmul.f32 %v1321_v38, %v1321_v38  ;;  %3752 = vpow2.f32 %v1169_v56  ;;  %v4965_v39 = vpop.f32.mrb[56].mxu0  ;;  %v1040_v11 = vmin.f32 %v4953_v14, 20.0 }
 0x176   :  { %v3743_v53 = vpop.eup %3742  ;;  %v1728_v0 = vmul.f32 %v3741_v45, %v3010_v46  ;;  %3754 = vpow2.f32 %v1167_v58  ;;  %v1039_v29 = vmin.f32 %v4957_v25, 20.0  ;;  %v4969_v3 = vpop.f32.mrb[57].mxu0  ;;  %v3012_v57 = vadd.f32 -1.0, %v1415_v9 }
 0x177   :  { %v1609_v6 = vadd.f32 1.0, %v1417_v48  ;;  %v1324_v18 = vadd.f32 1.0, %v3743_v53  ;;  %v1042_v23 = vmin.f32 %v4963_v17, 20.0  ;;  %v3745_v54 = vpop.eup %3744  ;;  %v1173_v51 = vmul.f32 1.442695, %v1040_v11 }
 0x178   :  { %v1893_v28 = vmul.f32 %v1728_v0, %v4823_v33  ;;  %v1171_v34 = vmul.f32 1.442695, %v1039_v29  ;;  %v4975_v46 = vadd.f32 %v4949_v50, %v4825_v7  ;;  %v1734_v47 = vmul.f32 %v3745_v54, %v3013_v44 }
 0x179   :  { %v3747_v22 = vpop.eup %3746  ;;  %3756 = vrcp.f32 %v1609_v6  ;;  %v1420_v56 = vmul.f32 %v1324_v18, %v1324_v18  ;;  %v1177_v31 = vmul.f32 1.442695, %v1042_v23  ;;  %v4977_v38 = vpop.f32.mrb[58].mxu0  ;;  %v3015_v53 = vadd.f32 -1.0, %v1418_v4 }
 0x17a   :  { %v4982_v9 = vmax.f32 %v1981_v41, %v1893_v28  ;;  %v2041_v58 = vadd.f32 %v2040_v13, %v1893_v28  ;;  %v1323_v33 = vadd.f32 1.0, %v3747_v22  ;;  %3758 = vpow2.f32 %v1173_v51  ;;  %v4984_v45 = vpop.f32.mrb[59].mxu0 }
 0x17b   :  { %v4987_v7 = vmul.f32 %v1734_v47, %v4834_v59  ;;  %v1612_v44 = vadd.f32 1.0, %v1420_v56  ;;  %3760 = vpow2.f32 %v1171_v34  ;;  %v1041_v29 = vmin.f32 %v4975_v46, 20.0 }
 0x17c   :  { %v2042_v0 = vadd.f32 %v2041_v58, %v1894_v15  ;;  %v1419_v11 = vmul.f32 %v1323_v33, %v1323_v33  ;;  %3762 = vpow2.f32 %v1177_v31  ;;  %v4994_v63 = vadd.f32 %v4949_v50, %v4836_v27 }
 0x17d   :  { %v3749_v6 = vpop.eup %3748  ;;  %3764 = vrcp.f32 %v1612_v44  ;;  %v4998_v59 = vadd.f32 %v4949_v50, %v4838_v61  ;;  %v5000_v41 = vpop.f32.mrb[60].mxu0  ;;  %v3014_v13 = vadd.f32 -1.0, %v1417_v48  ;;  %v1175_v23 = vmul.f32 1.442695, %v1041_v29 }
 0x17e   :  { %v3751_v4 = vpop.eup %3750  ;;  %v1732_v15 = vmul.f32 %v3749_v6, %v3012_v57  ;;  %v1611_v18 = vadd.f32 1.0, %v1419_v11  ;;  %v5002_v54 = vpop.f32.mrb[61].mxu0  ;;  %v1044_v34 = vmin.f32 %v4994_v63, 20.0  ;;  %v5008_v22 = vadd.f32 %v4949_v50, %v4849_v10 }
 0x17f   :  { %5915 = vst [vmem:[#allocation11_spill] sm:$0xff] %v5002_v54  ;;  %v3753_v28 = vpop.eup %3752  ;;  %v1738_v51 = vmul.f32 %v3751_v4, %v3015_v53  ;;  %v1043_v27 = vmin.f32 %v4998_v59, 20.0  ;;  %v5015_v57 = vadd.f32 %v4949_v50, %v4851_v40 }
 0x180   :  { %v3755_v61 = vpop.eup %3754  ;;  %v5011_v47 = vmul.f32 %v1732_v15, %v4843_v55  ;;  %3766 = vrcp.f32 %v1611_v18  ;;  %v1326_v48 = vadd.f32 1.0, %v3753_v28  ;;  %v1181_v33 = vmul.f32 1.442695, %v1044_v34 }
 0x181   :  { %v5018_v31 = vmul.f32 %v1738_v51, %v4847_v49  ;;  %v1325_v58 = vadd.f32 1.0, %v3755_v61  ;;  %3768 = vpow2.f32 %v1175_v23  ;;  %v5020_v53 = vpop.f32.mrb[62].mxu0  ;;  %v1179_v29 = vmul.f32 1.442695, %v1043_v27 }
 0x182   :  { %5916 = vst [vmem:[#allocation12_spill] sm:$0xff] %v5020_v53  ;;  %v2043_v55 = vadd.f32 %v2042_v0, %v5011_v47  ;;  %v1422_v44 = vmul.f32 %v1326_v48, %v1326_v48  ;;  %v5025_v6 = vpop.f32.mrb[63].mxu0  ;;  %3770 = vpow2.f32 %v1181_v33  ;;  %v1046_v15 = vmin.f32 %v5008_v22, 20.0 }
 0x183   :  { %5917 = vst [vmem:[#allocation13_spill] sm:$0xff] %v5025_v6  ;;  %v3757_v4 = vpop.eup %3756  ;;  %v1421_v49 = vmul.f32 %v1325_v58, %v1325_v58  ;;  %v3017_v51 = vadd.f32 -1.0, %v1420_v56  ;;  %v3016_v0 = vadd.f32 -1.0, %v1419_v11  ;;  %3772 = vpow2.f32 %v1179_v29 }
 0x184   :  { %v3759_v18 = vpop.eup %3758  ;;  %v1736_v23 = vmul.f32 %v3757_v4, %v3014_v13  ;;  %v2044_v28 = vadd.f32 %v2043_v55, %v4987_v7  ;;  %v1614_v34 = vadd.f32 1.0, %v1422_v44  ;;  %v1185_v33 = vmul.f32 1.442695, %v1046_v15 }
 0x185   :  { %v3761_v61 = vpop.eup %3760  ;;  %v1613_v48 = vadd.f32 1.0, %v1421_v49  ;;  %v1328_v27 = vadd.f32 1.0, %v3759_v18  ;;  %v5031_v10 = vpop.f32.mrb[64].mxu0  ;;  %v1045_v11 = vmin.f32 %v5015_v57, 20.0 }
 0x186   :  { %5918 = vst [vmem:[#allocation14_spill] sm:$0xff] %v5031_v10  ;;  %v3763_v24 = vpop.eup %3762  ;;  %v5034_v40 = vmul.f32 %v1736_v23, %v4874_v60  ;;  %3774 = vrcp.f32 %v1614_v34  ;;  %v1327_v58 = vadd.f32 1.0, %v3761_v61  ;;  %v5036_v6 = vpop.f32.mrb[65].mxu0  ;;  %v3019_v60 = vadd.f32 -1.0, %v1422_v44 }
 0x187   :  { %5919 = vst [vmem:[#allocation15_spill] sm:$0xff] %v5036_v6  ;;  %v3765_v13 = vpop.eup %3764  ;;  %3776 = vrcp.f32 %v1613_v48  ;;  %v1424_v56 = vmul.f32 %v1328_v27, %v1328_v27  ;;  %v1330_v55 = vadd.f32 1.0, %v3763_v24  ;;  %v3018_v27 = vadd.f32 -1.0, %v1421_v49 }
 0x188   :  { %v2045_v4 = vadd.f32 %v2044_v28, %v5034_v40  ;;  %v1742_v18 = vmul.f32 %v3765_v13, %v3017_v51  ;;  %v1423_v10 = vmul.f32 %v1327_v58, %v1327_v58  ;;  %3778 = vpow2.f32 %v1185_v33 }
 0x189   :  { %v1616_v23 = vadd.f32 1.0, %v1424_v56  ;;  %v1426_v34 = vmul.f32 %v1330_v55, %v1330_v55  ;;  %v5042_v15 = vpop.f32.mrb[66].mxu0  ;;  %v3021_v28 = vadd.f32 -1.0, %v1424_v56  ;;  %v5921_v44 = vmax.f32 %v4930_v26, %v4987_v7 }
 0x18a   :  { %v3767_v61 = vpop.eup %3766  ;;  %v1900_v48 = vmul.f32 %v1742_v18, %v4880_v8  ;;  %v2046_v24 = vadd.f32 %v2045_v4, %v5018_v31  ;;  %v1615_v6 = vadd.f32 1.0, %v1423_v10  ;;  %v5046_v53 = vpop.f32.mrb[67].mxu0  ;;  %v1183_v13 = vmul.f32 1.442695, %v1045_v11 }
 0x18b   :  { %5920 = vst [vmem:[#allocation16_spill] sm:$0xff] %v5046_v53  ;;  %v3769_v29 = vpop.eup %3768  ;;  %v1740_v54 = vmul.f32 %v3767_v61, %v3016_v0  ;;  %3780 = vrcp.f32 %v1616_v23  ;;  %v1618_v51 = vadd.f32 1.0, %v1426_v34  ;;  %v5056_v49 = vadd.f32 %v4949_v50, %v4856_v42 }
 0x18c   :  { %v5051_v58 = vmax.f32 %v5921_v44, %v1900_v48  ;;  %3782 = vrcp.f32 %v1615_v6  ;;  %v1329_v33 = vadd.f32 1.0, %v3769_v29  ;;  %v3771_v8 = vpop.eup %3770  ;;  %v5060_v0 = vadd.f32 %v4949_v50, %v4863_v12 }
 0x18d   :  { %v1899_v55 = vmul.f32 %v1740_v54, %v4889_v43  ;;  %3784 = vrcp.f32 %v1618_v51  ;;  %v5062_v56 = vpop.f32.mrb[68].mxu0  ;;  %v1332_v7 = vadd.f32 1.0, %v3771_v8  ;;  %v5066_v6 = vadd.f32 %v4949_v50, %v4876_v5  ;;  %v3773_v43 = vpop.eup %3772 }
 0x18e   :  { %5922 = vst [vmem:[#allocation17_spill] sm:$0xff] %v5062_v56  ;;  %v1425_v26 = vmul.f32 %v1329_v33, %v1329_v33  ;;  %3786 = vpow2.f32 %v1183_v13  ;;  %v5068_v11 = vpop.f32.mrb[69].mxu0  ;;  %v5924_v42 = vmax.f32 %v4933_v35, %v5011_v47  ;;  %v1048_v12 = vmin.f32 %v5056_v49, 20.0 }
 0x18f   :  { %5923 = vst [vmem:[#allocation18_spill] sm:$0xff] %v5068_v11  ;;  %v2047_v29 = vadd.f32 %v2046_v24, %v1899_v55  ;;  %v1047_v4 = vmin.f32 %v5060_v0, 20.0  ;;  %v3020_v23 = vadd.f32 -1.0, %v1423_v10  ;;  %v1428_v51 = vmul.f32 %v1332_v7, %v1332_v7 }
 0x190   :  { %v5073_v54 = vmax.f32 %v5924_v42, %v1899_v55  ;;  %v3775_v18 = vpop.eup %3774  ;;  %v1617_v61 = vadd.f32 1.0, %v1425_v26  ;;  %v1331_v44 = vadd.f32 1.0, %v3773_v43  ;;  %v1189_v8 = vmul.f32 1.442695, %v1048_v12 }
 0x191   :  { %v3777_v5 = vpop.eup %3776  ;;  %v1746_v33 = vmul.f32 %v3775_v18, %v3019_v60  ;;  %v2048_v13 = vadd.f32 %v2047_v29, %v1900_v48  ;;  %v1187_v11 = vmul.f32 1.442695, %v1047_v4  ;;  %v5077_v56 = vpop.f32.mrb[70].mxu0  ;;  %v3023_v47 = vadd.f32 -1.0, %v1426_v34 }
 0x192   :  { %v1744_v35 = vmul.f32 %v3777_v5, %v3018_v27  ;;  %3788 = vrcp.f32 %v1617_v61  ;;  %v1620_v24 = vadd.f32 1.0, %v1428_v51  ;;  %v5079_v55 = vpop.f32.mrb[71].mxu0  ;;  %v3779_v42 = vpop.eup %3778  ;;  %v1427_v10 = vmul.f32 %v1331_v44, %v1331_v44 }
 0x193   :  { %v1902_v53 = vmul.f32 %v1746_v33, %v4926_v21  ;;  %3790 = vpow2.f32 %v1189_v8  ;;  %v1050_v7 = vmin.f32 %v5066_v6, 20.0  ;;  %v1334_v48 = vadd.f32 1.0, %v3779_v42 }
 0x194   :  { %v1901_v60 = vmul.f32 %v1744_v35, %v4938_v19  ;;  %3792 = vrcp.f32 %v1620_v24  ;;  %v5086_v43 = vadd.f32 %v4949_v50, %v4882_v2  ;;  %v5925_v27 = vmax.f32 %v4959_v36, %v5018_v31 }
 0x195   :  { %v3781_v34 = vpop.eup %3780  ;;  %v3022_v12 = vadd.f32 -1.0, %v1425_v26  ;;  %v1619_v21 = vadd.f32 1.0, %v1427_v10  ;;  %3794 = vpow2.f32 %v1187_v11  ;;  %v5093_v4 = vpop.f32.mrb[72].mxu0  ;;  %v5926_v19 = vmax.f32 %v4982_v9, %v5034_v40 }
 0x196   :  { %v5091_v29 = vmax.f32 %v5925_v27, %v1902_v53  ;;  %v3783_v18 = vpop.eup %3782  ;;  %v2049_v44 = vadd.f32 %v2048_v13, %v1901_v60  ;;  %v1750_v2 = vmul.f32 %v3781_v34, %v3021_v28  ;;  %v1430_v5 = vmul.f32 %v1334_v48, %v1334_v48  ;;  %v5100_v33 = vpop.f32.mrb[73].mxu0 }
 0x197   :  { %v5098_v61 = vmax.f32 %v5926_v19, %v1901_v60  ;;  %v3785_v8 = vpop.eup %3784  ;;  %v1748_v36 = vmul.f32 %v3783_v18, %v3020_v23  ;;  %3796 = vrcp.f32 %v1619_v21  ;;  %v1193_v31 = vmul.f32 1.442695, %v1050_v7 }
 0x198   :  { %v1049_v26 = vmin.f32 %v5086_v43, 20.0  ;;  %v3787_v11 = vpop.eup %3786  ;;  %v1904_v35 = vmul.f32 %v1750_v2, %v4953_v14  ;;  %v2050_v24 = vadd.f32 %v2049_v44, %v1902_v53  ;;  %v1754_v42 = vmul.f32 %v3785_v8, %v3023_v47 }
 0x199   :  { %v3025_v27 = vadd.f32 -1.0, %v1428_v51  ;;  %v5105_v9 = vmul.f32 %v1748_v36, %v4957_v25  ;;  %v1622_v40 = vadd.f32 1.0, %v1430_v5  ;;  %v1333_v28 = vadd.f32 1.0, %v3787_v11  ;;  %v5107_v13 = vpop.f32.mrb[74].mxu0 }
 0x19a   :  { %3798 = vpow2.f32 %v1193_v31  ;;  %v1996_v23 = vmax.f32 %v5051_v58, %v1904_v35  ;;  %v5111_v7 = vmul.f32 %v1754_v42, %v4963_v17  ;;  %v1191_v60 = vmul.f32 1.442695, %v1049_v26  ;;  %v5117_v53 = vpop.f32.mrb[75].mxu0 }
 0x19b   :  { %v5115_v14 = vadd.f32 %v4949_v50, %v4897_v16  ;;  %v1995_v25 = vmax.f32 %v5073_v54, %v5105_v9  ;;  %v2051_v51 = vadd.f32 %v2050_v24, %v5105_v9  ;;  %3800 = vrcp.f32 %v1622_v40 }
 0x19c   :  { %v1429_v47 = vmul.f32 %v1333_v28, %v1333_v28  ;;  %v3789_v48 = vpop.eup %3788  ;;  %v1998_v58 = vmax.f32 %v5091_v29, %v5111_v7  ;;  %3802 = vpow2.f32 %v1191_v60  ;;  %v5127_v16 = vadd.f32 %v4949_v50, %v4900_v32 }
 0x19d   :  { %v1052_v17 = vmin.f32 %v5115_v14, 20.0  ;;  %v3791_v34 = vpop.eup %3790  ;;  %v1752_v21 = vmul.f32 %v3789_v48, %v3022_v12  ;;  %v2052_v18 = vadd.f32 %v2051_v51, %v1904_v35  ;;  %v3024_v19 = vadd.f32 -1.0, %v1427_v10  ;;  %v5129_v44 = vpop.f32.mrb[76].mxu0 }
 0x19e   :  { %v1621_v54 = vadd.f32 1.0, %v1429_v47  ;;  %v3793_v2 = vpop.eup %3792  ;;  %v1336_v8 = vadd.f32 1.0, %v3791_v34  ;;  %v1051_v31 = vmin.f32 %v5127_v16, 20.0  ;;  %v5134_v26 = vadd.f32 %v4949_v50, %v4907_v1  ;;  %v5136_v11 = vpop.f32.mrb[77].mxu0 }
 0x19f   :  { %v1197_v36 = vmul.f32 1.442695, %v1052_v17  ;;  %v3795_v32 = vpop.eup %3794  ;;  %v5139_v24 = vmul.f32 %v1752_v21, %v4975_v46  ;;  %v1758_v12 = vmul.f32 %v3793_v2, %v3025_v27  ;;  %v5143_v10 = vadd.f32 %v4949_v50, %v4915_v62 }
 0x1a0   :  { %3804 = vrcp.f32 %v1621_v54  ;;  %v1432_v35 = vmul.f32 %v1336_v8, %v1336_v8  ;;  %v1335_v42 = vadd.f32 1.0, %v3795_v32  ;;  %v1195_v9 = vmul.f32 1.442695, %v1051_v31 }
 0x1a1   :  { %3806 = vpow2.f32 %v1197_v36  ;;  %v3797_v40 = vpop.eup %3796  ;;  %v1997_v1 = vmax.f32 %v5098_v61, %v5139_v24  ;;  %v2053_v28 = vadd.f32 %v2052_v18, %v5139_v24  ;;  %v1908_v60 = vmul.f32 %v1758_v12, %v4994_v63  ;;  %v5150_v27 = vpop.f32.mrb[78].mxu0 }
 0x1a2   :  { %v1054_v46 = vmin.f32 %v5134_v26, 20.0  ;;  %v1756_v51 = vmul.f32 %v3797_v40, %v3024_v19  ;;  %v3027_v48 = vadd.f32 -1.0, %v1430_v5  ;;  %v1624_v62 = vadd.f32 1.0, %v1432_v35  ;;  %v5154_v34 = vpop.f32.mrb[79].mxu0 }
 0x1a3   :  { %v5152_v17 = vmul.f32 %v1335_v42, %v1335_v42  ;;  %v5156_v54 = vmax.f32 %v1996_v23, %v1908_v60  ;;  %v2054_v2 = vadd.f32 %v2053_v28, %v5111_v7  ;;  %3808 = vpow2.f32 %v1195_v9 }
 0x1a4   :  { %v3799_v21 = vpop.eup %3798  ;;  %v1201_v18 = vmul.f32 1.442695, %v1054_v46  ;;  %v1907_v63 = vmul.f32 %v1756_v51, %v4998_v59  ;;  %v3026_v8 = vadd.f32 -1.0, %v1429_v47  ;;  %3810 = vrcp.f32 %v1624_v62 }
 0x1a5   :  { %v1623_v36 = vadd.f32 1.0, %v5152_v17  ;;  %v3801_v19 = vpop.eup %3800  ;;  %v1338_v5 = vadd.f32 1.0, %v3799_v21  ;;  %v1053_v31 = vmin.f32 %v5143_v10, 20.0  ;;  %v5164_v32 = vadd.f32 %v4949_v50, %v4921_v52  ;;  %v5166_v23 = vpop.f32.mrb[80].mxu0 }
 0x1a6   :  { %3812 = vpow2.f32 %v1201_v18  ;;  %v3803_v12 = vpop.eup %3802  ;;  %v5168_v42 = vmax.f32 %v1995_v25, %v1907_v63  ;;  %v2055_v9 = vadd.f32 %v2054_v2, %v1907_v63  ;;  %v1762_v59 = vmul.f32 %v3801_v19, %v3027_v48  ;;  %v5170_v47 = vpop.f32.mrb[81].mxu0 }
 0x1a7   :  { %3814 = vrcp.f32 %v1623_v36  ;;  %v1434_v40 = vmul.f32 %v1338_v5, %v1338_v5  ;;  %v1337_v28 = vadd.f32 1.0, %v3803_v12  ;;  %v1199_v46 = vmul.f32 1.442695, %v1053_v31 }
 0x1a8   :  { %v1056_v51 = vmin.f32 %v5164_v32, 20.0  ;;  %v1910_v62 = vmul.f32 %v1762_v59, %v5008_v22  ;;  %v2056_v21 = vadd.f32 %v2055_v9, %v1908_v60  ;;  %v5176_v52 = vadd.f32 %v4949_v50, %v4928_v37 }
 0x1a9   :  { %v5180_v25 = vadd.f32 %v4949_v50, %v4940_v30  ;;  %v1626_v2 = vadd.f32 1.0, %v1434_v40  ;;  %v1433_v18 = vmul.f32 %v1337_v28, %v1337_v28  ;;  %3816 = vpow2.f32 %v1199_v46  ;;  %v5182_v63 = vpop.f32.mrb[82].mxu0 }
 0x1aa   :  { %v3805_v48 = vpop.eup %3804  ;;  %v5187_v22 = vmax.f32 %v1998_v58, %v1910_v62  ;;  %v1205_v19 = vmul.f32 1.442695, %v1056_v51  ;;  %v1055_v37 = vmin.f32 %v5176_v52, 20.0  ;;  %v5190_v5 = vpop.f32.mrb[83].mxu0  ;;  %v3029_v30 = vadd.f32 -1.0, %v1432_v35 }
 0x1ab   :  { %v3807_v36 = vpop.eup %3806  ;;  %v1760_v60 = vmul.f32 %v3805_v48, %v3026_v8  ;;  %5927 = vst [vmem:[#allocation19_spill] sm:$0xff] %v5190_v5  ;;  %3818 = vrcp.f32 %v1626_v2  ;;  %v1625_v31 = vadd.f32 1.0, %v1433_v18  ;;  %v1058_v28 = vmin.f32 %v5180_v25, 20.0 }
 0x1ac   :  { %v1340_v12 = vadd.f32 1.0, %v3807_v36  ;;  %3820 = vpow2.f32 %v1205_v19  ;;  %v1203_v59 = vmul.f32 1.442695, %v1055_v37  ;;  %v5196_v7 = vadd.f32 %v4949_v50, %v4943_v20 }
 0x1ad   :  { %v1909_v9 = vmul.f32 %v1760_v60, %v5015_v57  ;;  %v3809_v46 = vpop.eup %3808  ;;  %3822 = vrcp.f32 %v1625_v31  ;;  %v5200_v58 = vadd.f32 %v4949_v50, %v4965_v39  ;;  %v5202_v35 = vpop.f32.mrb[84].mxu0  ;;  %v3028_v60 = vadd.f32 -1.0, %v5152_v17 }
 0x1ae   :  { %v1436_v29 = vmul.f32 %v1340_v12, %v1340_v12  ;;  %5928 = vst [vmem:[#allocation20_spill] sm:$0xff] %v5202_v35  ;;  %v3811_v8 = vpop.eup %3810  ;;  %v1339_v48 = vadd.f32 1.0, %v3809_v46  ;;  %3824 = vpow2.f32 %v1203_v59  ;;  %v5209_v2 = vpop.f32.mrb[85].mxu0  ;;  %v1209_v39 = vmul.f32 1.442695, %v1058_v28 }
 0x1af   :  { %v5207_v57 = vmax.f32 %v1997_v1, %v1909_v9  ;;  %v2057_v51 = vadd.f32 %v2056_v21, %v1909_v9  ;;  %v1766_v20 = vmul.f32 %v3811_v8, %v3029_v30  ;;  %v1057_v5 = vmin.f32 %v5196_v7, 20.0 }
 0x1b0   :  { %v3813_v36 = vpop.eup %3812  ;;  %v1628_v19 = vadd.f32 1.0, %v1436_v29  ;;  %v1435_v12 = vmul.f32 %v1339_v48, %v1339_v48  ;;  %v1060_v1 = vmin.f32 %v5200_v58, 20.0  ;;  %v3031_v9 = vadd.f32 -1.0, %v1434_v40 }
 0x1b1   :  { %v3815_v37 = vpop.eup %3814  ;;  %v2058_v31 = vadd.f32 %v2057_v51, %v1910_v62  ;;  %v1342_v35 = vadd.f32 1.0, %v3813_v36  ;;  %v1912_v61 = vmul.f32 %v1766_v20, %v5056_v49  ;;  %v5215_v21 = vpop.f32.mrb[86].mxu0  ;;  %v1207_v8 = vmul.f32 1.442695, %v1057_v5 }
 0x1b2   :  { %v1764_v24 = vmul.f32 %v3815_v37, %v3028_v60  ;;  %3826 = vrcp.f32 %v1628_v19  ;;  %v1627_v30 = vadd.f32 1.0, %v1435_v12  ;;  %v5217_v17 = vpop.f32.mrb[87].mxu0  ;;  %v1213_v51 = vmul.f32 1.442695, %v1060_v1 }
 0x1b3   :  { %v1438_v59 = vmul.f32 %v1342_v35, %v1342_v35  ;;  %3828 = vpow2.f32 %v1209_v39  ;;  %v3817_v28 = vpop.eup %3816  ;;  %v2004_v62 = vmax.f32 %v5156_v54, %v1912_v61  ;;  %v3030_v49 = vadd.f32 -1.0, %v1433_v18 }
 0x1b4   :  { %v1911_v46 = vmul.f32 %v1764_v24, %v5060_v0  ;;  %3830 = vrcp.f32 %v1627_v30  ;;  %v1341_v36 = vadd.f32 1.0, %v3817_v28  ;;  %v5224_v35 = vadd.f32 %v4949_v50, %v4969_v3 }
 0x1b5   :  { %v1630_v48 = vadd.f32 1.0, %v1438_v59  ;;  %v3819_v20 = vpop.eup %3818  ;;  %3832 = vpow2.f32 %v1207_v8  ;;  %v5226_v19 = vpop.f32.mrb[88].mxu0  ;;  %v5230_v18 = vadd.f32 %v4949_v50, %v4977_v38  ;;  %v3033_v28 = vadd.f32 -1.0, %v1436_v29 }
 0x1b6   :  { %v2003_v60 = vmax.f32 %v5168_v42, %v1911_v46  ;;  %v2059_v40 = vadd.f32 %v2058_v31, %v1911_v46  ;;  %5929 = vst [vmem:[#allocation21_spill] sm:$0xff] %v5226_v19  ;;  %v3821_v54 = vpop.eup %3820  ;;  %v1770_v39 = vmul.f32 %v3819_v20, %v3031_v9  ;;  %v1437_v0 = vmul.f32 %v1341_v36, %v1341_v36  ;;  %v5232_v5 = vpop.f32.mrb[89].mxu0 }
 0x1b7   :  { %3834 = vrcp.f32 %v1630_v48  ;;  %5930 = vst [vmem:[#allocation22_spill] sm:$0xff] %v5232_v5  ;;  %v3823_v37 = vpop.eup %3822  ;;  %v1344_v24 = vadd.f32 1.0, %v3821_v54  ;;  %v1059_v48 = vmin.f32 %v5224_v35, 20.0  ;;  %v1062_v38 = vmin.f32 %v5230_v18, 20.0 }
 0x1b8   :  { %v2007_v42 = vmax.f32 %v2003_v60, %v2004_v62  ;;  %v2060_v31 = vadd.f32 %v2059_v40, %v1912_v61  ;;  %3836 = vpow2.f32 %v1213_v51  ;;  %v3825_v1 = vpop.eup %3824  ;;  %v1914_v3 = vmul.f32 %v1770_v39, %v5066_v6 }
 0x1b9   :  { %v1768_v30 = vmul.f32 %v3823_v37, %v3030_v49  ;;  %v1629_v46 = vadd.f32 1.0, %v1437_v0  ;;  %v1440_v9 = vmul.f32 %v1344_v24, %v1344_v24  ;;  %v1343_v8 = vadd.f32 1.0, %v3825_v1  ;;  %v5237_v36 = vpop.f32.mrb[90].mxu0 }
 0x1ba   :  { %5931 = vst [vmem:[#allocation23_spill] sm:$0xff] %v5237_v36  ;;  %v2006_v20 = vmax.f32 %v5187_v22, %v1914_v3  ;;  %v3032_v62 = vadd.f32 -1.0, %v1435_v12  ;;  %v5241_v51 = vpop.f32.mrb[91].mxu0  ;;  %v1211_v60 = vmul.f32 1.442695, %v1059_v48  ;;  %v5245_v40 = vadd.f32 %v4949_v50, %v4984_v45 }
 0x1bb   :  { %v1913_v61 = vmul.f32 %v1768_v30, %v5086_v43  ;;  %3838 = vrcp.f32 %v1629_v46  ;;  %5932 = vst [vmem:[#allocation24_spill] sm:$0xff] %v5241_v51  ;;  %v1632_v49 = vadd.f32 1.0, %v1440_v9  ;;  %v1439_v29 = vmul.f32 %v1343_v8, %v1343_v8 }
 0x1bc   :  { %v3827_v6 = vpop.eup %3826  ;;  %v1217_v22 = vmul.f32 1.442695, %v1062_v38  ;;  %v3035_v1 = vadd.f32 -1.0, %v1438_v59  ;;  %v1061_v59 = vmin.f32 %v5245_v40, 20.0 }
 0x1bd   :  { %v3829_v54 = vpop.eup %3828  ;;  %v2005_v39 = vmax.f32 %v5207_v57, %v1913_v61  ;;  %v2061_v37 = vadd.f32 %v2060_v31, %v1913_v61  ;;  %v1774_v24 = vmul.f32 %v3827_v6, %v3033_v28  ;;  %3840 = vrcp.f32 %v1632_v49  ;;  %v5248_v30 = vpop.f32.mrb[92].mxu0 }
 0x1be   :  { %v1631_v43 = vadd.f32 1.0, %v1439_v29  ;;  %v1346_v12 = vadd.f32 1.0, %v3829_v54  ;;  %5933 = vst [vmem:[#allocation25_spill] sm:$0xff] %v5248_v30  ;;  %v3831_v46 = vpop.eup %3830  ;;  %3842 = vpow2.f32 %v1211_v60  ;;  %v5255_v45 = vpop.f32.mrb[93].mxu0  ;;  %v3034_v54 = vadd.f32 -1.0, %v1437_v0 }
 0x1bf   :  { %v2008_v51 = vmax.f32 %v2005_v39, %v2006_v20  ;;  %v5250_v8 = vadd.f32 %v2061_v37, %v1914_v3  ;;  %v5253_v48 = vmul.f32 %v1774_v24, %v5115_v14  ;;  %5935 = vst [vmem:[#allocation27_spill] sm:$0xff] %v5255_v45  ;;  %v3833_v57 = vpop.eup %3832  ;;  %v1772_v31 = vmul.f32 %v3831_v46, %v3032_v62 }
 0x1c0   :  { %3844 = vrcp.f32 %v1631_v43  ;;  %v1442_v28 = vmul.f32 %v1346_v12, %v1346_v12  ;;  %v1345_v6 = vadd.f32 1.0, %v3833_v57  ;;  %v5274_v0 = vadd.f32 %v4949_v50, %v5000_v41 }
 0x1c1   :  { %5934 = vst [vmem:[#allocation26_spill] sm:$0xff] %v5250_v8  ;;  %v3835_v38 = vpop.eup %3834  ;;  %v5258_v61 = vmax.f32 %v2007_v42, %v2008_v51  ;;  %3846 = vpow2.f32 %v1217_v22  ;;  %v5261_v3 = vmul.f32 %v1772_v31, %v5127_v16  ;;  %v5263_v60 = vpop.f32.mrb[94].mxu0  ;;  %v3037_v42 = vadd.f32 -1.0, %v1440_v9  ;;  %v5939_v31 = vld [vmem:[#allocation11_spill] sm:$0xff] }
 0x1c2   :  { %v3837_v20 = vpop.eup %3836  ;;  %v1778_v14 = vmul.f32 %v3835_v38, %v3035_v1  ;;  %v1634_v49 = vadd.f32 1.0, %v1442_v28  ;;  %5937 = vst [vmem:[#allocation29_spill] sm:$0xff] %v5263_v60  ;;  %v1441_v39 = vmul.f32 %v1345_v6, %v1345_v6  ;;  %v5265_v37 = vpop.f32.mrb[95].mxu0  ;;  %v1215_v51 = vmul.f32 1.442695, %v1061_v59  ;;  %v5940_v59 = vld [vmem:[#allocation12_spill] sm:$0xff] }
 0x1c3   :  { %5936 = vst [vmem:[#allocation28_spill] sm:$0xff] %v5258_v61  ;;  %v1348_v62 = vadd.f32 1.0, %v3837_v20  ;;  %5938 = vst [vmem:[#allocation30_spill] sm:$0xff] %v5265_v37  ;;  %v2123_v24 = vadd.f32 %v5253_v48, %v5261_v3  ;;  %v3036_v16 = vadd.f32 -1.0, %v1439_v29  ;;  %v3039_v1 = vadd.f32 -1.0, %v1442_v28 }
 0x1c4   :  { %3848 = vrcp.f32 %v1634_v49  ;;  %v5270_v43 = vmul.f32 %v1778_v14, %v5134_v26  ;;  %v1633_v12 = vadd.f32 1.0, %v1441_v39  ;;  %v5278_v9 = vadd.f32 %v4949_v50, %v5939_v31  ;;  %v5941_v26 = vld [vmem:[#allocation13_spill] sm:$0xff] }
 0x1c5   :  { %v3839_v22 = vpop.eup %3838  ;;  %v1444_v57 = vmul.f32 %v1348_v62, %v1348_v62  ;;  %3850 = vpow2.f32 %v1215_v51  ;;  %v5282_v38 = vadd.f32 %v4949_v50, %v5940_v59  ;;  %v5286_v29 = vadd.f32 %v4949_v50, %v5941_v26 }
 0x1c6   :  { %v1776_v46 = vmul.f32 %v3839_v22, %v3034_v54  ;;  %3852 = vrcp.f32 %v1633_v12  ;;  %v3038_v20 = vadd.f32 -1.0, %v1441_v39  ;;  %v1064_v14 = vmin.f32 %v5274_v0, 20.0 }
 0x1c7   :  { %v3841_v28 = vpop.eup %3840  ;;  %v1636_v41 = vadd.f32 1.0, %v1444_v57  ;;  %v1063_v62 = vmin.f32 %v5278_v9, 20.0  ;;  %v1066_v51 = vmin.f32 %v5282_v38, 20.0  ;;  %v1065_v22 = vmin.f32 %v5286_v29, 20.0 }
 0x1c8   :  { %v5289_v6 = vmul.f32 %v1776_v46, %v5143_v10  ;;  %v3843_v49 = vpop.eup %3842  ;;  %v1782_v54 = vmul.f32 %v3841_v28, %v3037_v42  ;;  %v1221_v26 = vmul.f32 1.442695, %v1064_v14 }
 0x1c9   :  { %3854 = vrcp.f32 %v1636_v41  ;;  %v1347_v59 = vadd.f32 1.0, %v3843_v49  ;;  %v1219_v61 = vmul.f32 1.442695, %v1063_v62  ;;  %v1225_v8 = vmul.f32 1.442695, %v1066_v51 }
 0x1ca   :  { %v3845_v12 = vpop.eup %3844  ;;  %v2124_v31 = vadd.f32 %v2123_v24, %v5289_v6  ;;  %v5297_v39 = vmul.f32 %v1782_v54, %v5164_v32  ;;  %3856 = vpow2.f32 %v1221_v26  ;;  %v1223_v41 = vmul.f32 1.442695, %v1065_v22 }
 0x1cb   :  { %v3847_v10 = vpop.eup %3846  ;;  %v1780_v46 = vmul.f32 %v3845_v12, %v3036_v16  ;;  %v1443_v28 = vmul.f32 %v1347_v59, %v1347_v59  ;;  %3858 = vpow2.f32 %v1219_v61  ;;  %v3041_v49 = vadd.f32 -1.0, %v1444_v57  ;;  %v5943_v59 = vld [vmem:[#allocation15_spill] sm:$0xff] }
 0x1cc   :  { %v2125_v42 = vadd.f32 %v2124_v31, %v5270_v43  ;;  %v1350_v37 = vadd.f32 1.0, %v3847_v10  ;;  %v2071_v60 = vmax.f32 %v5253_v48, %v5297_v39  ;;  %3860 = vpow2.f32 %v1225_v8 }
 0x1cd   :  { %v5303_v24 = vmul.f32 %v1780_v46, %v5176_v52  ;;  %v1635_v32 = vadd.f32 1.0, %v1443_v28  ;;  %3862 = vpow2.f32 %v1223_v41  ;;  %v3040_v31 = vadd.f32 -1.0, %v1443_v28  ;;  %v5942_v52 = vld [vmem:[#allocation14_spill] sm:$0xff] }
 0x1ce   :  { %v3849_v14 = vpop.eup %3848  ;;  %v1446_v54 = vmul.f32 %v1350_v37, %v1350_v37  ;;  %v5310_v61 = vadd.f32 %v4949_v50, %v5942_v52  ;;  %v5318_v26 = vadd.f32 %v4949_v50, %v5943_v59  ;;  %v5323_v46 = vadd.f32 %v4949_v50, %v5042_v15 }
 0x1cf   :  { %v2126_v62 = vadd.f32 %v2125_v42, %v5303_v24  ;;  %v1786_v51 = vmul.f32 %v3849_v14, %v3039_v1  ;;  %v3851_v12 = vpop.eup %3850  ;;  %3864 = vrcp.f32 %v1635_v32 }
 0x1d0   :  { %v1638_v48 = vadd.f32 1.0, %v1446_v54  ;;  %v3853_v22 = vpop.eup %3852  ;;  %v1349_v37 = vadd.f32 1.0, %v3851_v12  ;;  %v1068_v10 = vmin.f32 %v5310_v61, 20.0  ;;  %v1067_v28 = vmin.f32 %v5318_v26, 20.0 }
 0x1d1   :  { %v5313_v57 = vmul.f32 %v1786_v51, %v5180_v25  ;;  %v2127_v8 = vadd.f32 %v2126_v62, %v5297_v39  ;;  %v1784_v1 = vmul.f32 %v3853_v22, %v3038_v20  ;;  %v5944_v39 = vld [vmem:[#allocation16_spill] sm:$0xff]  ;;  %v1070_v62 = vmin.f32 %v5323_v46, 20.0  ;;  %v5945_v51 = vld [vmem:[#allocation17_spill] sm:$0xff] }
 0x1d2   :  { %3866 = vrcp.f32 %v1638_v48  ;;  %v1445_v25 = vmul.f32 %v1349_v37, %v1349_v37  ;;  %v5330_v41 = vadd.f32 %v4949_v50, %v5944_v39  ;;  %v1229_v32 = vmul.f32 1.442695, %v1068_v10 }
 0x1d3   :  { %v3855_v14 = vpop.eup %3854  ;;  %v5333_v20 = vmul.f32 %v1784_v1, %v5196_v7  ;;  %v5338_v15 = vadd.f32 %v4949_v50, %v5945_v51  ;;  %v3043_v48 = vadd.f32 -1.0, %v1446_v54  ;;  %v1227_v22 = vmul.f32 1.442695, %v1067_v28 }
 0x1d4   :  { %v1790_v12 = vmul.f32 %v3855_v14, %v3041_v49  ;;  %v1637_v52 = vadd.f32 1.0, %v1445_v25  ;;  %v3857_v37 = vpop.eup %3856  ;;  %3868 = vpow2.f32 %v1229_v32  ;;  %v1233_v7 = vmul.f32 1.442695, %v1070_v62 }
 0x1d5   :  { %v2128_v39 = vadd.f32 %v2127_v8, %v5333_v20  ;;  %v3859_v1 = vpop.eup %3858  ;;  %v1352_v42 = vadd.f32 1.0, %v3857_v37  ;;  %v1069_v50 = vmin.f32 %v5330_v41, 20.0  ;;  %v1072_v28 = vmin.f32 %v5338_v15, 20.0 }
 0x1d6   :  { %v1924_v10 = vmul.f32 %v1790_v12, %v5200_v58  ;;  %3870 = vrcp.f32 %v1637_v52  ;;  %v3861_v51 = vpop.eup %3860  ;;  %v1351_v54 = vadd.f32 1.0, %v3859_v1  ;;  %v3042_v16 = vadd.f32 -1.0, %v1445_v25 }
 0x1d7   :  { %v2129_v49 = vadd.f32 %v2128_v39, %v5313_v57  ;;  %3872 = vpow2.f32 %v1227_v22  ;;  %v3863_v14 = vpop.eup %3862  ;;  %v1448_v8 = vmul.f32 %v1352_v42, %v1352_v42  ;;  %v1354_v32 = vadd.f32 1.0, %v3861_v51 }
 0x1d8   :  { %v5347_v59 = vmax.f32 %v2071_v60, %v1924_v10  ;;  %3874 = vpow2.f32 %v1233_v7  ;;  %v1447_v58 = vmul.f32 %v1351_v54, %v1351_v54  ;;  %v1353_v12 = vadd.f32 1.0, %v3863_v14 }
 0x1d9   :  { %v3865_v62 = vpop.eup %3864  ;;  %v1231_v52 = vmul.f32 1.442695, %v1069_v50  ;;  %v1640_v45 = vadd.f32 1.0, %v1448_v8  ;;  %v1450_v30 = vmul.f32 %v1354_v32, %v1354_v32  ;;  %v1237_v36 = vmul.f32 1.442695, %v1072_v28 }
 0x1da   :  { %v1788_v37 = vmul.f32 %v3865_v62, %v3040_v31  ;;  %v3045_v1 = vadd.f32 -1.0, %v1448_v8  ;;  %v1639_v22 = vadd.f32 1.0, %v1447_v58  ;;  %v1449_v5 = vmul.f32 %v1353_v12, %v1353_v12 }
 0x1db   :  { %3876 = vpow2.f32 %v1231_v52  ;;  %v3044_v42 = vadd.f32 -1.0, %v1447_v58  ;;  %v5350_v7 = vadd.f32 -1.0, %v1450_v30  ;;  %v1642_v25 = vadd.f32 1.0, %v1450_v30 }
 0x1dc   :  { %v3867_v39 = vpop.eup %3866  ;;  %v1923_v60 = vmul.f32 %v1788_v37, %v5224_v35  ;;  %3878 = vrcp.f32 %v1640_v45  ;;  %v1641_v51 = vadd.f32 1.0, %v1449_v5  ;;  %v5946_v31 = vmax.f32 %v5261_v3, %v5303_v24  ;;  %v5361_v35 = vld [vmem:[%s5905_s2] ss:$0 sm:$0xff] }
 0x1dd   :  { %v1794_v19 = vmul.f32 %v3867_v39, %v3043_v48  ;;  %3880 = vrcp.f32 %v1639_v22  ;;  %v5947_v45 = vld [vmem:[#allocation18_spill] sm:$0xff]  ;;  %v5369_v3 = vadd.f32 %v5361_v35, %v5077_v56  ;;  %v5373_v24 = vadd.f32 %v5361_v35, %v5079_v55 }
 0x1de   :  { %v5355_v50 = vmax.f32 %v5946_v31, %v1923_v60  ;;  %v2130_v54 = vadd.f32 %v2129_v49, %v1923_v60  ;;  %3882 = vpow2.f32 %v1237_v36  ;;  %v3869_v14 = vpop.eup %3868  ;;  %v5365_v30 = vadd.f32 %v5361_v35, %v5947_v45 }
 0x1df   :  { %v1926_v28 = vmul.f32 %v1794_v19, %v5230_v18  ;;  %3884 = vrcp.f32 %v1642_v25  ;;  %v5948_v18 = vmax.f32 %v5270_v43, %v5313_v57  ;;  %v1356_v49 = vadd.f32 1.0, %v3869_v14 }
 0x1e0   :  { %v3871_v19 = vpop.eup %3870  ;;  %v2131_v48 = vadd.f32 %v2130_v54, %v1924_v10  ;;  %3886 = vrcp.f32 %v1641_v51  ;;  %v3046_v62 = vadd.f32 -1.0, %v1449_v5  ;;  %v1071_v58 = vmin.f32 %v5365_v30, 20.0 }
 0x1e1   :  { %v5378_v36 = vmax.f32 %v5948_v18, %v1926_v28  ;;  %v3873_v8 = vpop.eup %3872  ;;  %v1792_v32 = vmul.f32 %v3871_v19, %v3042_v16  ;;  %v1074_v56 = vmin.f32 %v5369_v3, 20.0  ;;  %v1452_v52 = vmul.f32 %v1356_v49, %v1356_v49 }
 0x1e2   :  { %v3875_v12 = vpop.eup %3874  ;;  %v1355_v55 = vadd.f32 1.0, %v3873_v8  ;;  %v1073_v37 = vmin.f32 %v5373_v24, 20.0  ;;  %v5385_v43 = vadd.f32 %v5361_v35, %v5093_v4  ;;  %v1235_v39 = vmul.f32 1.442695, %v1071_v58 }
 0x1e3   :  { %v1925_v57 = vmul.f32 %v1792_v32, %v5245_v40  ;;  %v1358_v10 = vadd.f32 1.0, %v3875_v12  ;;  %v5390_v5 = vadd.f32 %v5361_v35, %v5100_v33  ;;  %v3049_v16 = vadd.f32 -1.0, %v1452_v52 }
 0x1e4   :  { %v1644_v22 = vadd.f32 1.0, %v1452_v52  ;;  %v1451_v60 = vmul.f32 %v1355_v55, %v1355_v55  ;;  %v1241_v25 = vmul.f32 1.442695, %v1074_v56  ;;  %v5949_v31 = vmax.f32 %v5289_v6, %v5333_v20 }
 0x1e5   :  { %v3877_v51 = vpop.eup %3876  ;;  %v2132_v4 = vadd.f32 %v2131_v48, %v1925_v57  ;;  %v1454_v14 = vmul.f32 %v1358_v10, %v1358_v10  ;;  %3888 = vpow2.f32 %v1235_v39  ;;  %v1239_v18 = vmul.f32 1.442695, %v1073_v37 }
 0x1e6   :  { %v5395_v54 = vmax.f32 %v5949_v31, %v1925_v57  ;;  %v3879_v40 = vpop.eup %3878  ;;  %3890 = vrcp.f32 %v1644_v22  ;;  %v1643_v45 = vadd.f32 1.0, %v1451_v60  ;;  %v1357_v19 = vadd.f32 1.0, %v3877_v51 }
 0x1e7   :  { %v3881_v33 = vpop.eup %3880  ;;  %v1798_v49 = vmul.f32 %v3879_v40, %v3045_v1  ;;  %v2133_v8 = vadd.f32 %v2132_v4, %v1926_v28  ;;  %v3048_v32 = vadd.f32 -1.0, %v1451_v60  ;;  %v1646_v58 = vadd.f32 1.0, %v1454_v14 }
 0x1e8   :  { %v3883_v56 = vpop.eup %3882  ;;  %v1796_v12 = vmul.f32 %v3881_v33, %v3044_v42  ;;  %3892 = vrcp.f32 %v1643_v45  ;;  %v3051_v52 = vadd.f32 -1.0, %v1454_v14  ;;  %v1453_v6 = vmul.f32 %v1357_v19, %v1357_v19 }
 0x1e9   :  { %v3885_v20 = vpop.eup %3884  ;;  %v1928_v48 = vmul.f32 %v1798_v49, %v5274_v0  ;;  %3894 = vrcp.f32 %v1646_v58  ;;  %v1360_v55 = vadd.f32 1.0, %v3883_v56  ;;  %v1076_v57 = vmin.f32 %v5385_v43, 20.0 }
 0x1ea   :  { %v3887_v10 = vpop.eup %3886  ;;  %v1927_v37 = vmul.f32 %v1796_v12, %v5278_v9  ;;  %v1802_v1 = vmul.f32 %v3885_v20, %v5350_v7  ;;  %v1645_v28 = vadd.f32 1.0, %v1453_v6  ;;  %v1075_v39 = vmin.f32 %v5390_v5, 20.0 }
 0x1eb   :  { %v2079_v42 = vmax.f32 %v5347_v59, %v1928_v48  ;;  %v1800_v22 = vmul.f32 %v3887_v10, %v3046_v62  ;;  %v1456_v60 = vmul.f32 %v1360_v55, %v1360_v55  ;;  %3896 = vpow2.f32 %v1241_v25 }
 0x1ec   :  { %v2078_v51 = vmax.f32 %v5355_v50, %v1927_v37  ;;  %v2134_v0 = vadd.f32 %v2133_v8, %v1927_v37  ;;  %v1930_v31 = vmul.f32 %v1802_v1, %v5282_v38  ;;  %3898 = vrcp.f32 %v1645_v28 }
 0x1ed   :  { %v5406_v4 = vmul.f32 %v1800_v22, %v5286_v29  ;;  %v3050_v9 = vadd.f32 -1.0, %v1453_v6  ;;  %v1648_v14 = vadd.f32 1.0, %v1456_v60  ;;  %3900 = vpow2.f32 %v1239_v18 }
 0x1ee   :  { %v2081_v7 = vmax.f32 %v5378_v36, %v1930_v31  ;;  %v2135_v40 = vadd.f32 %v2134_v0, %v1928_v48  ;;  %v1245_v45 = vmul.f32 1.442695, %v1076_v57  ;;  %v1243_v59 = vmul.f32 1.442695, %v1075_v39 }
 0x1ef   :  { %v3889_v62 = vpop.eup %3888  ;;  %v2080_v25 = vmax.f32 %v5395_v54, %v5406_v4  ;;  %3902 = vrcp.f32 %v1648_v14  ;;  %v5413_v38 = vadd.f32 %v5361_v35, %v5107_v13  ;;  %v5417_v29 = vadd.f32 %v5361_v35, %v5117_v53 }
 0x1f0   :  { %v3891_v50 = vpop.eup %3890  ;;  %v2136_v19 = vadd.f32 %v2135_v40, %v5406_v4  ;;  %v1359_v36 = vadd.f32 1.0, %v3889_v62  ;;  %3904 = vpow2.f32 %v1245_v45  ;;  %v5422_v18 = vadd.f32 %v5361_v35, %v5129_v44 }
 0x1f1   :  { %v1806_v33 = vmul.f32 %v3891_v50, %v3049_v16  ;;  %3906 = vpow2.f32 %v1243_v59  ;;  %v1078_v54 = vmin.f32 %v5413_v38, 20.0  ;;  %v1077_v13 = vmin.f32 %v5417_v29, 20.0 }
 0x1f2   :  { %v3893_v49 = vpop.eup %3892  ;;  %v2137_v8 = vadd.f32 %v2136_v19, %v1930_v31  ;;  %v1455_v58 = vmul.f32 %v1359_v36, %v1359_v36  ;;  %v1080_v53 = vmin.f32 %v5422_v18, 20.0  ;;  %v5429_v56 = vadd.f32 %v5361_v35, %v5136_v11 }
 0x1f3   :  { %v3895_v12 = vpop.eup %3894  ;;  %v1932_v6 = vmul.f32 %v1806_v33, %v5310_v61  ;;  %v1804_v44 = vmul.f32 %v3893_v49, %v3048_v32  ;;  %v1249_v20 = vmul.f32 1.442695, %v1078_v54  ;;  %v1247_v16 = vmul.f32 1.442695, %v1077_v13 }
 0x1f4   :  { %v1810_v48 = vmul.f32 %v3895_v12, %v3051_v52  ;;  %v3053_v55 = vadd.f32 -1.0, %v1456_v60  ;;  %v1647_v57 = vadd.f32 1.0, %v1455_v58  ;;  %v1253_v10 = vmul.f32 1.442695, %v1080_v53 }
 0x1f5   :  { %v3897_v37 = vpop.eup %3896  ;;  %v5432_v1 = vmax.f32 %v2079_v42, %v1932_v6  ;;  %v1931_v28 = vmul.f32 %v1804_v44, %v5318_v26  ;;  %3908 = vpow2.f32 %v1249_v20  ;;  %v1079_v39 = vmin.f32 %v5429_v56, 20.0 }
 0x1f6   :  { %v3899_v11 = vpop.eup %3898  ;;  %v1934_v22 = vmul.f32 %v1810_v48, %v5323_v46  ;;  %3910 = vrcp.f32 %v1647_v57  ;;  %v1362_v61 = vadd.f32 1.0, %v3897_v37  ;;  %v5439_v32 = vadd.f32 %v5361_v35, %v5150_v27 }
 0x1f7   :  { %v3901_v52 = vpop.eup %3900  ;;  %v5441_v60 = vmax.f32 %v2078_v51, %v1931_v28  ;;  %v2138_v0 = vadd.f32 %v2137_v8, %v1931_v28  ;;  %v1808_v42 = vmul.f32 %v3899_v11, %v3050_v9  ;;  %3912 = vpow2.f32 %v1247_v16 }
 0x1f8   :  { %v5443_v31 = vmax.f32 %v2081_v7, %v1934_v22  ;;  %v1458_v26 = vmul.f32 %v1362_v61, %v1362_v61  ;;  %v1361_v4 = vadd.f32 1.0, %v3901_v52  ;;  %3914 = vpow2.f32 %v1253_v10 }
 0x1f9   :  { %v3903_v14 = vpop.eup %3902  ;;  %v1933_v46 = vmul.f32 %v1808_v42, %v5330_v41  ;;  %v2139_v40 = vadd.f32 %v2138_v0, %v1932_v6  ;;  %v1251_v45 = vmul.f32 1.442695, %v1079_v39  ;;  %v1082_v59 = vmin.f32 %v5439_v32, 20.0 }
 0x1fa   :  { %v3905_v27 = vpop.eup %3904  ;;  %v1814_v62 = vmul.f32 %v3903_v14, %v3053_v55  ;;  %v1650_v50 = vadd.f32 1.0, %v1458_v26  ;;  %v1457_v51 = vmul.f32 %v1361_v4, %v1361_v4  ;;  %v3052_v54 = vadd.f32 -1.0, %v1455_v58 }
 0x1fb   :  { %v3907_v19 = vpop.eup %3906  ;;  %v5447_v36 = vmax.f32 %v2080_v25, %v1933_v46  ;;  %v2140_v9 = vadd.f32 %v2139_v40, %v1933_v46  ;;  %v1364_v7 = vadd.f32 1.0, %v3905_v27  ;;  %3916 = vpow2.f32 %v1251_v45 }
 0x1fc   :  { %v5450_v33 = vmul.f32 %v1814_v62, %v5338_v15  ;;  %3918 = vrcp.f32 %v1650_v50  ;;  %v1649_v41 = vadd.f32 1.0, %v1457_v51  ;;  %v1363_v8 = vadd.f32 1.0, %v3907_v19 }
 0x1fd   :  { %v2141_v13 = vadd.f32 %v2140_v9, %v1934_v22  ;;  %v1460_v49 = vmul.f32 %v1364_v7, %v1364_v7  ;;  %v1257_v53 = vmul.f32 1.442695, %v1082_v59  ;;  %v5456_v25 = vadd.f32 %v5361_v35, %v5154_v34 }
 0x1fe   :  { %v2087_v12 = vmax.f32 %v5432_v1, %v5450_v33  ;;  %3920 = vrcp.f32 %v1649_v41  ;;  %v5460_v6 = vadd.f32 %v5361_v35, %v5166_v23  ;;  %v3055_v58 = vadd.f32 -1.0, %v1458_v26 }
 0x1ff   :  { %v3909_v15 = vpop.eup %3908  ;;  %v1652_v44 = vadd.f32 1.0, %v1460_v49  ;;  %v1459_v20 = vmul.f32 %v1363_v8, %v1363_v8  ;;  %3922 = vpow2.f32 %v1257_v53  ;;  %v1081_v55 = vmin.f32 %v5456_v25, 20.0 }
 0x200   :  { %v3911_v16 = vpop.eup %3910  ;;  %v1366_v48 = vadd.f32 1.0, %v3909_v15  ;;  %v1084_v57 = vmin.f32 %v5460_v6, 20.0  ;;  %v5466_v10 = vadd.f32 %v5361_v35, %v5170_v47  ;;  %v3054_v28 = vadd.f32 -1.0, %v1457_v51  ;;  %v5950_v15 = vld [vmem:[#allocation19_spill] sm:$0xff] }
 0x201   :  { %v3913_v34 = vpop.eup %3912  ;;  %v1812_v37 = vmul.f32 %v3911_v16, %v3052_v54  ;;  %3924 = vrcp.f32 %v1652_v44  ;;  %v1651_v23 = vadd.f32 1.0, %v1459_v20  ;;  %v1255_v61 = vmul.f32 1.442695, %v1081_v55 }
 0x202   :  { %v3915_v39 = vpop.eup %3914  ;;  %v1462_v11 = vmul.f32 %v1366_v48, %v1366_v48  ;;  %v1365_v22 = vadd.f32 1.0, %v3913_v34  ;;  %v1261_v52 = vmul.f32 1.442695, %v1084_v57  ;;  %v3057_v42 = vadd.f32 -1.0, %v1460_v49 }
 0x203   :  { %v5469_v0 = vmul.f32 %v1812_v37, %v5365_v30  ;;  %3926 = vrcp.f32 %v1651_v23  ;;  %v1368_v26 = vadd.f32 1.0, %v3915_v39  ;;  %v1083_v47 = vmin.f32 %v5466_v10, 20.0 }
 0x204   :  { %v1654_v4 = vadd.f32 1.0, %v1462_v11  ;;  %v1461_v14 = vmul.f32 %v1365_v22, %v1365_v22  ;;  %3928 = vpow2.f32 %v1255_v61  ;;  %v3056_v62 = vadd.f32 -1.0, %v1459_v20 }
 0x205   :  { %v3917_v46 = vpop.eup %3916  ;;  %v2086_v40 = vmax.f32 %v5441_v60, %v5469_v0  ;;  %v2142_v45 = vadd.f32 %v2141_v13, %v5469_v0  ;;  %v1464_v59 = vmul.f32 %v1368_v26, %v1368_v26  ;;  %3930 = vpow2.f32 %v1261_v52 }
 0x206   :  { %v3919_v27 = vpop.eup %3918  ;;  %3932 = vrcp.f32 %v1654_v4  ;;  %v1653_v30 = vadd.f32 1.0, %v1461_v14  ;;  %v1367_v50 = vadd.f32 1.0, %v3917_v46  ;;  %v3059_v9 = vadd.f32 -1.0, %v1462_v11 }
 0x207   :  { %v1818_v51 = vmul.f32 %v3919_v27, %v3055_v58  ;;  %v2143_v19 = vadd.f32 %v2142_v45, %v5450_v33  ;;  %v1656_v7 = vadd.f32 1.0, %v1464_v59  ;;  %v1259_v49 = vmul.f32 1.442695, %v1083_v47 }
 0x208   :  { %v3921_v54 = vpop.eup %3920  ;;  %3934 = vrcp.f32 %v1653_v30  ;;  %v1463_v41 = vmul.f32 %v1367_v50, %v1367_v50  ;;  %v5478_v60 = vadd.f32 %v5361_v35, %v5182_v63  ;;  %v5483_v58 = vadd.f32 %v5361_v35, %v5950_v15 }
 0x209   :  { %v3923_v13 = vpop.eup %3922  ;;  %v1938_v8 = vmul.f32 %v1818_v51, %v5369_v3  ;;  %v1816_v53 = vmul.f32 %v3921_v54, %v3054_v28  ;;  %3936 = vrcp.f32 %v1656_v7  ;;  %v3058_v44 = vadd.f32 -1.0, %v1461_v14  ;;  %v5951_v28 = vld [vmem:[#allocation20_spill] sm:$0xff] }
 0x20a   :  { %v1655_v20 = vadd.f32 1.0, %v1463_v41  ;;  %v1370_v16 = vadd.f32 1.0, %v3923_v13  ;;  %3938 = vpow2.f32 %v1259_v49  ;;  %v1086_v63 = vmin.f32 %v5478_v60, 20.0 }
 0x20b   :  { %v3925_v48 = vpop.eup %3924  ;;  %v2089_v55 = vmax.f32 %v5443_v31, %v1938_v8  ;;  %v1937_v57 = vmul.f32 %v1816_v53, %v5373_v24  ;;  %v1085_v34 = vmin.f32 %v5483_v58, 20.0  ;;  %v5491_v23 = vadd.f32 %v5361_v35, %v5951_v28 }
 0x20c   :  { %v1822_v3 = vmul.f32 %v3925_v48, %v3057_v42  ;;  %3940 = vrcp.f32 %v1655_v20  ;;  %v1466_v37 = vmul.f32 %v1370_v16, %v1370_v16  ;;  %v1265_v61 = vmul.f32 1.442695, %v1086_v63 }
 0x20d   :  { %v3927_v39 = vpop.eup %3926  ;;  %v2088_v11 = vmax.f32 %v5447_v36, %v1937_v57  ;;  %v2144_v22 = vadd.f32 %v2143_v19, %v1937_v57  ;;  %v1263_v52 = vmul.f32 1.442695, %v1085_v34  ;;  %v3061_v26 = vadd.f32 -1.0, %v1464_v59 }
 0x20e   :  { %v3929_v31 = vpop.eup %3928  ;;  %v1940_v24 = vmul.f32 %v1822_v3, %v5385_v43  ;;  %v1820_v0 = vmul.f32 %v3927_v39, %v3056_v62  ;;  %v1658_v4 = vadd.f32 1.0, %v1466_v37  ;;  %3942 = vpow2.f32 %v1265_v61 }
 0x20f   :  { %v3931_v14 = vpop.eup %3930  ;;  %v2145_v42 = vadd.f32 %v2144_v22, %v1938_v8  ;;  %v1369_v47 = vadd.f32 1.0, %v3929_v31  ;;  %v1088_v46 = vmin.f32 %v5491_v23, 20.0  ;;  %v3060_v62 = vadd.f32 -1.0, %v1463_v41 }
 0x210   :  { %v3933_v45 = vpop.eup %3932  ;;  %v5499_v36 = vmax.f32 %v2087_v12, %v1940_v24  ;;  %v1939_v27 = vmul.f32 %v1820_v0, %v5390_v5  ;;  %3944 = vrcp.f32 %v1658_v4  ;;  %v1372_v30 = vadd.f32 1.0, %v3931_v14 }
 0x211   :  { %v1826_v43 = vmul.f32 %v3933_v45, %v3059_v9  ;;  %v1465_v59 = vmul.f32 %v1369_v47, %v1369_v47  ;;  %3946 = vpow2.f32 %v1263_v52  ;;  %v5506_v54 = vadd.f32 %v5361_v35, %v5209_v2  ;;  %v5953_v45 = vld [vmem:[#allocation22_spill] sm:$0xff] }
 0x212   :  { %v3935_v50 = vpop.eup %3934  ;;  %v5502_v51 = vmax.f32 %v2086_v40, %v1939_v27  ;;  %v2146_v19 = vadd.f32 %v2145_v42, %v1939_v27  ;;  %v1468_v7 = vmul.f32 %v1372_v30, %v1372_v30  ;;  %v3063_v5 = vadd.f32 -1.0, %v1466_v37 }
 0x213   :  { %v3937_v1 = vpop.eup %3936  ;;  %v1942_v33 = vmul.f32 %v1826_v43, %v5413_v38  ;;  %v1824_v12 = vmul.f32 %v3935_v50, %v3058_v44  ;;  %v1657_v49 = vadd.f32 1.0, %v1465_v59  ;;  %v1269_v53 = vmul.f32 1.442695, %v1088_v46 }
 0x214   :  { %v3939_v13 = vpop.eup %3938  ;;  %v2147_v9 = vadd.f32 %v2146_v19, %v1940_v24  ;;  %v1830_v41 = vmul.f32 %v3937_v1, %v3061_v26  ;;  %v1660_v8 = vadd.f32 1.0, %v1468_v7  ;;  %v1087_v38 = vmin.f32 %v5506_v54, 20.0  ;;  %v5954_v1 = vld [vmem:[#allocation23_spill] sm:$0xff] }
 0x215   :  { %v5509_v15 = vmax.f32 %v2089_v55, %v1942_v33  ;;  %v1941_v40 = vmul.f32 %v1824_v12, %v5417_v29  ;;  %3948 = vrcp.f32 %v1657_v49  ;;  %v1371_v20 = vadd.f32 1.0, %v3939_v13 }
 0x216   :  { %v3941_v16 = vpop.eup %3940  ;;  %v5513_v2 = vmul.f32 %v1830_v41, %v5422_v18  ;;  %3950 = vrcp.f32 %v1660_v8  ;;  %v5518_v44 = vadd.f32 %v5361_v35, %v5215_v21  ;;  %v1267_v34 = vmul.f32 1.442695, %v1087_v38 }
 0x217   :  { %v5520_v48 = vmax.f32 %v2088_v11, %v1941_v40  ;;  %v2148_v57 = vadd.f32 %v2147_v9, %v1941_v40  ;;  %v1828_v55 = vmul.f32 %v3941_v16, %v3060_v62  ;;  %v1467_v63 = vmul.f32 %v1371_v20, %v1371_v20  ;;  %v5955_v20 = vld [vmem:[#allocation24_spill] sm:$0xff] }
 0x218   :  { %v2095_v29 = vmax.f32 %v5499_v36, %v5513_v2  ;;  %3952 = vpow2.f32 %v1269_v53  ;;  %v1090_v18 = vmin.f32 %v5518_v44, 20.0  ;;  %v3943_v3 = vpop.eup %3942  ;;  %v3062_v39 = vadd.f32 -1.0, %v1465_v59 }
 0x219   :  { %v5526_v37 = vmul.f32 %v1828_v55, %v5429_v56  ;;  %v2149_v28 = vadd.f32 %v2148_v57, %v1942_v33  ;;  %v1659_v21 = vadd.f32 1.0, %v1467_v63  ;;  %v1374_v11 = vadd.f32 1.0, %v3943_v3  ;;  %v5956_v57 = vld [vmem:[#allocation25_spill] sm:$0xff] }
 0x21a   :  { %v3945_v22 = vpop.eup %3944  ;;  %3954 = vpow2.f32 %v1267_v34  ;;  %v1273_v61 = vmul.f32 1.442695, %v1090_v18  ;;  %v5530_v52 = vadd.f32 %v5361_v35, %v5217_v17  ;;  %v5952_v17 = vld [vmem:[#allocation21_spill] sm:$0xff]  ;;  %v5546_v36 = vadd.f32 %v5361_v35, %v5953_v45 }
 0x21b   :  { %v3947_v31 = vpop.eup %3946  ;;  %v2094_v24 = vmax.f32 %v5502_v51, %v5526_v37  ;;  %v2150_v0 = vadd.f32 %v2149_v28, %v5526_v37  ;;  %v1834_v26 = vmul.f32 %v3945_v22, %v3063_v5  ;;  %3956 = vrcp.f32 %v1659_v21  ;;  %v5958_v37 = vld [vmem:[#allocation29_spill] sm:$0xff] }
 0x21c   :  { %v1470_v56 = vmul.f32 %v1374_v11, %v1374_v11  ;;  %v1373_v4 = vadd.f32 1.0, %v3947_v31  ;;  %3958 = vpow2.f32 %v1273_v61  ;;  %v1089_v14 = vmin.f32 %v5530_v52, 20.0 }
 0x21d   :  { %v5537_v42 = vmul.f32 %v1834_v26, %v5439_v32  ;;  %v2151_v47 = vadd.f32 %v2150_v0, %v5513_v2  ;;  %v5542_v46 = vadd.f32 %v5361_v35, %v5952_v17  ;;  %v3065_v27 = vadd.f32 -1.0, %v1468_v7 }
 0x21e   :  { %v1662_v30 = vadd.f32 1.0, %v1470_v56  ;;  %v1469_v43 = vmul.f32 %v1373_v4, %v1373_v4  ;;  %v1271_v62 = vmul.f32 1.442695, %v1089_v14  ;;  %v1091_v19 = vmin.f32 %v5546_v36, 20.0 }
 0x21f   :  { %v3949_v59 = vpop.eup %3948  ;;  %v2097_v50 = vmax.f32 %v5509_v15, %v5537_v42  ;;  %v1092_v32 = vmin.f32 %v5542_v46, 20.0  ;;  %v5554_v33 = vadd.f32 %v5361_v35, %v5954_v1  ;;  %v3064_v49 = vadd.f32 -1.0, %v1467_v63 }
 0x220   :  { %v3951_v12 = vpop.eup %3950  ;;  %v1832_v5 = vmul.f32 %v3949_v59, %v3062_v39  ;;  %3960 = vrcp.f32 %v1662_v30  ;;  %v1661_v7 = vadd.f32 1.0, %v1469_v43  ;;  %v1275_v41 = vmul.f32 1.442695, %v1091_v19 }
 0x221   :  { %v1838_v13 = vmul.f32 %v3951_v12, %v3065_v27  ;;  %3962 = vpow2.f32 %v1271_v62  ;;  %v1277_v9 = vmul.f32 1.442695, %v1092_v32  ;;  %v1094_v40 = vmin.f32 %v5554_v33, 20.0 }
 0x222   :  { %v3953_v8 = vpop.eup %3952  ;;  %v5557_v53 = vmul.f32 %v1832_v5, %v5456_v25  ;;  %3964 = vrcp.f32 %v1661_v7  ;;  %v5562_v16 = vadd.f32 %v5361_v35, %v5955_v20  ;;  %v5567_v55 = vadd.f32 %v5361_v35, %v5956_v57 }
 0x223   :  { %v1948_v2 = vmul.f32 %v1838_v13, %v5460_v6  ;;  %v1376_v38 = vadd.f32 1.0, %v3953_v8  ;;  %3966 = vpow2.f32 %v1277_v9  ;;  %v1281_v18 = vmul.f32 1.442695, %v1094_v40  ;;  %v5959_v40 = vld [vmem:[#allocation30_spill] sm:$0xff] }
 0x224   :  { %v3955_v63 = vpop.eup %3954  ;;  %v2096_v25 = vmax.f32 %v5520_v48, %v5557_v53  ;;  %v2152_v34 = vadd.f32 %v2151_v47, %v5557_v53  ;;  %3968 = vpow2.f32 %v1275_v41  ;;  %v1093_v6 = vmin.f32 %v5562_v16, 20.0 }
 0x225   :  { %v3957_v3 = vpop.eup %3956  ;;  %v5572_v28 = vmax.f32 %v2095_v29, %v1948_v2  ;;  %v1472_v39 = vmul.f32 %v1376_v38, %v1376_v38  ;;  %v1375_v21 = vadd.f32 1.0, %v3955_v63  ;;  %3970 = vpow2.f32 %v1281_v18  ;;  %v5957_v29 = vld [vmem:[#allocation27_spill] sm:$0xff] }
 0x226   :  { %v3959_v22 = vpop.eup %3958  ;;  %v1836_v11 = vmul.f32 %v3957_v3, %v3064_v49  ;;  %v2153_v61 = vadd.f32 %v2152_v34, %v5537_v42  ;;  %v1096_v31 = vmin.f32 %v5567_v55, 20.0  ;;  %v1279_v14 = vmul.f32 1.442695, %v1093_v6  ;;  %v2245_v42 = vld [vmem:[#allocation2 + $0x8] sm:$0xff] }
 0x227   :  { %v1664_v0 = vadd.f32 1.0, %v1472_v39  ;;  %v1471_v48 = vmul.f32 %v1375_v21, %v1375_v21  ;;  %v1378_v26 = vadd.f32 1.0, %v3959_v22  ;;  %v5580_v17 = vadd.f32 %v5361_v35, %v5957_v29 }
 0x228   :  { %v1947_v4 = vmul.f32 %v1836_v11, %v5466_v10  ;;  %v1285_v47 = vmul.f32 1.442695, %v1096_v31  ;;  %v3067_v45 = vadd.f32 -1.0, %v1470_v56  ;;  %v3066_v12 = vadd.f32 -1.0, %v1469_v43 }
 0x229   :  { %3972 = vrcp.f32 %v1664_v0  ;;  %v1663_v27 = vadd.f32 1.0, %v1471_v48  ;;  %v1474_v30 = vmul.f32 %v1378_v26, %v1378_v26  ;;  %v1095_v10 = vmin.f32 %v5580_v17, 20.0 }
 0x22a   :  { %v3961_v62 = vpop.eup %3960  ;;  %v5585_v59 = vmax.f32 %v2094_v24, %v1947_v4  ;;  %v2154_v32 = vadd.f32 %v2153_v61, %v1947_v4  ;;  %3974 = vpow2.f32 %v1279_v14  ;;  %v5591_v24 = vadd.f32 %v5361_v35, %v5958_v37  ;;  %v2248_v14 = vld [vmem:[#allocation2 + $0x20] sm:$0xff] }
 0x22b   :  { %v3963_v19 = vpop.eup %3962  ;;  %v1842_v1 = vmul.f32 %v3961_v62, %v3067_v45  ;;  %3976 = vrcp.f32 %v1663_v27  ;;  %v1666_v5 = vadd.f32 1.0, %v1474_v30  ;;  %v1283_v13 = vmul.f32 1.442695, %v1095_v10  ;;  %v2253_v62 = vld [vmem:[#allocation2 + $0x48] sm:$0xff] }
 0x22c   :  { %v3965_v49 = vpop.eup %3964  ;;  %v2155_v56 = vadd.f32 %v2154_v32, %v1948_v2  ;;  %v1377_v7 = vadd.f32 1.0, %v3963_v19  ;;  %3978 = vpow2.f32 %v1285_v47  ;;  %v5597_v20 = vadd.f32 %v5361_v35, %v5959_v40 }
 0x22d   :  { %v3967_v9 = vpop.eup %3966  ;;  %v1950_v41 = vmul.f32 %v1842_v1, %v5478_v60  ;;  %v1840_v51 = vmul.f32 %v3965_v49, %v3066_v12  ;;  %3980 = vrcp.f32 %v1666_v5  ;;  %v1098_v57 = vmin.f32 %v5591_v24, 20.0 }
 0x22e   :  { %v3969_v8 = vpop.eup %3968  ;;  %v5593_v53 = vmul.f32 %v1377_v7, %v1377_v7  ;;  %v1380_v43 = vadd.f32 1.0, %v3967_v9  ;;  %3982 = vpow2.f32 %v1283_v13  ;;  %v1097_v3 = vmin.f32 %v5597_v20, 20.0 }
 0x22f   :  { %v5602_v2 = vmax.f32 %v2097_v50, %v1950_v41  ;;  %v1949_v60 = vmul.f32 %v1840_v51, %v5483_v58  ;;  %v1379_v38 = vadd.f32 1.0, %v3969_v8  ;;  %v3971_v63 = vpop.eup %3970  ;;  %v2249_v50 = vld [vmem:[#allocation2 + $0x28] sm:$0xff]  ;;  %v3069_v22 = vadd.f32 -1.0, %v1472_v39 }
 0x230   :  { %v1665_v34 = vadd.f32 1.0, %v5593_v53  ;;  %v5607_v18 = vmul.f32 %v1380_v43, %v1380_v43  ;;  %v1382_v15 = vadd.f32 1.0, %v3971_v63  ;;  %v1289_v11 = vmul.f32 1.442695, %v1098_v57  ;;  %v2257_v39 = vld [vmem:[#allocation2 + $0x68] sm:$0xff]  ;;  %v2260_v63 = vld [vmem:[#allocation2 + $0x80] sm:$0xff] }
 0x231   :  { %v5610_v21 = vmax.f32 %v2096_v25, %v1949_v60  ;;  %v2156_v35 = vadd.f32 %v2155_v56, %v1949_v60  ;;  %v5612_v6 = vmul.f32 %v1379_v38, %v1379_v38  ;;  %v3068_v31 = vadd.f32 -1.0, %v1471_v48  ;;  %v2244_v25 = vld [vmem:[#allocation2] sm:$0xff]  ;;  %v2261_v43 = vld [vmem:[#allocation2 + $0x88] sm:$0xff] }
 0x232   :  { %3984 = vrcp.f32 %v1665_v34  ;;  %v1668_v58 = vadd.f32 1.0, %v5607_v18  ;;  %v5616_v4 = vmul.f32 %v1382_v15, %v1382_v15  ;;  %v1287_v45 = vmul.f32 1.442695, %v1097_v3  ;;  %v2265_v57 = vld [vmem:[#allocation2 + $0xa8] sm:$0xff]  ;;  %v2264_v34 = vld [vmem:[#allocation2 + $0xa0] sm:$0xff] }
 0x233   :  { %v3973_v61 = vpop.eup %3972  ;;  %v2157_v0 = vadd.f32 %v2156_v35, %v1950_v41  ;;  %v1667_v26 = vadd.f32 1.0, %v5612_v6  ;;  %v3417_v27 = vpack.c.bf16 %v2249_v50, %v2245_v42  ;;  %v3071_v10 = vadd.f32 -1.0, %v1474_v30  ;;  %v2252_v41 = vld [vmem:[#allocation2 + $0x40] sm:$0xff] }
 0x234   :  { %v3975_v47 = vpop.eup %3974  ;;  %v1846_v29 = vmul.f32 %v3973_v61, %v3069_v22  ;;  %3986 = vrcp.f32 %v1668_v58  ;;  %v1670_v19 = vadd.f32 1.0, %v5616_v4  ;;  %v3419_v49 = vpack.c.bf16 %v2248_v14, %v2244_v25  ;;  %v2256_v30 = vld [vmem:[#allocation2 + $0x60] sm:$0xff]  ;;  %v2269_v58 = vld [vmem:[#allocation2 + $0xc8] sm:$0xff] }
 0x235   :  { %v3977_v32 = vpop.eup %3976  ;;  %3988 = vrcp.f32 %v1667_v26  ;;  %v1381_v48 = vadd.f32 1.0, %v3975_v47  ;;  %3418 = vmatprep.subr.bf16.mxu1 %v3417_v27  ;;  %v3421_v9 = vpack.c.bf16 %v2257_v39, %v2253_v62  ;;  %v3423_v15 = vpack.c.bf16 %v2256_v30, %v2252_v41  ;;  %v2268_v26 = vld [vmem:[#allocation2 + $0xc0] sm:$0xff] }
 0x236   :  { %v3979_v1 = vpop.eup %3978  ;;  %v5620_v12 = vmul.f32 %v1846_v29, %v5491_v23  ;;  %v1844_v5 = vmul.f32 %v3977_v32, %v3068_v31  ;;  %3990 = vpow2.f32 %v1289_v11  ;;  %3420 = vmatpush1.bf16.msra.mxu1 %v3419_v49  ;;  %v3070_v42 = vadd.f32 -1.0, %v5593_v53  ;;  %v2273_v11 = vld [vmem:[#allocation2 + $0xe8] sm:$0xff]  ;;  %v2272_v47 = vld [vmem:[#allocation2 + $0xe0] sm:$0xff] }
 0x237   :  { %v3981_v56 = vpop.eup %3980  ;;  %3992 = vrcp.f32 %v1670_v19  ;;  %v5622_v7 = vmul.f32 %v1381_v48, %v1381_v48  ;;  %v1384_v13 = vadd.f32 1.0, %v3979_v1  ;;  %3422 = vmatprep.subr.bf16.mxu1 %v3421_v9  ;;  %v3073_v53 = vadd.f32 -1.0, %v5607_v18  ;;  %v2277_v29 = vld [vmem:[#allocation2 + $0x108] sm:$0xff]  ;;  %v2276_v41 = vld [vmem:[#allocation2 + $0x100] sm:$0xff] }
 0x238   :  { %v3983_v51 = vpop.eup %3982  ;;  %v2103_v37 = vmax.f32 %v5572_v28, %v5620_v12  ;;  %v5627_v8 = vmul.f32 %v1844_v5, %v5506_v54  ;;  %v1850_v23 = vmul.f32 %v3981_v56, %v3071_v10  ;;  %3994 = vpow2.f32 %v1287_v45  ;;  %v2281_v45 = vld [vmem:[#allocation2 + $0x128] sm:$0xff]  ;;  %v2280_v30 = vld [vmem:[#allocation2 + $0x120] sm:$0xff] }
 0x239   :  { %v1669_v40 = vadd.f32 1.0, %v5622_v7  ;;  %v5630_v60 = vmul.f32 %v1384_v13, %v1384_v13  ;;  %v1383_v38 = vadd.f32 1.0, %v3983_v51  ;;  %v3072_v62 = vadd.f32 -1.0, %v5612_v6 }
 0x23a   :  { %v2102_v3 = vmax.f32 %v5585_v59, %v5627_v8  ;;  %v2158_v35 = vadd.f32 %v2157_v0, %v5627_v8  ;;  %v5636_v54 = vmul.f32 %v1850_v23, %v5518_v44  ;;  %3424 = vmatpush1.bf16.msra.mxu1 %v3423_v15  ;;  %v3425_v0 = vpack.c.bf16 %v2265_v57, %v2261_v43  ;;  %v2289_v43 = vld [vmem:[#allocation2 + $0x168] sm:$0xff] }
 0x23b   :  { %3996 = vrcp.f32 %v1669_v40  ;;  %v1672_v50 = vadd.f32 1.0, %v5630_v60  ;;  %v5640_v22 = vmul.f32 %v1383_v38, %v1383_v38  ;;  %v3427_v44 = vpack.c.bf16 %v2264_v34, %v2260_v63 }
 0x23c   :  { %v3985_v61 = vpop.eup %3984  ;;  %v2105_v31 = vmax.f32 %v5602_v2, %v5636_v54  ;;  %v2159_v59 = vadd.f32 %v2158_v35, %v5620_v12  ;;  %3426 = vmatprep.subr.bf16.mxu1 %v3425_v0  ;;  %v3429_v2 = vpack.c.bf16 %v2273_v11, %v2269_v58  ;;  %v3075_v18 = vadd.f32 -1.0, %v5616_v4  ;;  %v2285_v4 = vld [vmem:[#allocation2 + $0x148] sm:$0xff]  ;;  %v2288_v58 = vld [vmem:[#allocation2 + $0x160] sm:$0xff] }
 0x23d   :  { %v1848_v25 = vmul.f32 %v3985_v61, %v3070_v42  ;;  %3998 = vrcp.f32 %v1672_v50  ;;  %v1671_v14 = vadd.f32 1.0, %v5640_v22  ;;  %v3431_v1 = vpack.c.bf16 %v2272_v47, %v2268_v26  ;;  %v2284_v50 = vld [vmem:[#allocation2 + $0x140] sm:$0xff] }
 0x23e   :  { %v3987_v27 = vpop.eup %3986  ;;  %3428 = vmatpush1.bf16.msra.mxu1 %v3427_v44  ;;  %v3433_v5 = vpack.c.bf16 %v2281_v45, %v2277_v29  ;;  %v3074_v23 = vadd.f32 -1.0, %v5622_v7  ;;  %v3435_v34 = vpack.c.bf16 %v2280_v30, %v2276_v41  ;;  %v3437_v7 = vpack.c.bf16 %v2289_v43, %v2285_v4  ;;  %v2296_v47 = vld [vmem:[#allocation2 + $0x1a0] sm:$0xff] }
 0x23f   :  { %v3989_v39 = vpop.eup %3988  ;;  %v1953_v32 = vmul.f32 %v1848_v25, %v5530_v52  ;;  %v1854_v10 = vmul.f32 %v3987_v27, %v3073_v53  ;;  %4000 = vrcp.f32 %v1671_v14  ;;  %3430 = vmatprep.subr.bf16.mxu1 %v3429_v2  ;;  %v4103_v11 = vmov 0.0   ;;  %v2292_v14 = vld [vmem:[#allocation2 + $0x180] sm:$0xff]  ;;  %v2305_v2 = vld [vmem:[#allocation2 + $0x1e8] sm:$0xff] }
 0x240   :  { %v3991_v19 = vpop.eup %3990  ;;  %v1852_v48 = vmul.f32 %v3989_v39, %v3072_v62  ;;  %2372 = vmatprep.mubr.f32.mxu1 %v4103_v11  ;;  %v3076_v26 = vadd.f32 -1.0, %v5640_v22  ;;  %v3439_v25 = vpack.c.bf16 %v2288_v58, %v2284_v50  ;;  %v2301_v62 = vld [vmem:[#allocation2 + $0x1c8] sm:$0xff]  ;;  %v3443_v22 = vpack.c.bf16 %v2296_v47, %v2292_v14  ;;  %v2259_v14 = vld [vmem:[#allocation2 + $0x78] sm:$0xff] }
 0x241   :  { %v3993_v49 = vpop.eup %3992  ;;  %v2104_v56 = vmax.f32 %v5610_v21, %v1953_v32  ;;  %v2160_v13 = vadd.f32 %v2159_v59, %v1953_v32  ;;  %v1956_v6 = vmul.f32 %v1854_v10, %v5542_v46  ;;  %v1386_v9 = vadd.f32 1.0, %v3991_v19  ;;  %v2300_v19 = vld [vmem:[#allocation2 + $0x1c0] sm:$0xff] }
 0x242   :  { %v3995_v52 = vpop.eup %3994  ;;  %v1955_v51 = vmul.f32 %v1852_v48, %v5546_v36  ;;  %v1858_v8 = vmul.f32 %v3993_v49, %v3075_v18  ;;  %3432 = vmatpush1.bf16.msra.mxu1 %v3431_v1  ;;  %v3445_v10 = vpack.c.bf16 %v2305_v2, %v2301_v62  ;;  %v2304_v48 = vld [vmem:[#allocation2 + $0x1e0] sm:$0xff]  ;;  %v2251_v49 = vld [vmem:[#allocation2 + $0x38] sm:$0xff] }
 0x243   :  { %v2107_v40 = vmax.f32 %v2103_v37, %v1956_v6  ;;  %v2161_v21 = vadd.f32 %v2160_v13, %v5636_v54  ;;  %v1482_v38 = vmul.f32 %v1386_v9, %v1386_v9  ;;  %v1385_v46 = vadd.f32 1.0, %v3995_v52  ;;  %3434 = vmatprep.subr.bf16.mxu1 %v3433_v5  ;;  %v2247_v5 = vld [vmem:[#allocation2 + $0x18] sm:$0xff] }
 0x244   :  { %v2106_v57 = vmax.f32 %v2102_v3, %v1955_v51  ;;  %v1958_v63 = vmul.f32 %v1858_v8, %v5554_v33  ;;  %v3077_v37 = vadd.f32 -1.0, %v5630_v60  ;;  %v2293_v3 = vld [vmem:[#allocation2 + $0x188] sm:$0xff]  ;;  %v3447_v41 = vpack.c.bf16 %v2304_v48, %v2300_v19 }
 0x245   :  { %v3997_v35 = vpop.eup %3996  ;;  %v2162_v36 = vadd.f32 %v2161_v21, %v1955_v51  ;;  %v1674_v15 = vadd.f32 1.0, %v1482_v38  ;;  %v1481_v42 = vmul.f32 %v1385_v46, %v1385_v46  ;;  %v2297_v33 = vld [vmem:[#allocation2 + $0x1a8] sm:$0xff] }
 0x246   :  { %v5660_v28 = vmax.f32 %v2105_v31, %v1958_v63  ;;  %v1856_v12 = vmul.f32 %v3997_v35, %v3074_v23  ;;  %3436 = vmatpush1.bf16.msra.mxu1 %v3435_v34  ;;  %v3441_v31 = vpack.c.bf16 %v2297_v33, %v2293_v3  ;;  %v5961_v23 = vld [vmem:[#allocation28_spill] sm:$0xff] }
 0x247   :  { %v3999_v54 = vpop.eup %3998  ;;  %v2163_v61 = vadd.f32 %v2162_v36, %v1956_v6  ;;  %4002 = vrcp.f32 %v1674_v15  ;;  %v1673_v59 = vadd.f32 1.0, %v1481_v42  ;;  %3438 = vmatprep.subr.bf16.mxu1 %v3437_v7  ;;  %v3079_v6 = vadd.f32 -1.0, %v1482_v38 }
 0x248   :  { %v1957_v0 = vmul.f32 %v1856_v12, %v5562_v16  ;;  %v1862_v44 = vmul.f32 %v3999_v54, %v3077_v37  ;;  %v3078_v51 = vadd.f32 -1.0, %v1481_v42  ;;  %v2010_v4 = vrot.slane %v5961_v23, 4 }
 0x249   :  { %v4001_v53 = vpop.eup %4000  ;;  %4004 = vrcp.f32 %v1673_v59 }
 0x24a   :  { %v2108_v60 = vmax.f32 %v2104_v56, %v1957_v0  ;;  %v2164_v29 = vadd.f32 %v2163_v61, %v1957_v0  ;;  %v1960_v45 = vmul.f32 %v1862_v44, %v5567_v55  ;;  %v1860_v27 = vmul.f32 %v4001_v53, %v3076_v26  ;;  %3440 = vmatpush1.bf16.msra.mxu1 %v3439_v25  ;;  %v5960_v56 = vld [vmem:[#allocation26_spill] sm:$0xff]  ;;  %v2246_v0 = vld [vmem:[#allocation2 + $0x10] sm:$0xff] }
 0x24b   :  { %3442 = vmatprep.subr.bf16.mxu1 %v3441_v31  ;;  %v2063_v13 = vrot.slane %v5960_v56, 4  ;;  %v2250_v44 = vld [vmem:[#allocation2 + $0x30] sm:$0xff]  ;;  %v2255_v31 = vld [vmem:[#allocation2 + $0x58] sm:$0xff] }
 0x24c   :  { %v2111_v39 = vmax.f32 %v2107_v40, %v1960_v45  ;;  %v1959_v16 = vmul.f32 %v1860_v27, %v5580_v17  ;;  %v2165_v32 = vadd.f32 %v2164_v29, %v1958_v63  ;;  %v3449_v17 = vpack.c.bf16 %v2251_v49, %v2247_v5  ;;  %v2266_v5 = vld [vmem:[#allocation2 + $0xb0] sm:$0xff]  ;;  %v2271_v49 = vld [vmem:[#allocation2 + $0xd8] sm:$0xff] }
 0x24d   :  { %v2064_v43 = vadd.f32 %v2063_v13, %v5960_v56  ;;  %v3453_v2 = vpack.c.bf16 %v2259_v14, %v2255_v31  ;;  %v2275_v56 = vld [vmem:[#allocation2 + $0xf8] sm:$0xff] }
 0x24e   :  { %v2110_v18 = vmax.f32 %v2106_v57, %v1959_v16  ;;  %v2166_v1 = vadd.f32 %v2165_v32, %v1959_v16  ;;  %3444 = vmatpush1.bf16.msra.mxu1 %v3443_v22  ;;  %v2011_v57 = vmax.f32 %v5961_v23, %v2010_v4  ;;  %v2258_v16 = vld [vmem:[#allocation2 + $0x70] sm:$0xff]  ;;  %v2263_v22 = vld [vmem:[#allocation2 + $0x98] sm:$0xff] }
 0x24f   :  { %3446 = vmatprep.subr.bf16.mxu1 %v3445_v10  ;;  %v2065_v63 = vrot.slane %v2064_v43, 2  ;;  %v2267_v10 = vld [vmem:[#allocation2 + $0xb8] sm:$0xff] }
 0x250   :  { %v2114_v55 = vmax.f32 %v2110_v18, %v2111_v39  ;;  %v2167_v9 = vadd.f32 %v2166_v1, %v1960_v45  ;;  %v2012_v58 = vrot.slane %v2011_v57, 2  ;;  %v2254_v39 = vld [vmem:[#allocation2 + $0x50] sm:$0xff]  ;;  %v3457_v18 = vpack.c.bf16 %v2267_v10, %v2263_v22  ;;  %v2287_v23 = vld [vmem:[#allocation2 + $0x158] sm:$0xff] }
 0x251   :  { %v4003_v30 = vpop.eup %4002  ;;  %v2066_v50 = vadd.f32 %v2065_v63, %v2064_v43  ;;  %v3455_v48 = vpack.c.bf16 %v2258_v16, %v2254_v39  ;;  %v2262_v1 = vld [vmem:[#allocation2 + $0x90] sm:$0xff]  ;;  %v2291_v4 = vld [vmem:[#allocation2 + $0x178] sm:$0xff]  ;;  %v2208_v39 = vld [vmem:[%s5906_s3 + $0xe0] sm:$0xff] }
 0x252   :  { %v1866_v52 = vmul.f32 %v4003_v30, %v3079_v6  ;;  %3448 = vmatpush1.bf16.msra.mxu1 %v3447_v41  ;;  %v2013_v54 = vmax.f32 %v2011_v57, %v2012_v58  ;;  %v3459_v13 = vpack.c.bf16 %v2266_v5, %v2262_v1  ;;  %v2270_v6 = vld [vmem:[#allocation2 + $0xd0] sm:$0xff]  ;;  %v2279_v41 = vld [vmem:[#allocation2 + $0x118] sm:$0xff]  ;;  %v2213_v16 = vld [vmem:[%s5906_s3 + $0x108] sm:$0xff] }
 0x253   :  { %v4005_v8 = vpop.eup %4004  ;;  %3450 = vmatprep.subr.bf16.mxu1 %v3449_v17  ;;  %v2067_v33 = vrot.slane %v2066_v50, 1  ;;  %v2283_v30 = vld [vmem:[#allocation2 + $0x138] sm:$0xff]  ;;  %v2302_v58 = vld [vmem:[#allocation2 + $0x1d0] sm:$0xff]  ;;  %v2221_v1 = vld [vmem:[%s5906_s3 + $0x148] sm:$0xff] }
 0x254   :  { %v1962_v40 = vmul.f32 %v1866_v52, %v5591_v24  ;;  %v1864_v21 = vmul.f32 %v4005_v8, %v3078_v51  ;;  %v2014_v26 = vrot.slane %v2013_v54, 1  ;;  %v3465_v52 = vpack.c.bf16 %v2283_v30, %v2279_v41  ;;  %v2278_v51 = vld [vmem:[#allocation2 + $0x110] sm:$0xff]  ;;  %v2299_v57 = vld [vmem:[#allocation2 + $0x1b8] sm:$0xff]  ;;  %v2225_v5 = vld [vmem:[%s5906_s3 + $0x168] sm:$0xff] }
 0x255   :  { %v2282_v8 = vld [vmem:[#allocation2 + $0x130] sm:$0xff] }
 0x256   :  { %v2113_v38 = vmax.f32 %v5660_v28, %v1962_v40  ;;  %v1961_v46 = vmul.f32 %v1864_v21, %v5597_v20  ;;  %v2068_v20 = vadd.f32 %v2067_v33, %v2066_v50  ;;  %v2015_v27 = vmax.f32 %v2013_v54, %v2014_v26  ;;  %v2286_v21 = vld [vmem:[#allocation2 + $0x150] sm:$0xff]  ;;  %v2180_v54 = vld [vmem:[%s5906_s3] sm:$0xff] }
 0x257   :  { %v3467_v43 = vpack.c.bf16 %v2282_v8, %v2278_v51  ;;  %v2192_v26 = vld [vmem:[%s5906_s3 + $0x60] sm:$0xff]  ;;  %v2237_v51 = vld [vmem:[%s5906_s3 + $0x1c8] sm:$0xff] }
 0x258   :  { %v2112_v34 = vmax.f32 %v2108_v60, %v1961_v46  ;;  %v2168_v35 = vadd.f32 %v2167_v9, %v1961_v46  ;;  %v3451_v60 = vpack.c.bf16 %v2250_v44, %v2246_v0  ;;  %v2069_v29 = vmul.f32 0.0026041667, %v2068_v20  ;;  %v2274_v9 = vld [vmem:[#allocation2 + $0xf0] sm:$0xff]  ;;  %v2295_v46 = vld [vmem:[#allocation2 + $0x198] sm:$0xff]  ;;  %v2193_v20 = vld [vmem:[%s5906_s3 + $0x68] sm:$0xff] }
 0x259   :  { %v3463_v17 = vpack.c.bf16 %v2274_v9, %v2270_v6  ;;  %v2188_v44 = vld [vmem:[%s5906_s3 + $0x40] sm:$0xff]  ;;  %v2229_v6 = vld [vmem:[%s5906_s3 + $0x188] sm:$0xff] }
 0x25a   :  { %v2115_v36 = vmax.f32 %v2112_v34, %v2113_v38  ;;  %v2169_v15 = vadd.f32 %v2168_v35, %v1962_v40  ;;  %v3469_v40 = vpack.c.bf16 %v2291_v4, %v2287_v23  ;;  %v2290_v38 = vld [vmem:[#allocation2 + $0x170] sm:$0xff]  ;;  %v3473_v34 = vpack.c.bf16 %v2299_v57, %v2295_v46  ;;  %v2233_v9 = vld [vmem:[%s5906_s3 + $0x1a8] sm:$0xff] }
 0x25b   :  { %v3471_v63 = vpack.c.bf16 %v2290_v38, %v2286_v21  ;;  %v2294_v35 = vld [vmem:[#allocation2 + $0x190] sm:$0xff]  ;;  %v3487_v31 = vpack.c.bf16 %v2192_v26, %v2188_v44  ;;  %v3505_v30 = vpack.c.bf16 %v2233_v9, %v2229_v6  ;;  %v2241_v8 = vld [vmem:[%s5906_s3 + $0x1e8] sm:$0xff]  ;;  %v2183_v21 = vld [vmem:[%s5906_s3 + $0x18] sm:$0xff] }
 0x25c   :  { %v2116_v42 = vmax.f32 %v2114_v55, %v2115_v36  ;;  %v2170_v7 = vrot.slane %v2169_v15, 4  ;;  %v3461_v55 = vpack.c.bf16 %v2275_v56, %v2271_v49  ;;  %v2298_v36 = vld [vmem:[#allocation2 + $0x1b0] sm:$0xff]  ;;  %v3501_v56 = vpack.c.bf16 %v2225_v5, %v2221_v1  ;;  %v2187_v38 = vld [vmem:[%s5906_s3 + $0x38] sm:$0xff]  ;;  %v2658_v6 = vld [vmem:[#allocation5] sm:$0xff] }
 0x25d   :  { %v3509_v4 = vpack.c.bf16 %v2241_v8, %v2237_v51  ;;  %v3513_v57 = vpack.c.bf16 %v2187_v38, %v2183_v21  ;;  %v2219_v44 = vld [vmem:[%s5906_s3 + $0x138] sm:$0xff]  ;;  %v2238_v5 = vld [vmem:[%s5906_s3 + $0x1d0] sm:$0xff]  ;;  %v2662_v38 = vld [vmem:[#allocation5 + $0x20] sm:$0xff] }
 0x25e   :  { %v2117_v12 = vrot.slane %v2116_v42, 4  ;;  %v2171_v24 = vadd.f32 %v2170_v7, %v2169_v15  ;;  %v2303_v15 = vld [vmem:[#allocation2 + $0x1d8] sm:$0xff]  ;;  %v3475_v7 = vpack.c.bf16 %v2298_v36, %v2294_v35  ;;  %v2660_v8 = vld [vmem:[#allocation5 + $0x10] sm:$0xff] }
 0x25f   :  { %v2191_v35 = vld [vmem:[%s5906_s3 + $0x58] sm:$0xff] }
 0x260   :  { %v2118_v37 = vmax.f32 %v2116_v42, %v2117_v12  ;;  %v2172_v3 = vrot.slane %v2171_v24, 2  ;;  %v2307_v42 = vld [vmem:[#allocation2 + $0x1f8] sm:$0xff]  ;;  %v2306_v12 = vld [vmem:[#allocation2 + $0x1f0] sm:$0xff] }
 0x261   :  { %v3477_v50 = vpack.c.bf16 %v2307_v42, %v2303_v15  ;;  %v2195_v36 = vld [vmem:[%s5906_s3 + $0x78] sm:$0xff] }
 0x262   :  { %v2173_v28 = vadd.f32 %v2172_v3, %v2171_v24  ;;  %v2119_v61 = vrot.slane %v2118_v37, 2  ;;  %v2181_v24 = vld [vmem:[%s5906_s3 + $0x8] sm:$0xff]  ;;  %v3479_v3 = vpack.c.bf16 %v2306_v12, %v2302_v58  ;;  %v3517_v42 = vpack.c.bf16 %v2195_v36, %v2191_v35  ;;  %v2199_v58 = vld [vmem:[%s5906_s3 + $0x98] sm:$0xff]  ;;  %v2664_v35 = vld [vmem:[#allocation5 + $0x30] sm:$0xff] }
 0x263   :  { %v2203_v12 = vld [vmem:[%s5906_s3 + $0xb8] sm:$0xff] }
 0x264   :  { %v2174_v59 = vrot.slane %v2173_v28, 1  ;;  %v2120_v25 = vmax.f32 %v2118_v37, %v2119_v61  ;;  %v2185_v37 = vld [vmem:[%s5906_s3 + $0x28] sm:$0xff]  ;;  %v2665_v36 = vld [vmem:[#allocation5 + $0x38] sm:$0xff] }
 0x265   :  { %v3481_v33 = vpack.c.bf16 %v2185_v37, %v2181_v24  ;;  %v2189_v61 = vld [vmem:[%s5906_s3 + $0x48] sm:$0xff]  ;;  %v3521_v37 = vpack.c.bf16 %v2203_v12, %v2199_v58  ;;  %v2666_v58 = vld [vmem:[#allocation5 + $0x40] sm:$0xff] }
 0x266   :  { %v2175_v53 = vadd.f32 %v2174_v59, %v2173_v28  ;;  %v2121_v47 = vrot.slane %v2120_v25, 1  ;;  %v2184_v28 = vld [vmem:[%s5906_s3 + $0x20] sm:$0xff]  ;;  %v3485_v0 = vpack.c.bf16 %v2193_v20, %v2189_v61  ;;  %v2206_v20 = vld [vmem:[%s5906_s3 + $0xd0] sm:$0xff]  ;;  %v2667_v12 = vld [vmem:[#allocation5 + $0x48] sm:$0xff] }
 0x267   :  { %v3483_v59 = vpack.c.bf16 %v2184_v28, %v2180_v54  ;;  %v2207_v54 = vld [vmem:[%s5906_s3 + $0xd8] sm:$0xff] }
 0x268   :  { %v2176_v45 = vmul.f32 0.0026041667, %v2175_v53  ;;  %v2122_v62 = vmax.f32 %v2120_v25, %v2121_v47  ;;  %v2197_v25 = vld [vmem:[%s5906_s3 + $0x88] sm:$0xff]  ;;  %v2196_v47 = vld [vmem:[%s5906_s3 + $0x80] sm:$0xff]  ;;  %v2211_v28 = vld [vmem:[%s5906_s3 + $0xf8] sm:$0xff] }
 0x269   :  { %v2201_v53 = vld [vmem:[%s5906_s3 + $0xa8] sm:$0xff]  ;;  %v3525_v61 = vpack.c.bf16 %v2211_v28, %v2207_v54  ;;  %v2668_v54 = vld [vmem:[#allocation5 + $0x50] sm:$0xff]  ;;  %v2669_v28 = vld [vmem:[#allocation5 + $0x58] sm:$0xff] }
 0x26a   :  { %v5674_v32 = vsel %vm2177_vm4, %v2069_v29, %v2176_v45  ;;  %v5676_v19 = vsel %vm2177_vm4, %v2015_v27, %v2122_v62  ;;  %v3489_v14 = vpack.c.bf16 %v2201_v53, %v2197_v25  ;;  %v2205_v29 = vld [vmem:[%s5906_s3 + $0xc8] sm:$0xff]  ;;  %v2214_v53 = vld [vmem:[%s5906_s3 + $0x110] sm:$0xff] }
 0x26b   :  { %2373 = vmatmul.mubr.f32.vlgmr.msra.gmra.mrb[0].mxu1 %v5674_v32  ;;  %v2209_v45 = vld [vmem:[%s5906_s3 + $0xe8] sm:$0xff] }
 0x26c   :  { %3452 = vmatpush1.bf16.msra.mxu1 %v3451_v60  ;;  %2443 = vmatprep.mubr.f32.mxu1 %v4103_v11  ;;  %v2200_v60 = vld [vmem:[%s5906_s3 + $0xa0] sm:$0xff]  ;;  %v3493_v62 = vpack.c.bf16 %v2209_v45, %v2205_v29  ;;  %v2222_v45 = vld [vmem:[%s5906_s3 + $0x150] sm:$0xff] }
 0x26d   :  { %3454 = vmatprep.subr.bf16.mxu1 %v3453_v2  ;;  %v3491_v27 = vpack.c.bf16 %v2200_v60, %v2196_v47  ;;  %v2204_v2 = vld [vmem:[%s5906_s3 + $0xc0] sm:$0xff]  ;;  %v2227_v47 = vld [vmem:[%s5906_s3 + $0x178] sm:$0xff] }
 0x26e   :  { %v3495_v22 = vpack.c.bf16 %v2208_v39, %v2204_v2  ;;  %v2235_v2 = vld [vmem:[%s5906_s3 + $0x1b8] sm:$0xff] }
 0x270   :  { %3456 = vmatpush1.bf16.msra.mxu1 %v3455_v48  ;;  %v2212_v48 = vld [vmem:[%s5906_s3 + $0x100] sm:$0xff] }
 0x271   :  { %3458 = vmatprep.subr.bf16.mxu1 %v3457_v18  ;;  %v2216_v18 = vld [vmem:[%s5906_s3 + $0x120] sm:$0xff] }
 0x272   :  { %v3499_v49 = vpack.c.bf16 %v2216_v18, %v2212_v48  ;;  %v2243_v48 = vld [vmem:[%s5906_s3 + $0x1f8] sm:$0xff] }
 0x274   :  { %3460 = vmatpush1.bf16.msra.mxu1 %v3459_v13  ;;  %v2220_v13 = vld [vmem:[%s5906_s3 + $0x140] sm:$0xff] }
 0x275   :  { %3462 = vmatprep.subr.bf16.mxu1 %v3461_v55  ;;  %v2224_v55 = vld [vmem:[%s5906_s3 + $0x160] sm:$0xff] }
 0x276   :  { %v3503_v41 = vpack.c.bf16 %v2224_v55, %v2220_v13  ;;  %v2674_v13 = vld [vmem:[#allocation5 + $0x80] sm:$0xff]  ;;  %v2675_v55 = vld [vmem:[#allocation5 + $0x88] sm:$0xff] }
 0x277   :  { %v3545_v9 = vpack.c.bf16 %v2675_v55, %v2674_v13 }
 0x278   :  { %3464 = vmatpush1.bf16.msra.mxu1 %v3463_v17  ;;  %v2228_v17 = vld [vmem:[%s5906_s3 + $0x180] sm:$0xff] }
 0x279   :  { %3466 = vmatprep.subr.bf16.mxu1 %v3465_v52  ;;  %v2232_v52 = vld [vmem:[%s5906_s3 + $0x1a0] sm:$0xff] }
 0x27a   :  { %v3507_v23 = vpack.c.bf16 %v2232_v52, %v2228_v17  ;;  %v2677_v17 = vld [vmem:[#allocation5 + $0x98] sm:$0xff] }
 0x27c   :  { %3468 = vmatpush1.bf16.msra.mxu1 %v3467_v43  ;;  %v2236_v43 = vld [vmem:[%s5906_s3 + $0x1c0] sm:$0xff] }
 0x27d   :  { %3470 = vmatprep.subr.bf16.mxu1 %v3469_v40  ;;  %v2240_v40 = vld [vmem:[%s5906_s3 + $0x1e0] sm:$0xff] }
 0x27e   :  { %v3511_v46 = vpack.c.bf16 %v2240_v40, %v2236_v43  ;;  %v2679_v43 = vld [vmem:[#allocation5 + $0xa8] sm:$0xff] }
 0x280   :  { %3472 = vmatpush1.bf16.msra.mxu1 %v3471_v63  ;;  %v2182_v63 = vld [vmem:[%s5906_s3 + $0x10] sm:$0xff] }
 0x281   :  { %3474 = vmatprep.subr.bf16.mxu1 %v3473_v34  ;;  %v2186_v34 = vld [vmem:[%s5906_s3 + $0x30] sm:$0xff] }
 0x282   :  { %v3515_v15 = vpack.c.bf16 %v2186_v34, %v2182_v63 }
 0x284   :  { %3476 = vmatpush1.bf16.msra.mxu1 %v3475_v7  ;;  %v2190_v7 = vld [vmem:[%s5906_s3 + $0x50] sm:$0xff] }
 0x285   :  { %3478 = vmatprep.subr.bf16.mxu1 %v3477_v50  ;;  %v2194_v50 = vld [vmem:[%s5906_s3 + $0x70] sm:$0xff] }
 0x286   :  { %v3519_v24 = vpack.c.bf16 %v2194_v50, %v2190_v7  ;;  %v3559_v7 = vpack.c.bf16 %v2665_v36, %v2664_v35 }
 0x288   :  { %3480 = vmatpush1.bf16.msra.mxu1 %v3479_v3  ;;  %v2198_v3 = vld [vmem:[%s5906_s3 + $0x90] sm:$0xff] }
 0x289   :  { %3482 = vmatprep.subr.bf16.mxu1 %v3481_v33  ;;  %v2202_v33 = vld [vmem:[%s5906_s3 + $0xb0] sm:$0xff] }
 0x28b   :  { %2444 = vmatmul.mubr.f32.vlgmr.msra.gmra.mrb[2].mxu1 %v5674_v32  ;;  %v2217_v32 = vld [vmem:[%s5906_s3 + $0x128] sm:$0xff] }
 0x28c   :  { %3484 = vmatpush1.bf16.msra.mxu1 %v3483_v59  ;;  %2514 = vmatprep.mubr.f32.mxu1 %v4103_v11  ;;  %v3497_v10 = vpack.c.bf16 %v2217_v32, %v2213_v16  ;;  %v2210_v59 = vld [vmem:[%s5906_s3 + $0xf0] sm:$0xff] }
 0x28d   :  { %3486 = vmatprep.subr.bf16.mxu1 %v3485_v0  ;;  %v2215_v0 = vld [vmem:[%s5906_s3 + $0x118] sm:$0xff]  ;;  %v3527_v26 = vpack.c.bf16 %v2210_v59, %v2206_v20  ;;  %v2230_v32 = vld [vmem:[%s5906_s3 + $0x190] sm:$0xff]  ;;  %v2687_v20 = vld [vmem:[#allocation5 + $0xe8] sm:$0xff] }
 0x28e   :  { %v3529_v25 = vpack.c.bf16 %v2219_v44, %v2215_v0  ;;  %v2670_v59 = vld [vmem:[#allocation5 + $0x60] sm:$0xff]  ;;  %v2671_v44 = vld [vmem:[#allocation5 + $0x68] sm:$0xff] }
 0x290   :  { %3488 = vmatpush1.bf16.msra.mxu1 %v3487_v31  ;;  %v2218_v31 = vld [vmem:[%s5906_s3 + $0x130] sm:$0xff] }
 0x291   :  { %3490 = vmatprep.subr.bf16.mxu1 %v3489_v14  ;;  %v2223_v14 = vld [vmem:[%s5906_s3 + $0x158] sm:$0xff]  ;;  %v3531_v60 = vpack.c.bf16 %v2218_v31, %v2214_v53  ;;  %v3571_v53 = vpack.c.bf16 %v2671_v44, %v2670_v59  ;;  %v2710_v59 = vld [vmem:[#allocation5 + $0x1a0] sm:$0xff] }
 0x292   :  { %v3533_v29 = vpack.c.bf16 %v2227_v47, %v2223_v14  ;;  %v2672_v14 = vld [vmem:[#allocation5 + $0x70] sm:$0xff]  ;;  %v2673_v47 = vld [vmem:[#allocation5 + $0x78] sm:$0xff] }
 0x294   :  { %3492 = vmatpush1.bf16.msra.mxu1 %v3491_v27  ;;  %v2226_v27 = vld [vmem:[%s5906_s3 + $0x170] sm:$0xff] }
 0x295   :  { %3494 = vmatprep.subr.bf16.mxu1 %v3493_v62  ;;  %v2231_v62 = vld [vmem:[%s5906_s3 + $0x198] sm:$0xff]  ;;  %v3535_v39 = vpack.c.bf16 %v2226_v27, %v2222_v45  ;;  %v3575_v45 = vpack.c.bf16 %v2673_v47, %v2672_v14 }
 0x296   :  { %v3537_v16 = vpack.c.bf16 %v2235_v2, %v2231_v62  ;;  %v2594_v62 = vlaneseq  ;;  %v2713_v14 = vld [vmem:[#allocation5 + $0x1b8] sm:$0xff] }
 0x298   :  { %3496 = vmatpush1.bf16.msra.mxu1 %v3495_v22  ;;  %v2234_v22 = vld [vmem:[%s5906_s3 + $0x1b0] sm:$0xff]  ;;  %v2595_v2 = vshrl.u32 %v2594_v62, 7  ;;  %v2715_v62 = vld [vmem:[#allocation5 + $0x1c8] sm:$0xff] }
 0x299   :  { %3498 = vmatprep.subr.bf16.mxu1 %v3497_v10  ;;  %v2239_v10 = vld [vmem:[%s5906_s3 + $0x1d8] sm:$0xff]  ;;  %v3539_v18 = vpack.c.bf16 %v2234_v22, %v2230_v32 }
 0x29a   :  { %v3541_v1 = vpack.c.bf16 %v2243_v48, %v2239_v10  ;;  %v2600_v32 = vsub.s32 1, %v2595_v2 }
 0x29c   :  { %3500 = vmatpush1.bf16.msra.mxu1 %v3499_v49  ;;  %v2242_v49 = vld [vmem:[%s5906_s3 + $0x1f0] sm:$0xff] }
 0x29d   :  { %3502 = vmatprep.subr.bf16.mxu1 %v3501_v56  ;;  %v3543_v56 = vpack.c.bf16 %v2242_v49, %v2238_v5 }
 0x2a0   :  { %3504 = vmatpush1.bf16.msra.mxu1 %v3503_v41  ;;  %v2659_v41 = vld [vmem:[#allocation5 + $0x8] sm:$0xff] }
 0x2a1   :  { %3506 = vmatprep.subr.bf16.mxu1 %v3505_v30  ;;  %v2676_v30 = vld [vmem:[#allocation5 + $0x90] sm:$0xff]  ;;  %v3547_v52 = vpack.c.bf16 %v2659_v41, %v2658_v6 }
 0x2a2   :  { %v3549_v51 = vpack.c.bf16 %v2677_v17, %v2676_v30 }
 0x2a4   :  { %3508 = vmatpush1.bf16.msra.mxu1 %v3507_v23  ;;  %v2661_v23 = vld [vmem:[#allocation5 + $0x18] sm:$0xff] }
 0x2a5   :  { %3510 = vmatprep.subr.bf16.mxu1 %v3509_v4  ;;  %v2678_v4 = vld [vmem:[#allocation5 + $0xa0] sm:$0xff]  ;;  %v3551_v40 = vpack.c.bf16 %v2661_v23, %v2660_v8  ;;  %v2604_v23 = vsub.s32 2, %v2595_v2 }
 0x2a6   :  { %v3553_v21 = vpack.c.bf16 %v2679_v43, %v2678_v4  ;;  %v2608_v4 = vsub.s32 3, %v2595_v2 }
 0x2a8   :  { %3512 = vmatpush1.bf16.msra.mxu1 %v3511_v46  ;;  %v2680_v46 = vld [vmem:[#allocation5 + $0xb0] sm:$0xff] }
 0x2a9   :  { %3514 = vmatprep.subr.bf16.mxu1 %v3513_v57  ;;  %v2681_v57 = vld [vmem:[#allocation5 + $0xb8] sm:$0xff] }
 0x2aa   :  { %v3557_v34 = vpack.c.bf16 %v2681_v57, %v2680_v46 }
 0x2ab   :  { %2515 = vmatmul.mubr.f32.vlgmr.msra.gmra.mrb[0].mxu1 %v5676_v19 }
 0x2ac   :  { %3516 = vmatpush1.bf16.msra.mxu1 %v3515_v15  ;;  %2585 = vmatprep.mubr.f32.mxu1 %v4103_v11  ;;  %v3523_v11 = vpack.c.bf16 %v2202_v33, %v2198_v3  ;;  %v2682_v15 = vld [vmem:[#allocation5 + $0xc0] sm:$0xff]  ;;  %v3563_v3 = vpack.c.bf16 %v2667_v12, %v2666_v58  ;;  %v2708_v12 = vld [vmem:[#allocation5 + $0x190] sm:$0xff] }
 0x2ad   :  { %3518 = vmatprep.subr.bf16.mxu1 %v3517_v42  ;;  %v2683_v42 = vld [vmem:[#allocation5 + $0xc8] sm:$0xff] }
 0x2ae   :  { %v3561_v50 = vpack.c.bf16 %v2683_v42, %v2682_v15  ;;  %v2690_v42 = vld [vmem:[#allocation5 + $0x100] sm:$0xff] }
 0x2b0   :  { %3520 = vmatpush1.bf16.msra.mxu1 %v3519_v24  ;;  %v2684_v24 = vld [vmem:[#allocation5 + $0xd0] sm:$0xff] }
 0x2b1   :  { %3522 = vmatprep.subr.bf16.mxu1 %v3521_v37  ;;  %v2685_v37 = vld [vmem:[#allocation5 + $0xd8] sm:$0xff] }
 0x2b2   :  { %v3565_v33 = vpack.c.bf16 %v2685_v37, %v2684_v24  ;;  %v2709_v24 = vld [vmem:[#allocation5 + $0x198] sm:$0xff] }
 0x2b4   :  { %3524 = vmatpush1.bf16.msra.mxu1 %v3523_v11  ;;  %v3567_v11 = vpack.c.bf16 %v2669_v28, %v2668_v54 }
 0x2b5   :  { %3526 = vmatprep.subr.bf16.mxu1 %v3525_v61  ;;  %v2686_v61 = vld [vmem:[#allocation5 + $0xe0] sm:$0xff] }
 0x2b6   :  { %v3569_v0 = vpack.c.bf16 %v2687_v20, %v2686_v61  ;;  %v2692_v61 = vld [vmem:[#allocation5 + $0x110] sm:$0xff]  ;;  %v2693_v20 = vld [vmem:[#allocation5 + $0x118] sm:$0xff] }
 0x2b7   :  { %v3583_v44 = vpack.c.bf16 %v2693_v20, %v2692_v61 }
 0x2b8   :  { %3528 = vmatpush1.bf16.msra.mxu1 %v3527_v26  ;;  %v2688_v26 = vld [vmem:[#allocation5 + $0xf0] sm:$0xff] }
 0x2b9   :  { %3530 = vmatprep.subr.bf16.mxu1 %v3529_v25  ;;  %v2689_v25 = vld [vmem:[#allocation5 + $0xf8] sm:$0xff] }
 0x2ba   :  { %v3573_v31 = vpack.c.bf16 %v2689_v25, %v2688_v26  ;;  %v2694_v25 = vld [vmem:[#allocation5 + $0x120] sm:$0xff] }
 0x2bc   :  { %3532 = vmatpush1.bf16.msra.mxu1 %v3531_v60  ;;  %v2706_v60 = vld [vmem:[#allocation5 + $0x180] sm:$0xff] }
 0x2bd   :  { %3534 = vmatprep.subr.bf16.mxu1 %v3533_v29  ;;  %v2707_v29 = vld [vmem:[#allocation5 + $0x188] sm:$0xff] }
 0x2be   :  { %v3577_v27 = vpack.c.bf16 %v2707_v29, %v2706_v60  ;;  %v2696_v29 = vld [vmem:[#allocation5 + $0x130] sm:$0xff] }
 0x2c0   :  { %3536 = vmatpush1.bf16.msra.mxu1 %v3535_v39  ;;  %v2596_v39 = vsub.s32 0, %v2595_v2 }
 0x2c1   :  { %3538 = vmatprep.subr.bf16.mxu1 %v3537_v16  ;;  %v2592_v16 = vld [vmem:[%s5908_s5] sm:$0xf] }
 0x2c2   :  { %v2597_v22 = vrot.slane %v2592_v16, %v2596_v39  ;;  %v2601_v10 = vrot.slane %v2592_v16, %v2600_v32  ;;  %v2605_v43 = vrot.slane %v2592_v16, %v2604_v23  ;;  %v2702_v23 = vld [vmem:[#allocation5 + $0x160] sm:$0xff] }
 0x2c4   :  { %3540 = vmatpush1.bf16.msra.mxu1 %v3539_v18 }
 0x2c5   :  { %3542 = vmatprep.subr.bf16.mxu1 %v3541_v1 }
 0x2c8   :  { %3544 = vmatpush1.bf16.msra.mxu1 %v3543_v56 }
 0x2c9   :  { %3546 = vmatprep.subr.bf16.mxu1 %v3545_v9 }
 0x2cb   :  { %2586 = vmatmul.mubr.f32.vlgmr.msra.gmra.mrb[2].mxu1 %v5676_v19  ;;  %v2663_v19 = vld [vmem:[#allocation5 + $0x28] sm:$0xff] }
 0x2cc   :  { %3548 = vmatpush3.bf16.msra.mxu1 %v3547_v52  ;;  %v3555_v63 = vpack.c.bf16 %v2663_v19, %v2662_v38 }
 0x2cd   :  { %3550 = vmatprep.subr.bf16.mxu1 %v3549_v51 }
 0x2d0   :  { %3552 = vmatpush3.bf16.msra.mxu1 %v3551_v40  ;;  %v2609_v40 = vrot.slane %v2592_v16, %v2608_v4  ;;  %v2703_v4 = vld [vmem:[#allocation5 + $0x168] sm:$0xff] }
 0x2d1   :  { %3554 = vmatprep.subr.bf16.mxu1 %v3553_v21 }
 0x2d4   :  { %3556 = vmatpush3.bf16.msra.mxu1 %v3555_v63 }
 0x2d5   :  { %3558 = vmatprep.subr.bf16.mxu1 %v3557_v34 }
 0x2d8   :  { %3560 = vmatpush3.bf16.msra.mxu1 %v3559_v7  ;;  %v2691_v7 = vld [vmem:[#allocation5 + $0x108] sm:$0xff] }
 0x2d9   :  { %3562 = vmatprep.subr.bf16.mxu1 %v3561_v50  ;;  %v3579_v54 = vpack.c.bf16 %v2691_v7, %v2690_v42 }
 0x2dc   :  { %3564 = vmatpush3.bf16.msra.mxu1 %v3563_v3 }
 0x2dd   :  { %3566 = vmatprep.subr.bf16.mxu1 %v3565_v33 }
 0x2e0   :  { %3568 = vmatpush3.bf16.msra.mxu1 %v3567_v11  ;;  %v3581_v11 = vpack.c.bf16 %v2709_v24, %v2708_v12 }
 0x2e1   :  { %3570 = vmatprep.subr.bf16.mxu1 %v3569_v0  ;;  %v2711_v0 = vld [vmem:[#allocation5 + $0x1a8] sm:$0xff] }
 0x2e2   :  { %v3585_v26 = vpack.c.bf16 %v2711_v0, %v2710_v59 }
 0x2e4   :  { %3572 = vmatpush3.bf16.msra.mxu1 %v3571_v53  ;;  %v2695_v53 = vld [vmem:[#allocation5 + $0x128] sm:$0xff] }
 0x2e5   :  { %3574 = vmatprep.subr.bf16.mxu1 %v3573_v31  ;;  %v2712_v31 = vld [vmem:[#allocation5 + $0x1b0] sm:$0xff]  ;;  %v3587_v47 = vpack.c.bf16 %v2695_v53, %v2694_v25 }
 0x2e6   :  { %v3589_v60 = vpack.c.bf16 %v2713_v14, %v2712_v31 }
 0x2e8   :  { %3576 = vmatpush3.bf16.msra.mxu1 %v3575_v45  ;;  %v2697_v45 = vld [vmem:[#allocation5 + $0x138] sm:$0xff] }
 0x2e9   :  { %3578 = vmatprep.subr.bf16.mxu1 %v3577_v27  ;;  %v2714_v27 = vld [vmem:[#allocation5 + $0x1c0] sm:$0xff]  ;;  %v3591_v32 = vpack.c.bf16 %v2697_v45, %v2696_v29 }
 0x37e   :  { %v2516_v48 = vpop.f32.mrb[0].mxu1 }
 0x37f   :  { %v2614_v18 = vadd.f32 %v2597_v22, %v2516_v48  ;;  %v2518_v1 = vpop.f32.mrb[1].mxu1  ;;  %v2698_v48 = vld [vmem:[#allocation5 + $0x140] sm:$0xff] }
 0x380   :  { %v2615_v5 = vadd.f32 %v2601_v10, %v2518_v1  ;;  %v3593_v10 = vpack.c.bf16 %v2715_v62, %v2714_v27 }
 0x381   :  { %v2618_v49 = vmin.f32 %v2614_v18, 20.0 }
 0x382   :  { %v2619_v56 = vmin.f32 %v2615_v5, 20.0 }
 0x383   :  { %v2622_v13 = vmul.f32 1.442695, %v2618_v49  ;;  %v2717_v49 = vld [vmem:[#allocation5 + $0x1d8] sm:$0xff] }
 0x384   :  { %v2624_v55 = vmul.f32 1.442695, %v2619_v56 }
 0x385   :  { %4006 = vpow2.f32 %v2622_v13 }
 0x386   :  { %4008 = vpow2.f32 %v2624_v55 }
 0x38f   :  { %v4007_v6 = vpop.eup %4006 }
 0x390   :  { %v4009_v9 = vpop.eup %4008  ;;  %v2630_v41 = vadd.f32 1.0, %v4007_v6 }
 0x391   :  { %v2631_v30 = vadd.f32 1.0, %v4009_v9 }
 0x392   :  { %v2634_v17 = vmul.f32 %v2630_v41, %v2630_v41  ;;  %v2700_v41 = vld [vmem:[#allocation5 + $0x150] sm:$0xff] }
 0x393   :  { %v2635_v52 = vmul.f32 %v2631_v30, %v2631_v30  ;;  %v2701_v30 = vld [vmem:[#allocation5 + $0x158] sm:$0xff] }
 0x394   :  { %v2642_v51 = vadd.f32 1.0, %v2634_v17  ;;  %v3080_v38 = vadd.f32 -1.0, %v2634_v17  ;;  %v2718_v17 = vld [vmem:[#allocation5 + $0x1e0] sm:$0xff] }
 0x395   :  { %v2643_v8 = vadd.f32 1.0, %v2635_v52  ;;  %v3081_v63 = vadd.f32 -1.0, %v2635_v52  ;;  %v2719_v52 = vld [vmem:[#allocation5 + $0x1e8] sm:$0xff] }
 0x396   :  { %4010 = vrcp.f32 %v2642_v51  ;;  %v3599_v51 = vpack.c.bf16 %v2701_v30, %v2700_v41 }
 0x397   :  { %4012 = vrcp.f32 %v2643_v8  ;;  %v3601_v8 = vpack.c.bf16 %v2719_v52, %v2718_v17 }
 0x39e   :  { %v2587_v21 = vpop.f32.mrb[2].mxu1 }
 0x39f   :  { %v5880_v19 = vadd.f32 %v2605_v43, %v2587_v21  ;;  %v2589_v46 = vpop.f32.mrb[3].mxu1  ;;  %v2720_v43 = vld [vmem:[#allocation5 + $0x1f0] sm:$0xff]  ;;  %v3603_v21 = vpack.c.bf16 %v2703_v4, %v2702_v23 }
 0x3a0   :  { %v4011_v57 = vpop.eup %4010  ;;  %v5882_v34 = vadd.f32 %v2609_v40, %v2589_v46  ;;  %v2721_v40 = vld [vmem:[#allocation5 + $0x1f8] sm:$0xff]  ;;  %v2704_v46 = vld [vmem:[#allocation5 + $0x170] sm:$0xff] }
 0x3a1   :  { %v4013_v35 = vpop.eup %4012  ;;  %v2647_v36 = vmul.f32 %v4011_v57, %v3080_v38  ;;  %v2620_v15 = vmin.f32 %v5880_v19, 20.0  ;;  %v3605_v38 = vpack.c.bf16 %v2721_v40, %v2720_v43  ;;  %v2705_v57 = vld [vmem:[#allocation5 + $0x178] sm:$0xff] }
 0x3a2   :  { %v2649_v50 = vmul.f32 %v4013_v35, %v3081_v63  ;;  %v2621_v58 = vmin.f32 %v5882_v34, 20.0 }
 0x3a3   :  { %v2626_v37 = vmul.f32 1.442695, %v2620_v15  ;;  %v2654_v28 = vmul.f32 %v2647_v36, %v2614_v18  ;;  %v2699_v18 = vld [vmem:[#allocation5 + $0x148] sm:$0xff]  ;;  %v3607_v15 = vpack.c.bf16 %v2705_v57, %v2704_v46 }
 0x3a4   :  { %v2655_v3 = vmul.f32 %v2649_v50, %v2615_v5  ;;  %v2628_v33 = vmul.f32 1.442695, %v2621_v58  ;;  %v2716_v5 = vld [vmem:[#allocation5 + $0x1d0] sm:$0xff]  ;;  %v3595_v55 = vpack.c.bf16 %v2699_v18, %v2698_v48 }
 0x3a5   :  { %4014 = vpow2.f32 %v2626_v37  ;;  %v3597_v9 = vpack.c.bf16 %v2717_v49, %v2716_v5 }
 0x3a6   :  { %4016 = vpow2.f32 %v2628_v33  ;;  %2793 = vmatprep.mubr.f32.mxu1 %v2655_v3  ;;  %v3084_v33 = vld [vmem:[%s5910_s7] ss:$0 sm:$0xff] }
 0x3a7   :  { %2794 = vmatmul.mubr.f32.vlgmr.msra.gmra.mrb[4].mxu1 %v2654_v28 }
 0x3a8   :  { %3580 = vmatpush3.bf16.msra.mxu1 %v3579_v54 }
 0x3a9   :  { %3582 = vmatprep.subr.bf16.mxu1 %v3581_v11 }
 0x3ac   :  { %3584 = vmatpush3.bf16.msra.mxu1 %v3583_v44 }
 0x3ad   :  { %3586 = vmatprep.subr.bf16.mxu1 %v3585_v26 }
 0x3af   :  { %v4015_v2 = vpop.eup %4014 }
 0x3b0   :  { %v4017_v39 = vpop.eup %4016  ;;  %v2632_v16 = vadd.f32 1.0, %v4015_v2  ;;  %3588 = vmatpush3.bf16.msra.mxu1 %v3587_v47 }
 0x3b1   :  { %v2633_v22 = vadd.f32 1.0, %v4017_v39  ;;  %3590 = vmatprep.subr.bf16.mxu1 %v3589_v60 }
 0x3b2   :  { %v2636_v1 = vmul.f32 %v2632_v16, %v2632_v16 }
 0x3b3   :  { %v2637_v56 = vmul.f32 %v2633_v22, %v2633_v22 }
 0x3b4   :  { %v2644_v13 = vadd.f32 1.0, %v2636_v1  ;;  %3592 = vmatpush3.bf16.msra.mxu1 %v3591_v32  ;;  %v3082_v63 = vadd.f32 -1.0, %v2636_v1 }
 0x3b5   :  { %v2645_v6 = vadd.f32 1.0, %v2637_v56  ;;  %3594 = vmatprep.subr.bf16.mxu1 %v3593_v10  ;;  %v3083_v36 = vadd.f32 -1.0, %v2637_v56 }
 0x3b6   :  { %4018 = vrcp.f32 %v2644_v13 }
 0x3b7   :  { %4020 = vrcp.f32 %v2645_v6 }
 0x3b8   :  { %3596 = vmatpush3.bf16.msra.mxu1 %v3595_v55 }
 0x3b9   :  { %3598 = vmatprep.subr.bf16.mxu1 %v3597_v9 }
 0x3bc   :  { %3600 = vmatpush3.bf16.msra.mxu1 %v3599_v51 }
 0x3bd   :  { %3602 = vmatprep.subr.bf16.mxu1 %v3601_v8 }
 0x3c0   :  { %v4019_v35 = vpop.eup %4018  ;;  %3604 = vmatpush3.bf16.msra.mxu1 %v3603_v21 }
 0x3c1   :  { %v4021_v42 = vpop.eup %4020  ;;  %v2651_v7 = vmul.f32 %v4019_v35, %v3082_v63  ;;  %3606 = vmatprep.subr.bf16.mxu1 %v3605_v38 }
 0x3c2   :  { %v2653_v50 = vmul.f32 %v4021_v42, %v3083_v36 }
 0x3c3   :  { %v2656_v12 = vmul.f32 %v2651_v7, %v5880_v19 }
 0x3c4   :  { %v2657_v58 = vmul.f32 %v2653_v50, %v5882_v34  ;;  %3608 = vmatpush3.bf16.msra.mxu1 %v3607_v15 }
 0x3c6   :  { %2863 = vmatprep.mubr.f32.mxu1 %v2657_v58 }
 0x3c7   :  { %2864 = vmatmul.mubr.f32.vlgmr.msra.gmra.mrb[6].mxu1 %v2656_v12 }
 0x47a   :  { %v3217_v24 = vpop.f32.mrb[4].mxu1 }
 0x47b   :  { %v3218_v37 = vpop.f32.mrb[5].mxu1 }
 0x47c   :  { %v3219_v3 = vadd.f32 %v3218_v37, %v3217_v24 }
 0x47e   :  { %v2796_v11 = vadd.f32 %v3219_v3, %v3084_v33 }
 0x49a   :  { %v3252_v54 = vpop.f32.mrb[6].mxu1 }
 0x49b   :  { %v3253_v28 = vpop.f32.mrb[7].mxu1 }
 0x49c   :  { %v3254_v61 = vadd.f32 %v3253_v28, %v3252_v54 }
 0x49e   :  { %v2866_v20 = vadd.f32 %v3254_v61, %v2796_v11 }
 0x4a0   :  { %2869 = vst [vmem:[#allocation7] sm:$0x3] %v2866_v20 }
 0x4a1   :  { %4079 = shalt.err (!%p4076_p6)
}
 0x4a2   :  { %s4080_s7 = scalar_lea.hbm %s5911_s8, 32 }
 0x4a3   :  { %p4081_p7 = scmp.ne.s32.totalorder %s5911_s8, %s4080_s7  ;;  %p4084_p8 = scmp.lt.u32.totalorder %s4080_s7, %s5911_s8 }
 0x4a5   :  { %p4086_p9 = pnand %p4084_p8, %p4081_p7 }
 0x4a7   :  { %4089 = shalt.err (!%p4086_p9)
}
 0x4a8   :  { %2879 = dma.vmem_to_hbm [thread:$0]  %s2877_s0, 32, %s5911_s8, [#allocation4]  }
 0x4a9   :  { %4094 = dma.done.wait [#allocation4], 32  }
 0x4aa   :  { %4095 = vsyncadd [#allocation4], 4294967264 }
 0x4ab   :  { %2883 = vsyncpa [#allocation3], 1 }
 0x4ac   :  { %2884 = vsyncpa [#allocation6], 1 }
 0x4ad   :  { %2885 = vsyncpa [#allocation4], 1 }

</bundles_post_ra>
